<compile_context>
chip_gen: v6e
topology: v6e:2x2x1
jax: 0.10.0
libtpu: 0.0.40
codegen_flags: <defaults>
</compile_context>

<pallas_src>
import functools

import jax
import jax.numpy as jnp
from jax.experimental import pallas as pl
from jax.experimental.pallas import tpu as pltpu


# ------------------------------ fused kernel --------------------------------

def _iram_fused_kernel(p1t_ref, pdt_ref, w1_ref, b1_ref, w23_ref, b23_ref,
                       w4_ref, b4_ref, xres_ref, o_ref, *, inv_tau, n_batch):
    """Whole IRAM forward for the (tiny) batch in one kernel invocation.

    Block shapes (N=2, C1=4, C2=128, H=W=16):
      p1t_ref : (36, 512)  im2col(x)^T                 cols = n*256 + h*W + w
      pdt_ref : (36, 128)  im2col(x_ds)^T              cols = n*64  + sd
      w1_ref  : (128, 36)  conv1 weight (rows = out channel)
      b1_ref  : (128, 1)
      w23_ref : (256, 36)  [w2 even ch; w2 odd ch; w3 even ch; w3 odd ch]
      b23_ref : (256, 1)
      w4_ref  : (4, 128)   Linear(C2->C1) weight (PyTorch layout)
      b4_ref  : (4, 1)
      xres_ref: (4, 512)   residual x, permuted/transposed to the out layout
      o_ref   : (4, 512)   M (transposed/permuted) -> lane-dense stores
    """
    f32 = jnp.float32
    c2 = w1_ref.shape[0]                  # 128
    g = c2 // 2                           # 64  = channel-group size
    sd = pdt_ref.shape[1] // n_batch      # 64  = (H/2)*(W/2)
    n_blocks = p1t_ref.shape[1] // c2     # 4   = psi1 .view(-1,C2) row blocks

    # ---- psi2 & psi3 convs, merged: one (2*C2,36)@(36,N*sd) MXU pass.
    y = jnp.dot(w23_ref[...], pdt_ref[...], preferred_element_type=f32)
    y = jnp.maximum(y + b23_ref[...], 0.0)                # (256, 128)

    # Re-assemble the raw PyTorch .view() layouts from the conv output:
    #   view row n*g + r  <->  (batch n, channel pair 2r / 2r+1).
    def view_gather(base):
        rows = []
        for n in range(n_batch):                          # static unroll (2)
            cols = slice(n * sd, (n + 1) * sd)
            rows.append(jnp.concatenate([y[base:base + g, cols],
                                         y[base + g:base + 2 * g, cols]],
                                        axis=1))          # (g, 2*sd)
        return jnp.concatenate(rows, axis=0)              # (128, 128)

    p2 = view_gather(0)        # == x_psi2.view(C2, -1)
    p3 = view_gather(2 * g)    # == x_psi3.view(-1, C2)

    # ---- Fold the C2->C1 Linear through x_psi3 once (C1 << C2):
    #   relu(W4 @ (probs @ p3)^T + b4) == relu((W4 @ p3^T) @ probs^T + b4)
    w4p3t = jnp.dot(w4_ref[...], p3.T, preferred_element_type=f32)   # (4, 128)

    # ---- psi1 conv: one (C2,36)@(36,N*S) matmul covering every block.
    a1 = jnp.dot(w1_ref[...], p1t_ref[...], preferred_element_type=f32)
    a1 = jnp.maximum(a1 + b1_ref[...], 0.0)               # (128, 512)

    b4 = b4_ref[...]
    for blk in range(n_blocks):                           # static unroll (4)
        cols = slice(blk * c2, (blk + 1) * c2)            # 128-aligned slabs
        q = a1[:, cols]                                   # (128, 128)

        s = jnp.dot(q, p2, preferred_element_type=f32) * inv_tau
        s = s - jnp.max(s, axis=-1, keepdims=True)
        e = jnp.exp(s)
        probs = e / jnp.sum(e, axis=-1, keepdims=True)    # exact divide

        # psi4 applied in the folded/transposed form -> (4, 128) lane-dense tile.
        out_t = jnp.dot(w4p3t, probs.T, preferred_element_type=f32) + b4
        out_t = jnp.maximum(out_t, 0.0)                   # (4, 128)
        o_ref[:, cols] = out_t + xres_ref[:, cols]


# ------------------------------ host wrapper --------------------------------

def _im2col_T(x_nchw):
    """3x3 / pad-1 patches, transposed: (Cin*9, N*H*W).

    Row k = c*9 + kh*3 + kw matches w.reshape(Cout, Cin*9) flattening;
    column index = n*H*W + h*W + w.  (~90 KB total here - negligible glue.)
    """
    n, c, h, w = x_nchw.shape
    xp = jnp.pad(x_nchw, ((0, 0), (0, 0), (1, 1), (1, 1)))
    taps = jnp.stack([xp[:, :, kh:kh + h, kw:kw + w]
                      for kh in range(3) for kw in range(3)], axis=2)
    return jnp.transpose(taps, (1, 2, 0, 3, 4)).reshape(c * 9, n * h * w)


@functools.partial(jax.jit, static_argnames=("C2", "tau"))
def iram_forward(x, params, C2=128, tau=128):
    N, C1, H, W = x.shape
    S = H * W
    if not (N == 2 and H % 2 == 0 and W % 2 == 0 and S % C2 == 0
            and N * (H // 2) * (W // 2) == C2 and C2 % 2 == 0):
        raise NotImplementedError(
            "fused IRAM kernel is specialised to N=2, C2=128, H=W=16")

    f32 = jnp.float32
    xf = x.astype(f32)

    # im2col inputs (transposed so the conv matmuls emit .view()-layout rows).
    p1t = _im2col_T(xf)                              # (36, 512)
    x_ds = xf[:, :, ::2, ::2]                        # nearest, scale 0.5
    pdt = _im2col_T(x_ds)                            # (36, 128)

    # Weight / bias packing.
    w1f = params["w1"].reshape(C2, C1 * 9).astype(f32)
    b1c = params["b1"].reshape(C2, 1).astype(f32)
    w2f = params["w2"].reshape(C2, C1 * 9).astype(f32)
    w3f = params["w3"].reshape(C2, C1 * 9).astype(f32)
    w23 = jnp.concatenate([w2f[0::2], w2f[1::2], w3f[0::2], w3f[1::2]], axis=0)
    b23 = jnp.concatenate([params["b2"][0::2], params["b2"][1::2],
                           params["b3"][0::2], params["b3"][1::2]]
                          ).reshape(2 * C2, 1).astype(f32)
    w4 = params["w4"].astype(f32)                    # (C1, C2)
    b4c = params["b4"].reshape(C1, 1).astype(f32)

    # Residual x, reindexed to the kernel's (C1, n*S + s_hi*C2 + c) layout.
    xres_t = jnp.transpose(xf.reshape(N, C2, S // C2, C1),
                           (3, 0, 2, 1)).reshape(C1, N * S)

    sd_total = N * (H // 2) * (W // 2)               # 128
    kern = functools.partial(_iram_fused_kernel,
                             inv_tau=1.0 / float(tau), n_batch=N)
    mt = pl.pallas_call(
        kern,
        out_shape=jax.ShapeDtypeStruct((C1, N * S), f32),
        grid=(1,),                                   # everything fits in VMEM
        in_specs=[
            pl.BlockSpec((C1 * 9, N * S), lambda i: (0, 0)),     # p1t
            pl.BlockSpec((C1 * 9, sd_total), lambda i: (0, 0)),  # pdt
            pl.BlockSpec((C2, C1 * 9), lambda i: (0, 0)),        # w1
            pl.BlockSpec((C2, 1), lambda i: (0, 0)),             # b1
            pl.BlockSpec((2 * C2, C1 * 9), lambda i: (0, 0)),    # w23
            pl.BlockSpec((2 * C2, 1), lambda i: (0, 0)),         # b23
            pl.BlockSpec((C1, C2), lambda i: (0, 0)),            # w4
            pl.BlockSpec((C1, 1), lambda i: (0, 0)),             # b4
            pl.BlockSpec((C1, N * S), lambda i: (0, 0)),         # residual
        ],
        out_specs=pl.BlockSpec((C1, N * S), lambda i: (0, 0)),
        compiler_params=pltpu.CompilerParams(
            dimension_semantics=("arbitrary",)),
    )(p1t, pdt, w1f, b1c, w23, b23, w4, b4c, xres_t)

    # Undo the kernel-side row permutation / transpose (8 KB, one XLA copy).
    M = jnp.transpose(mt.reshape(C1, N, S // C2, C2),
                      (1, 3, 2, 0)).reshape(N, C1, H, W)
    return M, x


# --------------------------- pure-JAX reference ------------------------------

def _reference_forward(x, params, C2, tau):
    def conv_relu(inp, w, b):
        out = jax.lax.conv_general_dilated(
            inp, w, window_strides=(1, 1), padding=((1, 1), (1, 1)),
            dimension_numbers=("NCHW", "OIHW", "NCHW"),
            precision=jax.lax.Precision.HIGHEST)
        return jnp.maximum(out + b[None, :, None, None], 0.0)

    hi = jax.lax.Precision.HIGHEST
    x_psi1 = conv_relu(x, params["w1"], params["b1"]).reshape(-1, C2)
    x_ds = x[:, :, ::2, ::2]
    x_psi2 = conv_relu(x_ds, params["w2"], params["b2"]).reshape(C2, -1)
    x_psi3 = conv_relu(x_ds, params["w3"], params["b3"]).reshape(-1, C2)
    s = jnp.dot(x_psi1, x_psi2, precision=hi) / tau
    p = jax.nn.softmax(s, axis=1)
    ctx = jnp.dot(p, x_psi3, precision=hi)
    out = jnp.maximum(jnp.dot(ctx, params["w4"].T, precision=hi)
                      + params["b4"], 0.0)
    return out.reshape(x.shape) + x, x


# ---------------------------------- main -------------------------------------

if __name__ == "__main__":
    N, C1, H, W = 2, 4, 16, 16
    C2, tau = 128, 128

    key = jax.random.PRNGKey(0)
    ks = jax.random.split(key, 9)

    def uniform_init(k, shape, fan_in):
        bound = 1.0 / float(fan_in) ** 0.5
        return jax.random.uniform(k, shape, jnp.float32, -bound, bound)

    params = {
        # Conv2d weights: (Cout, Cin, 3, 3); biases: (Cout,)
        "w1": uniform_init(ks[0], (C2, C1, 3, 3), C1 * 9),
        "b1": uniform_init(ks[1], (C2,), C1 * 9),
        "w2": uniform_init(ks[2], (C2, C1, 3, 3), C1 * 9),
        "b2": uniform_init(ks[3], (C2,), C1 * 9),
        "w3": uniform_init(ks[4], (C2, C1, 3, 3), C1 * 9),
        "b3": uniform_init(ks[5], (C2,), C1 * 9),
        # Linear(C2, C1): weight (C1, C2), bias (C1,)
        "w4": uniform_init(ks[6], (C1, C2), C2),
        "b4": uniform_init(ks[7], (C1,), C2),
    }
    x = jax.random.normal(ks[8], (N, C1, H, W), jnp.float32)

    M, x_out = iram_forward(x, params, C2=C2, tau=tau)
    jax.block_until_ready(M)
    jax.block_until_ready(x_out)

    assert M.shape == (N, C1, H, W) and x_out.shape == (N, C1, H, W)

    # Numerical check of the fused kernel against an independent XLA reference.
    M_ref, _ = _reference_forward(x, params, C2, tau)
    max_err = float(jnp.max(jnp.abs(M - M_ref)))
    assert max_err < 2e-2, f"mismatch vs reference, max abs err = {max_err}"

    print("KERNEL_OK")
</pallas_src>

<mosaic_0001>
module attributes {stable_mosaic.version = 11 : i64} {
  func.func @_iram_fused_kernel(%arg0: i32, %arg1: memref<36x512xf32, #tpu.memory_space<vmem>>, %arg2: memref<36x128xf32, #tpu.memory_space<vmem>>, %arg3: memref<128x36xf32, #tpu.memory_space<vmem>>, %arg4: memref<128x1xf32, #tpu.memory_space<vmem>>, %arg5: memref<256x36xf32, #tpu.memory_space<vmem>>, %arg6: memref<256x1xf32, #tpu.memory_space<vmem>>, %arg7: memref<4x128xf32, #tpu.memory_space<vmem>>, %arg8: memref<4x1xf32, #tpu.memory_space<vmem>>, %arg9: memref<4x512xf32, #tpu.memory_space<vmem>>, %arg10: memref<4x512xf32, #tpu.memory_space<vmem>>) attributes {dimension_semantics = [#tpu.dimension_semantics<arbitrary>], iteration_bounds = array<i64: 1>, scalar_prefetch = 0 : i64, scratch_operands = 0 : i64, tpu.core_type = #tpu.core_type<tc>, window_params = [{pipeline_mode = #tpu.pipeline_mode<synchronous>, transform_indices = @transform_0, window_bounds = array<i64: 36, 512>}, {pipeline_mode = #tpu.pipeline_mode<synchronous>, transform_indices = @transform_1, window_bounds = array<i64: 36, 128>}, {pipeline_mode = #tpu.pipeline_mode<synchronous>, transform_indices = @transform_2, window_bounds = array<i64: 128, 36>}, {pipeline_mode = #tpu.pipeline_mode<synchronous>, transform_indices = @transform_3, window_bounds = array<i64: 128, 1>}, {pipeline_mode = #tpu.pipeline_mode<synchronous>, transform_indices = @transform_4, window_bounds = array<i64: 256, 36>}, {pipeline_mode = #tpu.pipeline_mode<synchronous>, transform_indices = @transform_5, window_bounds = array<i64: 256, 1>}, {pipeline_mode = #tpu.pipeline_mode<synchronous>, transform_indices = @transform_6, window_bounds = array<i64: 4, 128>}, {pipeline_mode = #tpu.pipeline_mode<synchronous>, transform_indices = @transform_7, window_bounds = array<i64: 4, 1>}, {pipeline_mode = #tpu.pipeline_mode<synchronous>, transform_indices = @transform_8, window_bounds = array<i64: 4, 512>}, {pipeline_mode = #tpu.pipeline_mode<synchronous>, transform_indices = @transform_9, window_bounds = array<i64: 4, 512>}]} {
    %c0 = arith.constant 0 : index
    %c0_0 = arith.constant 0 : index
    %0 = vector.load %arg5[%c0, %c0_0] : memref<256x36xf32, #tpu.memory_space<vmem>>, vector<256x36xf32>
    %c0_1 = arith.constant 0 : index
    %c0_2 = arith.constant 0 : index
    %1 = vector.load %arg2[%c0_1, %c0_2] : memref<36x128xf32, #tpu.memory_space<vmem>>, vector<36x128xf32>
    %cst = arith.constant dense<0.000000e+00> : vector<256x128xf32>
    %2 = tpu.matmul %0, %1, %cst {dimension_numbers = #tpu.dot_dimension_numbers<[1], [0], [0], [1], [0, 0, 1, 1], [], []>} : vector<256x36xf32>, vector<36x128xf32>, vector<256x128xf32> -> vector<256x128xf32>
    %c0_3 = arith.constant 0 : index
    %c0_4 = arith.constant 0 : index
    %3 = vector.load %arg6[%c0_3, %c0_4] : memref<256x1xf32, #tpu.memory_space<vmem>>, vector<256x1xf32>
    %4 = vector.broadcast %3 : vector<256x1xf32> to vector<256x128xf32>
    %5 = arith.addf %2, %4 : vector<256x128xf32>
    %cst_5 = arith.constant 0.000000e+00 : f32
    %6 = vector.broadcast %cst_5 : f32 to vector<256x128xf32>
    %7 = arith.maximumf %5, %6 : vector<256x128xf32>
    %8 = vector.extract_strided_slice %7 {offsets = [0, 0], sizes = [64, 64], strides = [1, 1]} : vector<256x128xf32> to vector<64x64xf32>
    %9 = vector.extract_strided_slice %7 {offsets = [64, 0], sizes = [64, 64], strides = [1, 1]} : vector<256x128xf32> to vector<64x64xf32>
    %10 = tpu.concatenate %8, %9 in 1 : vector<64x64xf32>, vector<64x64xf32> -> vector<64x128xf32>
    %11 = vector.extract_strided_slice %7 {offsets = [0, 64], sizes = [64, 64], strides = [1, 1]} : vector<256x128xf32> to vector<64x64xf32>
    %12 = vector.extract_strided_slice %7 {offsets = [64, 64], sizes = [64, 64], strides = [1, 1]} : vector<256x128xf32> to vector<64x64xf32>
    %13 = tpu.concatenate %11, %12 in 1 : vector<64x64xf32>, vector<64x64xf32> -> vector<64x128xf32>
    %14 = tpu.concatenate %10, %13 in 0 : vector<64x128xf32>, vector<64x128xf32> -> vector<128x128xf32>
    %15 = vector.extract_strided_slice %7 {offsets = [128, 0], sizes = [64, 64], strides = [1, 1]} : vector<256x128xf32> to vector<64x64xf32>
    %16 = vector.extract_strided_slice %7 {offsets = [192, 0], sizes = [64, 64], strides = [1, 1]} : vector<256x128xf32> to vector<64x64xf32>
    %17 = tpu.concatenate %15, %16 in 1 : vector<64x64xf32>, vector<64x64xf32> -> vector<64x128xf32>
    %18 = vector.extract_strided_slice %7 {offsets = [128, 64], sizes = [64, 64], strides = [1, 1]} : vector<256x128xf32> to vector<64x64xf32>
    %19 = vector.extract_strided_slice %7 {offsets = [192, 64], sizes = [64, 64], strides = [1, 1]} : vector<256x128xf32> to vector<64x64xf32>
    %20 = tpu.concatenate %18, %19 in 1 : vector<64x64xf32>, vector<64x64xf32> -> vector<64x128xf32>
    %21 = tpu.concatenate %17, %20 in 0 : vector<64x128xf32>, vector<64x128xf32> -> vector<128x128xf32>
    %c0_6 = arith.constant 0 : index
    %c0_7 = arith.constant 0 : index
    %22 = vector.load %arg7[%c0_6, %c0_7] : memref<4x128xf32, #tpu.memory_space<vmem>>, vector<4x128xf32>
    %23 = tpu.transpose %21, [1, 0] : vector<128x128xf32> -> vector<128x128xf32>
    %cst_8 = arith.constant dense<0.000000e+00> : vector<4x128xf32>
    %24 = tpu.matmul %22, %23, %cst_8 {dimension_numbers = #tpu.dot_dimension_numbers<[1], [0], [0], [1], [0, 0, 1, 1], [], []>} : vector<4x128xf32>, vector<128x128xf32>, vector<4x128xf32> -> vector<4x128xf32>
    %c0_9 = arith.constant 0 : index
    %c0_10 = arith.constant 0 : index
    %25 = vector.load %arg3[%c0_9, %c0_10] : memref<128x36xf32, #tpu.memory_space<vmem>>, vector<128x36xf32>
    %c0_11 = arith.constant 0 : index
    %c0_12 = arith.constant 0 : index
    %26 = vector.load %arg1[%c0_11, %c0_12] : memref<36x512xf32, #tpu.memory_space<vmem>>, vector<36x512xf32>
    %cst_13 = arith.constant dense<0.000000e+00> : vector<128x512xf32>
    %27 = tpu.matmul %25, %26, %cst_13 {dimension_numbers = #tpu.dot_dimension_numbers<[1], [0], [0], [1], [0, 0, 1, 1], [], []>} : vector<128x36xf32>, vector<36x512xf32>, vector<128x512xf32> -> vector<128x512xf32>
    %c0_14 = arith.constant 0 : index
    %c0_15 = arith.constant 0 : index
    %28 = vector.load %arg4[%c0_14, %c0_15] : memref<128x1xf32, #tpu.memory_space<vmem>>, vector<128x1xf32>
    %29 = vector.broadcast %28 : vector<128x1xf32> to vector<128x512xf32>
    %30 = arith.addf %27, %29 : vector<128x512xf32>
    %cst_16 = arith.constant 0.000000e+00 : f32
    %31 = vector.broadcast %cst_16 : f32 to vector<128x512xf32>
    %32 = arith.maximumf %30, %31 : vector<128x512xf32>
    %c0_17 = arith.constant 0 : index
    %c0_18 = arith.constant 0 : index
    %33 = vector.load %arg8[%c0_17, %c0_18] : memref<4x1xf32, #tpu.memory_space<vmem>>, vector<4x1xf32>
    %34 = vector.extract_strided_slice %32 {offsets = [0, 0], sizes = [128, 128], strides = [1, 1]} : vector<128x512xf32> to vector<128x128xf32>
    %cst_19 = arith.constant dense<0.000000e+00> : vector<128x128xf32>
    %35 = tpu.matmul %34, %14, %cst_19 {dimension_numbers = #tpu.dot_dimension_numbers<[1], [0], [0], [1], [0, 0, 1, 1], [], []>} : vector<128x128xf32>, vector<128x128xf32>, vector<128x128xf32> -> vector<128x128xf32>
    %cst_20 = arith.constant 7.812500e-03 : f32
    %36 = vector.broadcast %cst_20 : f32 to vector<128x128xf32>
    %37 = arith.mulf %35, %36 : vector<128x128xf32>
    %cst_21 = arith.constant dense<0xFF800000> : vector<128xf32>
    %38 = vector.multi_reduction <maximumf>, %37, %cst_21 [1] : vector<128x128xf32> to vector<128xf32>
    %39 = vector.shape_cast %38 : vector<128xf32> to vector<128x1xf32>
    %40 = vector.broadcast %39 : vector<128x1xf32> to vector<128x128xf32>
    %41 = arith.subf %37, %40 : vector<128x128xf32>
    %42 = math.exp %41 : vector<128x128xf32>
    %cst_22 = arith.constant dense<0.000000e+00> : vector<128xf32>
    %43 = vector.multi_reduction <add>, %42, %cst_22 [1] : vector<128x128xf32> to vector<128xf32>
    %44 = vector.shape_cast %43 : vector<128xf32> to vector<128x1xf32>
    %45 = vector.broadcast %44 : vector<128x1xf32> to vector<128x128xf32>
    %46 = arith.divf %42, %45 : vector<128x128xf32>
    %47 = tpu.transpose %46, [1, 0] : vector<128x128xf32> -> vector<128x128xf32>
    %cst_23 = arith.constant dense<0.000000e+00> : vector<4x128xf32>
    %48 = tpu.matmul %24, %47, %cst_23 {dimension_numbers = #tpu.dot_dimension_numbers<[1], [0], [0], [1], [0, 0, 1, 1], [], []>} : vector<4x128xf32>, vector<128x128xf32>, vector<4x128xf32> -> vector<4x128xf32>
    %49 = vector.broadcast %33 : vector<4x1xf32> to vector<4x128xf32>
    %50 = arith.addf %48, %49 : vector<4x128xf32>
    %cst_24 = arith.constant 0.000000e+00 : f32
    %51 = vector.broadcast %cst_24 : f32 to vector<4x128xf32>
    %52 = arith.maximumf %50, %51 : vector<4x128xf32>
    %c0_25 = arith.constant 0 : index
    %c0_26 = arith.constant 0 : index
    %53 = vector.load %arg9[%c0_25, %c0_26] : memref<4x512xf32, #tpu.memory_space<vmem>>, vector<4x128xf32>
    %54 = arith.addf %52, %53 : vector<4x128xf32>
    %c0_27 = arith.constant 0 : index
    %c0_28 = arith.constant 0 : index
    %55 = vector.load %arg10[%c0_27, %c0_28] : memref<4x512xf32, #tpu.memory_space<vmem>>, vector<4x128xf32>
    tpu.vector_store %arg10[%c0_27, %c0_28], %54 {strides = array<i32>} : memref<4x512xf32, #tpu.memory_space<vmem>>, vector<4x128xf32>,
    %56 = vector.extract_strided_slice %32 {offsets = [0, 128], sizes = [128, 128], strides = [1, 1]} : vector<128x512xf32> to vector<128x128xf32>
    %cst_29 = arith.constant dense<0.000000e+00> : vector<128x128xf32>
    %57 = tpu.matmul %56, %14, %cst_29 {dimension_numbers = #tpu.dot_dimension_numbers<[1], [0], [0], [1], [0, 0, 1, 1], [], []>} : vector<128x128xf32>, vector<128x128xf32>, vector<128x128xf32> -> vector<128x128xf32>
    %cst_30 = arith.constant 7.812500e-03 : f32
    %58 = vector.broadcast %cst_30 : f32 to vector<128x128xf32>
    %59 = arith.mulf %57, %58 : vector<128x128xf32>
    %cst_31 = arith.constant dense<0xFF800000> : vector<128xf32>
    %60 = vector.multi_reduction <maximumf>, %59, %cst_31 [1] : vector<128x128xf32> to vector<128xf32>
    %61 = vector.shape_cast %60 : vector<128xf32> to vector<128x1xf32>
    %62 = vector.broadcast %61 : vector<128x1xf32> to vector<128x128xf32>
    %63 = arith.subf %59, %62 : vector<128x128xf32>
    %64 = math.exp %63 : vector<128x128xf32>
    %cst_32 = arith.constant dense<0.000000e+00> : vector<128xf32>
    %65 = vector.multi_reduction <add>, %64, %cst_32 [1] : vector<128x128xf32> to vector<128xf32>
    %66 = vector.shape_cast %65 : vector<128xf32> to vector<128x1xf32>
    %67 = vector.broadcast %66 : vector<128x1xf32> to vector<128x128xf32>
    %68 = arith.divf %64, %67 : vector<128x128xf32>
    %69 = tpu.transpose %68, [1, 0] : vector<128x128xf32> -> vector<128x128xf32>
    %cst_33 = arith.constant dense<0.000000e+00> : vector<4x128xf32>
    %70 = tpu.matmul %24, %69, %cst_33 {dimension_numbers = #tpu.dot_dimension_numbers<[1], [0], [0], [1], [0, 0, 1, 1], [], []>} : vector<4x128xf32>, vector<128x128xf32>, vector<4x128xf32> -> vector<4x128xf32>
    %71 = vector.broadcast %33 : vector<4x1xf32> to vector<4x128xf32>
    %72 = arith.addf %70, %71 : vector<4x128xf32>
    %cst_34 = arith.constant 0.000000e+00 : f32
    %73 = vector.broadcast %cst_34 : f32 to vector<4x128xf32>
    %74 = arith.maximumf %72, %73 : vector<4x128xf32>
    %c0_35 = arith.constant 0 : index
    %c128 = arith.constant 128 : index
    %75 = vector.load %arg9[%c0_35, %c128] : memref<4x512xf32, #tpu.memory_space<vmem>>, vector<4x128xf32>
    %76 = arith.addf %74, %75 : vector<4x128xf32>
    %c0_36 = arith.constant 0 : index
    %c128_37 = arith.constant 128 : index
    %77 = vector.load %arg10[%c0_36, %c128_37] : memref<4x512xf32, #tpu.memory_space<vmem>>, vector<4x128xf32>
    tpu.vector_store %arg10[%c0_36, %c128_37], %76 {strides = array<i32>} : memref<4x512xf32, #tpu.memory_space<vmem>>, vector<4x128xf32>,
    %78 = vector.extract_strided_slice %32 {offsets = [0, 256], sizes = [128, 128], strides = [1, 1]} : vector<128x512xf32> to vector<128x128xf32>
    %cst_38 = arith.constant dense<0.000000e+00> : vector<128x128xf32>
    %79 = tpu.matmul %78, %14, %cst_38 {dimension_numbers = #tpu.dot_dimension_numbers<[1], [0], [0], [1], [0, 0, 1, 1], [], []>} : vector<128x128xf32>, vector<128x128xf32>, vector<128x128xf32> -> vector<128x128xf32>
    %cst_39 = arith.constant 7.812500e-03 : f32
    %80 = vector.broadcast %cst_39 : f32 to vector<128x128xf32>
    %81 = arith.mulf %79, %80 : vector<128x128xf32>
    %cst_40 = arith.constant dense<0xFF800000> : vector<128xf32>
    %82 = vector.multi_reduction <maximumf>, %81, %cst_40 [1] : vector<128x128xf32> to vector<128xf32>
    %83 = vector.shape_cast %82 : vector<128xf32> to vector<128x1xf32>
    %84 = vector.broadcast %83 : vector<128x1xf32> to vector<128x128xf32>
    %85 = arith.subf %81, %84 : vector<128x128xf32>
    %86 = math.exp %85 : vector<128x128xf32>
    %cst_41 = arith.constant dense<0.000000e+00> : vector<128xf32>
    %87 = vector.multi_reduction <add>, %86, %cst_41 [1] : vector<128x128xf32> to vector<128xf32>
    %88 = vector.shape_cast %87 : vector<128xf32> to vector<128x1xf32>
    %89 = vector.broadcast %88 : vector<128x1xf32> to vector<128x128xf32>
    %90 = arith.divf %86, %89 : vector<128x128xf32>
    %91 = tpu.transpose %90, [1, 0] : vector<128x128xf32> -> vector<128x128xf32>
    %cst_42 = arith.constant dense<0.000000e+00> : vector<4x128xf32>
    %92 = tpu.matmul %24, %91, %cst_42 {dimension_numbers = #tpu.dot_dimension_numbers<[1], [0], [0], [1], [0, 0, 1, 1], [], []>} : vector<4x128xf32>, vector<128x128xf32>, vector<4x128xf32> -> vector<4x128xf32>
    %93 = vector.broadcast %33 : vector<4x1xf32> to vector<4x128xf32>
    %94 = arith.addf %92, %93 : vector<4x128xf32>
    %cst_43 = arith.constant 0.000000e+00 : f32
    %95 = vector.broadcast %cst_43 : f32 to vector<4x128xf32>
    %96 = arith.maximumf %94, %95 : vector<4x128xf32>
    %c0_44 = arith.constant 0 : index
    %c256 = arith.constant 256 : index
    %97 = vector.load %arg9[%c0_44, %c256] : memref<4x512xf32, #tpu.memory_space<vmem>>, vector<4x128xf32>
    %98 = arith.addf %96, %97 : vector<4x128xf32>
    %c0_45 = arith.constant 0 : index
    %c256_46 = arith.constant 256 : index
    %99 = vector.load %arg10[%c0_45, %c256_46] : memref<4x512xf32, #tpu.memory_space<vmem>>, vector<4x128xf32>
    tpu.vector_store %arg10[%c0_45, %c256_46], %98 {strides = array<i32>} : memref<4x512xf32, #tpu.memory_space<vmem>>, vector<4x128xf32>,
    %100 = vector.extract_strided_slice %32 {offsets = [0, 384], sizes = [128, 128], strides = [1, 1]} : vector<128x512xf32> to vector<128x128xf32>
    %cst_47 = arith.constant dense<0.000000e+00> : vector<128x128xf32>
    %101 = tpu.matmul %100, %14, %cst_47 {dimension_numbers = #tpu.dot_dimension_numbers<[1], [0], [0], [1], [0, 0, 1, 1], [], []>} : vector<128x128xf32>, vector<128x128xf32>, vector<128x128xf32> -> vector<128x128xf32>
    %cst_48 = arith.constant 7.812500e-03 : f32
    %102 = vector.broadcast %cst_48 : f32 to vector<128x128xf32>
    %103 = arith.mulf %101, %102 : vector<128x128xf32>
    %cst_49 = arith.constant dense<0xFF800000> : vector<128xf32>
    %104 = vector.multi_reduction <maximumf>, %103, %cst_49 [1] : vector<128x128xf32> to vector<128xf32>
    %105 = vector.shape_cast %104 : vector<128xf32> to vector<128x1xf32>
    %106 = vector.broadcast %105 : vector<128x1xf32> to vector<128x128xf32>
    %107 = arith.subf %103, %106 : vector<128x128xf32>
    %108 = math.exp %107 : vector<128x128xf32>
    %cst_50 = arith.constant dense<0.000000e+00> : vector<128xf32>
    %109 = vector.multi_reduction <add>, %108, %cst_50 [1] : vector<128x128xf32> to vector<128xf32>
    %110 = vector.shape_cast %109 : vector<128xf32> to vector<128x1xf32>
    %111 = vector.broadcast %110 : vector<128x1xf32> to vector<128x128xf32>
    %112 = arith.divf %108, %111 : vector<128x128xf32>
    %113 = tpu.transpose %112, [1, 0] : vector<128x128xf32> -> vector<128x128xf32>
    %cst_51 = arith.constant dense<0.000000e+00> : vector<4x128xf32>
    %114 = tpu.matmul %24, %113, %cst_51 {dimension_numbers = #tpu.dot_dimension_numbers<[1], [0], [0], [1], [0, 0, 1, 1], [], []>} : vector<4x128xf32>, vector<128x128xf32>, vector<4x128xf32> -> vector<4x128xf32>
    %115 = vector.broadcast %33 : vector<4x1xf32> to vector<4x128xf32>
    %116 = arith.addf %114, %115 : vector<4x128xf32>
    %cst_52 = arith.constant 0.000000e+00 : f32
    %117 = vector.broadcast %cst_52 : f32 to vector<4x128xf32>
    %118 = arith.maximumf %116, %117 : vector<4x128xf32>
    %c0_53 = arith.constant 0 : index
    %c384 = arith.constant 384 : index
    %119 = vector.load %arg9[%c0_53, %c384] : memref<4x512xf32, #tpu.memory_space<vmem>>, vector<4x128xf32>
    %120 = arith.addf %118, %119 : vector<4x128xf32>
    %c0_54 = arith.constant 0 : index
    %c384_55 = arith.constant 384 : index
    %121 = vector.load %arg10[%c0_54, %c384_55] : memref<4x512xf32, #tpu.memory_space<vmem>>, vector<4x128xf32>
    tpu.vector_store %arg10[%c0_54, %c384_55], %120 {strides = array<i32>} : memref<4x512xf32, #tpu.memory_space<vmem>>, vector<4x128xf32>,
    return
  }
  func.func @transform_0(%arg0: i32) -> (i32, i32) {
    %c0_i32 = arith.constant 0 : i32
    %c0_i32_0 = arith.constant 0 : i32
    %c0_i32_1 = arith.constant 0 : i32
    return %c0_i32, %c0_i32_0 : i32, i32
  }
  func.func @transform_1(%arg0: i32) -> (i32, i32) {
    %c0_i32 = arith.constant 0 : i32
    %c0_i32_0 = arith.constant 0 : i32
    %c0_i32_1 = arith.constant 0 : i32
    return %c0_i32, %c0_i32_0 : i32, i32
  }
  func.func @transform_2(%arg0: i32) -> (i32, i32) {
    %c0_i32 = arith.constant 0 : i32
    %c0_i32_0 = arith.constant 0 : i32
    %c0_i32_1 = arith.constant 0 : i32
    return %c0_i32, %c0_i32_0 : i32, i32
  }
  func.func @transform_3(%arg0: i32) -> (i32, i32) {
    %c0_i32 = arith.constant 0 : i32
    %c0_i32_0 = arith.constant 0 : i32
    %c0_i32_1 = arith.constant 0 : i32
    return %c0_i32, %c0_i32_0 : i32, i32
  }
  func.func @transform_4(%arg0: i32) -> (i32, i32) {
    %c0_i32 = arith.constant 0 : i32
    %c0_i32_0 = arith.constant 0 : i32
    %c0_i32_1 = arith.constant 0 : i32
    return %c0_i32, %c0_i32_0 : i32, i32
  }
  func.func @transform_5(%arg0: i32) -> (i32, i32) {
    %c0_i32 = arith.constant 0 : i32
    %c0_i32_0 = arith.constant 0 : i32
    %c0_i32_1 = arith.constant 0 : i32
    return %c0_i32, %c0_i32_0 : i32, i32
  }
  func.func @transform_6(%arg0: i32) -> (i32, i32) {
    %c0_i32 = arith.constant 0 : i32
    %c0_i32_0 = arith.constant 0 : i32
    %c0_i32_1 = arith.constant 0 : i32
    return %c0_i32, %c0_i32_0 : i32, i32
  }
  func.func @transform_7(%arg0: i32) -> (i32, i32) {
    %c0_i32 = arith.constant 0 : i32
    %c0_i32_0 = arith.constant 0 : i32
    %c0_i32_1 = arith.constant 0 : i32
    return %c0_i32, %c0_i32_0 : i32, i32
  }
  func.func @transform_8(%arg0: i32) -> (i32, i32) {
    %c0_i32 = arith.constant 0 : i32
    %c0_i32_0 = arith.constant 0 : i32
    %c0_i32_1 = arith.constant 0 : i32
    return %c0_i32, %c0_i32_0 : i32, i32
  }
  func.func @transform_9(%arg0: i32) -> (i32, i32) {
    %c0_i32 = arith.constant 0 : i32
    %c0_i32_0 = arith.constant 0 : i32
    %c0_i32_1 = arith.constant 0 : i32
    return %c0_i32, %c0_i32_0 : i32, i32
  }
}

</mosaic_0001>

<bundles_post_ra>
// kernel: iram_forward.1
= control target key start
LH: loop header
LB: loop body
LE: loop exit
PB: predicated region body
PF: predicated region fallthrough
CT: control target
= control target key end

     0   :  { %vm358_vm0 = vcmask 1043456   ;;  %vm261_vm1 = vcmask 293888   ;;  %v4003_v2 = vmov 0   ;;  %v6036_v60 = vmov 0.0   ;;  %s6012_s1 = inlined_call_operand.vmem [shape: f32[36,128], index: 1, kind: input, shape index: {}]   ;;  %s6013_s4 = inlined_call_operand.vmem [shape: f32[256,36], index: 4, kind: input, shape index: {}]   ;;  %s6014_s5 = inlined_call_operand.vmem [shape: f32[256,1], index: 5, kind: input, shape index: {}]   ;;  %s6015_s0 = inlined_call_operand.vmem [shape: f32[36,512], index: 0, kind: input, shape index: {}]   ;;  %s6016_s2 = inlined_call_operand.vmem [shape: f32[128,36], index: 2, kind: input, shape index: {}]   ;;  %s6017_s6 = inlined_call_operand.vmem [shape: f32[4,128], index: 6, kind: input, shape index: {}]   ;;  %s6018_s3 = inlined_call_operand.vmem [shape: f32[128,1], index: 3, kind: input, shape index: {}]   ;;  %s6019_s7 = inlined_call_operand.vmem [shape: f32[4,1], index: 7, kind: input, shape index: {}]   ;;  %s6020_s8 = inlined_call_operand.vmem [shape: f32[4,512], index: 8, kind: input, shape index: {}]   ;;  %s6021_s9 = inlined_call_operand.vmem [shape: f32[4,512], index: 9, kind: output, shape index: {}]  }
   0x1   :  { %v68_v0 = vld [vmem:[%s6012_s1 + $0x20] sm:$0xf]  ;;  %v67_v1 = vld [vmem:[%s6012_s1 + $0x18] sm:$0xff]  ;;  %3745 = vset.pattern.permute.xlu0 %v4003_v2  ;;  %3746 = vset.pattern.permute.xlu1 %v4003_v2  ;;  %v66_v4 = vld [vmem:[%s6012_s1 + $0x10] sm:$0xff]  ;;  %vm4006_vm2 = vmmov 0   ;;  %vm651_vm3 = vcmask 523264  }
   0x2   :  { %3274 = vmatprep.subr.msk.mxu0 %vm358_vm0, %v68_v0  ;;  %v32_v3 = vld [vmem:[%s6013_s4] sm:$0xff]  ;;  %v65_v5 = vld [vmem:[%s6012_s1 + $0x8] sm:$0xff]  ;;  %v34_v8 = vld [vmem:[%s6013_s4 + $0x10] sm:$0xff]  ;;  %1173 = vmatprep.mubr.f32.mxu1 %v6036_v60 }
   0x3   :  { %3275 = vmatpush3.msk.msra.mxu0 %vm358_vm0, %v68_v0  ;;  %3284 = vmatprep.mubr.msk.f32.mxu0 %vm261_vm1, %v32_v3  ;;  %v64_v6 = vld [vmem:[%s6012_s1] sm:$0xff]  ;;  %v33_v7 = vld [vmem:[%s6013_s4 + $0x8] sm:$0xff]  ;;  %v35_v9 = vld [vmem:[%s6013_s4 + $0x18] sm:$0xff]  ;;  %s4005_s1 = smov 64  }
   0x4   :  { %3276 = vmatprep.subr.mxu0 %v67_v1  ;;  %v92_v10 = vld [vmem:[%s6014_s5 + $0xb8] sm:$0xff]  ;;  %v36_v11 = vld [vmem:[%s6013_s4 + $0x20] sm:$0xff]  ;;  %v90_v12 = vld [vmem:[%s6014_s5 + $0xa8] sm:$0xff] }
   0x5   :  { %3277 = vmatpush3.msra.mxu0 %v67_v1  ;;  %218 = vperm.xlu0 %3745, %v92_v10   ;;  %v91_v13 = vld [vmem:[%s6014_s5 + $0xb0] sm:$0xff]  ;;  %v89_v14 = vld [vmem:[%s6014_s5 + $0xa0] sm:$0xff]  ;;  %v37_v15 = vld [vmem:[%s6013_s4 + $0x28] sm:$0xff] }
   0x6   :  { %3278 = vmatprep.subr.mxu0 %v66_v4  ;;  %208 = vperm.xlu1 %3746, %v90_v12   ;;  %v38_v16 = vld [vmem:[%s6013_s4 + $0x30] sm:$0xff]  ;;  %v88_v17 = vld [vmem:[%s6014_s5 + $0x98] sm:$0xff]  ;;  %v40_v20 = vld [vmem:[%s6013_s4 + $0x40] sm:$0xff] }
   0x7   :  { %3279 = vmatpush3.msra.mxu0 %v66_v4  ;;  %v87_v18 = vld [vmem:[%s6014_s5 + $0x90] sm:$0xff]  ;;  %v39_v19 = vld [vmem:[%s6013_s4 + $0x38] sm:$0xff]  ;;  %v86_v21 = vld [vmem:[%s6014_s5 + $0x88] sm:$0xff] }
   0x8   :  { %3280 = vmatprep.subr.mxu0 %v65_v5  ;;  %v85_v22 = vld [vmem:[%s6014_s5 + $0x80] sm:$0xff]  ;;  %v41_v23 = vld [vmem:[%s6013_s4 + $0x48] sm:$0xff]  ;;  %v42_v24 = vld [vmem:[%s6013_s4 + $0x50] sm:$0xff] }
   0x9   :  { %3281 = vmatpush3.msra.mxu0 %v65_v5  ;;  %213 = vperm.xlu0 %3745, %v91_v13   ;;  %v100_v25 = vld [vmem:[%s6014_s5 + $0xf8] sm:$0xff]  ;;  %v99_v26 = vld [vmem:[%s6014_s5 + $0xf0] sm:$0xff]  ;;  %v44_v28 = vld [vmem:[%s6013_s4 + $0x60] sm:$0xff] }
   0xa   :  { %3282 = vmatprep.subr.mxu0 %v64_v6  ;;  %203 = vperm.xlu1 %3746, %v89_v14   ;;  %v43_v27 = vld [vmem:[%s6013_s4 + $0x58] sm:$0xff]  ;;  %v98_v29 = vld [vmem:[%s6014_s5 + $0xe8] sm:$0xff]  ;;  %v97_v30 = vld [vmem:[%s6014_s5 + $0xe0] sm:$0xff] }
   0xb   :  { %3283 = vmatpush3.msra.mxu0 %v64_v6  ;;  %v45_v31 = vld [vmem:[%s6013_s4 + $0x68] sm:$0xff]  ;;  %v46_v32 = vld [vmem:[%s6013_s4 + $0x70] sm:$0xff]  ;;  %v96_v33 = vld [vmem:[%s6014_s5 + $0xd8] sm:$0xff] }
   0xc   :  { %3285 = vmatmul.mubr.msk.f32.vlgmr.msra.gmra.mxu0 %vm261_vm1, %v33_v7  ;;  %v95_v34 = vld [vmem:[%s6014_s5 + $0xd0] sm:$0xff]  ;;  %v47_v35 = vld [vmem:[%s6013_s4 + $0x78] sm:$0xff]  ;;  %v48_v36 = vld [vmem:[%s6013_s4 + $0x80] sm:$0xff]  ;;  %3332 = vmatprep.subr.mxu0 %v6036_v60 }
   0xd   :  { %3287 = vmatprep.mubr.msk.f32.mxu0 %vm261_vm1, %v34_v8  ;;  %198 = vperm.xlu0 %3745, %v88_v17   ;;  %v94_v37 = vld [vmem:[%s6014_s5 + $0xc8] sm:$0xff]  ;;  %v93_v38 = vld [vmem:[%s6014_s5 + $0xc0] sm:$0xff]  ;;  %v50_v40 = vld [vmem:[%s6013_s4 + $0x90] sm:$0xff] }
   0xe   :  { %193 = vperm.xlu1 %3746, %v87_v18   ;;  %v49_v39 = vld [vmem:[%s6013_s4 + $0x88] sm:$0xff]  ;;  %v51_v41 = vld [vmem:[%s6013_s4 + $0x98] sm:$0xff]  ;;  %v52_v42 = vld [vmem:[%s6013_s4 + $0xa0] sm:$0xff] }
   0xf   :  { %v53_v43 = vld [vmem:[%s6013_s4 + $0xa8] sm:$0xff]  ;;  %v54_v44 = vld [vmem:[%s6013_s4 + $0xb0] sm:$0xff]  ;;  %v55_v45 = vld [vmem:[%s6013_s4 + $0xb8] sm:$0xff] }
  0x10   :  { %3288 = vmatmul.mubr.msk.f32.gmra.mxu0 %vm261_vm1, %v35_v9  ;;  %v56_v46 = vld [vmem:[%s6013_s4 + $0xc0] sm:$0xff]  ;;  %v57_v47 = vld [vmem:[%s6013_s4 + $0xc8] sm:$0xff]  ;;  %v58_v48 = vld [vmem:[%s6013_s4 + $0xd0] sm:$0xff] }
  0x11   :  { %3290 = vmatprep.mubr.msk.f32.mxu0 %vm261_vm1, %v36_v11  ;;  %188 = vperm.xlu0 %3745, %v86_v21   ;;  %v59_v49 = vld [vmem:[%s6013_s4 + $0xd8] sm:$0xff]  ;;  %v60_v50 = vld [vmem:[%s6013_s4 + $0xe0] sm:$0xff]  ;;  %v61_v51 = vld [vmem:[%s6013_s4 + $0xe8] sm:$0xff] }
  0x12   :  { %183 = vperm.xlu1 %3746, %v85_v22   ;;  %v62_v52 = vld [vmem:[%s6013_s4 + $0xf0] sm:$0xff]  ;;  %v63_v53 = vld [vmem:[%s6013_s4 + $0xf8] sm:$0xff]  ;;  %v4253_v54 = vld [vmem:[%s6015_s0 + $0x88] sm:$0xf] }
  0x13   :  { %3731 = vmatprep.subr.msk.mxu1 %vm358_vm0, %v4253_v54  ;;  %v4260_v55 = vld [vmem:[%s6015_s0 + $0x80] sm:$0xf]  ;;  %v4267_v56 = vld [vmem:[%s6015_s0 + $0x68] sm:$0xff]  ;;  %v4315_v1 = vld [vmem:[%s6016_s2 + $0x58] sm:$0xff] }
  0x14   :  { %3291 = vmatmul.mubr.msk.f32.gmra.mxu0 %vm261_vm1, %v37_v15  ;;  %3736 = vmatpush1.msk.msra.mxu1 %vm358_vm0, %v4260_v55  ;;  %v4272_v57 = vld [vmem:[%s6015_s0 + $0x60] sm:$0xff]  ;;  %v4277_v58 = vld [vmem:[%s6015_s0 + $0x48] sm:$0xff]  ;;  %v886_v2 = vld [vmem:[%s6015_s0 + $0x98] sm:$0xf] }
  0x15   :  { %3293 = vmatprep.mubr.msk.f32.mxu0 %vm261_vm1, %v38_v16  ;;  %258 = vperm.xlu0 %3745, %v100_v25   ;;  %v4283_v59 = vld [vmem:[%s6015_s0 + $0x40] sm:$0xff]  ;;  %v4290_v61 = vld [vmem:[%s6015_s0 + $0x28] sm:$0xff]  ;;  %v885_v3 = vld [vmem:[%s6015_s0 + $0x90] sm:$0xf] }
  0x16   :  { %253 = vperm.xlu1 %3746, %v99_v26   ;;  %3732 = vmatprep.subr.mxu1 %v4267_v56  ;;  %v4297_v62 = vld [vmem:[%s6015_s0 + $0x20] sm:$0xff]  ;;  %v4303_v63 = vld [vmem:[%s6015_s0 + $0x8] sm:$0xff]  ;;  %v882_v4 = vld [vmem:[%s6015_s0 + $0x78] sm:$0xff] }
  0x17   :  { %3737 = vmatpush1.msra.mxu1 %v4272_v57  ;;  %v4309_v0 = vld [vmem:[%s6015_s0] sm:$0xff]  ;;  %v881_v5 = vld [vmem:[%s6015_s0 + $0x70] sm:$0xff]  ;;  %v878_v7 = vld [vmem:[%s6015_s0 + $0x58] sm:$0xff] }
  0x18   :  { %3294 = vmatmul.mubr.msk.f32.gmra.mxu0 %vm261_vm1, %v39_v19  ;;  %3733 = vmatprep.subr.mxu1 %v4277_v58  ;;  %v4338_v6 = vld [vmem:[%s6016_s2 + $0x60] sm:$0xff]  ;;  %v877_v8 = vld [vmem:[%s6015_s0 + $0x50] sm:$0xff]  ;;  %v874_v9 = vld [vmem:[%s6015_s0 + $0x38] sm:$0xff] }
  0x19   :  { %3296 = vmatprep.mubr.msk.f32.mxu0 %vm261_vm1, %v40_v20  ;;  %248 = vperm.xlu0 %3745, %v98_v29   ;;  %v873_v10 = vld [vmem:[%s6015_s0 + $0x30] sm:$0xff]  ;;  %v4359_v11 = vld [vmem:[%s6016_s2 + $0x68] sm:$0xff]  ;;  %v870_v12 = vld [vmem:[%s6015_s0 + $0x18] sm:$0xff] }
  0x1a   :  { %243 = vperm.xlu1 %3746, %v97_v30   ;;  %3738 = vmatpush1.msra.mxu1 %v4283_v59  ;;  %v869_v13 = vld [vmem:[%s6015_s0 + $0x10] sm:$0xff]  ;;  %v4388_v18 = vld [vmem:[%s6016_s2 + $0x78] sm:$0xff]  ;;  %v4400_v21 = vld [vmem:[%s6016_s2] sm:$0xff] }
  0x1b   :  { %3734 = vmatprep.subr.mxu1 %v4290_v61  ;;  %v4375_v15 = vld [vmem:[%s6016_s2 + $0x70] sm:$0xff]  ;;  %v4436_v30 = vld [vmem:[%s6016_s2 + $0x18] sm:$0xff] }
  0x1c   :  { %3297 = vmatmul.mubr.msk.f32.gmra.mxu0 %vm261_vm1, %v41_v23  ;;  %3739 = vmatpush1.msra.mxu1 %v4297_v62 }
  0x1d   :  { %3299 = vmatprep.mubr.msk.f32.mxu0 %vm261_vm1, %v42_v24  ;;  %238 = vperm.xlu0 %3745, %v96_v33   ;;  %v4412_v24 = vld [vmem:[%s6016_s2 + $0x8] sm:$0xff]  ;;  %v4448_v33 = vld [vmem:[%s6016_s2 + $0x20] sm:$0xff] }
  0x1e   :  { %233 = vperm.xlu1 %3746, %v95_v34   ;;  %3735 = vmatprep.subr.mxu1 %v4303_v63 }
  0x1f   :  { %3740 = vmatpush1.msra.mxu1 %v4309_v0 }
  0x20   :  { %3300 = vmatmul.mubr.msk.f32.gmra.mxu0 %vm261_vm1, %v43_v27  ;;  %3001 = vmatmul.mubr.msk.f32.vlgmr.msra.gmra.mxu1 %vm261_vm1, %v4315_v1  ;;  %v4424_v27 = vld [vmem:[%s6016_s2 + $0x10] sm:$0xff] }
  0x21   :  { %3302 = vmatprep.mubr.msk.f32.mxu0 %vm261_vm1, %v44_v28  ;;  %228 = vperm.xlu0 %3745, %v94_v37   ;;  %v4460_v37 = vld [vmem:[%s6016_s2 + $0x28] sm:$0xff] }
  0x22   :  { %223 = vperm.xlu1 %3746, %v93_v38   ;;  %3006 = vmatprep.subr.msk.mxu1 %vm358_vm0, %v886_v2 }
  0x23   :  { %1179 = vmatprep.mubr.f32.mxu1 %v6036_v60  ;;  %3007 = vmatpush1.msk.msra.mxu1 %vm358_vm0, %v885_v3 }
  0x24   :  { %3303 = vmatmul.mubr.msk.f32.gmra.mxu0 %vm261_vm1, %v45_v31  ;;  %1228 = vmatprep.subr.mxu1 %v882_v4 }
  0x25   :  { %3305 = vmatprep.mubr.msk.f32.mxu0 %vm261_vm1, %v46_v32  ;;  %1229 = vmatpush1.msra.mxu1 %v881_v5 }
  0x26   :  { %3002 = vmatmul.mubr.msk.f32.gmra.mxu1 %vm261_vm1, %v4338_v6  ;;  %1230 = vmatprep.subr.mxu1 %v878_v7 }
  0x27   :  { %1185 = vmatprep.mubr.f32.mxu1 %v6036_v60  ;;  %1231 = vmatpush1.msra.mxu1 %v877_v8 }
  0x28   :  { %3306 = vmatmul.mubr.msk.f32.gmra.mxu0 %vm261_vm1, %v47_v35  ;;  %1232 = vmatprep.subr.mxu1 %v874_v9  ;;  %v4501_v9 = vld [vmem:[%s6016_s2 + $0x48] sm:$0xff] }
  0x29   :  { %3308 = vmatprep.mubr.msk.f32.mxu0 %vm261_vm1, %v48_v36  ;;  %1233 = vmatpush1.msra.mxu1 %v873_v10  ;;  %6080 = vst [vmem:[#allocation4_spill] sm:$0xff] %v4501_v9 }
  0x2a   :  { %3003 = vmatmul.mubr.msk.f32.gmra.mxu1 %vm261_vm1, %v4359_v11  ;;  %1234 = vmatprep.subr.mxu1 %v870_v12 }
  0x2b   :  { %1191 = vmatprep.mubr.f32.mxu1 %v6036_v60  ;;  %1235 = vmatpush1.msra.mxu1 %v869_v13 }
  0x2c   :  { %3309 = vmatmul.mubr.msk.f32.gmra.mxu0 %vm261_vm1, %v49_v39  ;;  %3423 = vmatprep.subr.mxu1 %v6036_v60 }
  0x2d   :  { %3311 = vmatprep.mubr.msk.f32.mxu0 %vm261_vm1, %v50_v40 }
  0x2e   :  { %3004 = vmatmul.mubr.msk.f32.gmra.mxu1 %vm261_vm1, %v4375_v15 }
  0x2f   :  { %1197 = vmatprep.mubr.f32.mxu1 %v6036_v60 }
  0x30   :  { %3312 = vmatmul.mubr.msk.f32.gmra.mxu0 %vm261_vm1, %v51_v41 }
  0x31   :  { %3314 = vmatprep.mubr.msk.f32.mxu0 %vm261_vm1, %v52_v42 }
  0x32   :  { %3005 = vmatmul.mubr.msk.f32.gmra.mxu1 %vm261_vm1, %v4388_v18 }
  0x33   :  { %1268 = vmatprep.mubr.f32.mxu1 %v6036_v60 }
  0x34   :  { %3315 = vmatmul.mubr.msk.f32.gmra.mxu0 %vm261_vm1, %v53_v43  ;;  %v4470_v43 = vld [vmem:[%s6016_s2 + $0x30] sm:$0xff] }
  0x35   :  { %3317 = vmatprep.mubr.msk.f32.mxu0 %vm261_vm1, %v54_v44 }
  0x36   :  { %3008 = vmatmul.mubr.msk.f32.vlgmr.msra.gmra.mxu1 %vm261_vm1, %v4400_v21 }
  0x37   :  { %1274 = vmatprep.mubr.f32.mxu1 %v6036_v60 }
  0x38   :  { %3318 = vmatmul.mubr.msk.f32.gmra.mxu0 %vm261_vm1, %v55_v45 }
  0x39   :  { %3320 = vmatprep.mubr.msk.f32.mxu0 %vm261_vm1, %v56_v46 }
  0x3a   :  { %3009 = vmatmul.mubr.msk.f32.gmra.mxu1 %vm261_vm1, %v4412_v24 }
  0x3b   :  { %1280 = vmatprep.mubr.f32.mxu1 %v6036_v60 }
  0x3c   :  { %3321 = vmatmul.mubr.msk.f32.gmra.mxu0 %vm261_vm1, %v57_v47 }
  0x3d   :  { %3323 = vmatprep.mubr.msk.f32.mxu0 %vm261_vm1, %v58_v48  ;;  %v4478_v48 = vld [vmem:[%s6016_s2 + $0x38] sm:$0xff] }
  0x3e   :  { %3010 = vmatmul.mubr.msk.f32.gmra.mxu1 %vm261_vm1, %v4424_v27  ;;  %6078 = vst [vmem:[#allocation2_spill] sm:$0xff] %v4478_v48 }
  0x3f   :  { %1286 = vmatprep.mubr.f32.mxu1 %v6036_v60 }
  0x40   :  { %3324 = vmatmul.mubr.msk.f32.gmra.mxu0 %vm261_vm1, %v59_v49 }
  0x41   :  { %3326 = vmatprep.mubr.msk.f32.mxu0 %vm261_vm1, %v60_v50 }
  0x42   :  { %3011 = vmatmul.mubr.msk.f32.gmra.mxu1 %vm261_vm1, %v4436_v30 }
  0x43   :  { %1292 = vmatprep.mubr.f32.mxu1 %v6036_v60 }
  0x44   :  { %3327 = vmatmul.mubr.msk.f32.gmra.mxu0 %vm261_vm1, %v61_v51 }
  0x45   :  { %3329 = vmatprep.mubr.msk.f32.mxu0 %vm261_vm1, %v62_v52  ;;  %v4486_v52 = vld [vmem:[%s6016_s2 + $0x40] sm:$0xff] }
  0x46   :  { %3012 = vmatmul.mubr.msk.f32.gmra.mxu1 %vm261_vm1, %v4448_v33  ;;  %6079 = vst [vmem:[#allocation3_spill] sm:$0xff] %v4486_v52 }
  0x47   :  { %1298 = vmatprep.mubr.f32.mxu1 %v6036_v60 }
  0x48   :  { %3330 = vmatmul.mubr.msk.f32.gmra.mxu0 %vm261_vm1, %v63_v53 }
  0x49   :  { %3364 = vmatprep.mubr.msk.f32.mxu0 %vm4006_vm2, %v6036_v60 }
  0x4a   :  { %3013 = vmatmul.mubr.msk.f32.gmra.mxu1 %vm261_vm1, %v4460_v37 }
  0x4b   :  { %1304 = vmatprep.mubr.f32.mxu1 %v6036_v60 }
  0x4e   :  { %3014 = vmatmul.mubr.msk.f32.gmra.mxu1 %vm261_vm1, %v4470_v43 }
  0x4f   :  { %1310 = vmatprep.mubr.f32.mxu1 %v6036_v60 }
  0x52   :  { %3015 = vmatmul.mubr.msk.f32.gmra.mxu1 %vm261_vm1, %v4478_v48 }
  0x53   :  { %1316 = vmatprep.mubr.f32.mxu1 %v6036_v60 }
  0x56   :  { %3016 = vmatmul.mubr.msk.f32.gmra.mxu1 %vm261_vm1, %v4486_v52 }
  0x57   :  { %1322 = vmatprep.mubr.f32.mxu1 %v6036_v60 }
  0x5a   :  { %3017 = vmatmul.mubr.msk.f32.gmra.mxu1 %vm261_vm1, %v4501_v9 }
  0x5b   :  { %1328 = vmatprep.mubr.f32.mxu1 %v6036_v60 }
  0x80   :  { %v219_v35 = vpop.permute.xlu0 %218 }
  0x81   :  { %v209_v38 = vpop.permute.xlu1 %208 }
  0x84   :  { %v214_v41 = vpop.permute.xlu0 %213 }
  0x85   :  { %v204_v44 = vpop.permute.xlu1 %203 }
  0x88   :  { %v199_v47 = vpop.permute.xlu0 %198 }
  0x89   :  { %v194_v50 = vpop.permute.xlu1 %193 }
  0x8c   :  { %v189_v2 = vpop.permute.xlu0 %188 }
  0x8d   :  { %v184_v10 = vpop.permute.xlu1 %183 }
  0xcc   :  { %v4367_v14 = vpop.f32.mrf.mxu0 }
  0xce   :  { %v4377_v16 = vpop.f32.mrf.mxu0 }
  0xd0   :  { %v4380_v17 = vpop.f32.mrf.mxu0 }
  0xd2   :  { %v4390_v19 = vpop.f32.mrf.mxu0 }
  0xd4   :  { %v4392_v20 = vpop.f32.mrf.mxu0 }
  0xd6   :  { %v4402_v22 = vpop.f32.mrf.mxu0 }
  0xd8   :  { %v4404_v23 = vpop.f32.mrf.mxu0 }
  0xda   :  { %v4414_v25 = vpop.f32.mrf.mxu0 }
  0xdc   :  { %v4416_v26 = vpop.f32.mrf.mxu0 }
  0xde   :  { %v4426_v28 = vpop.f32.mrf.mxu0 }
  0xe0   :  { %v4428_v29 = vpop.f32.mrf.mxu0 }
  0xe2   :  { %v4438_v31 = vpop.f32.mrf.mxu0 }
  0xe4   :  { %v4440_v32 = vpop.f32.mrf.mxu0 }
  0xe6   :  { %v4450_v34 = vpop.f32.mrf.mxu0 }
  0xe8   :  { %v4452_v36 = vpop.f32.mrf.mxu0 }
  0xea   :  { %v4462_v39 = vpop.f32.mrf.mxu0 }
  0xec   :  { %v3310_v40 = vpop.f32.mrf.mxu0 }
  0xee   :  { %v508_v42 = vpop.f32.mrf.mxu0 }
  0xf0   :  { %v3313_v45 = vpop.f32.mrf.mxu0 }
  0xf2   :  { %v518_v46 = vpop.f32.mrf.mxu0 }
  0xf4   :  { %v3316_v49 = vpop.f32.mrf.mxu0 }
  0xf5   :  { %v4493_v5 = vadd.f32 %v3316_v49, %v209_v38  ;;  %v4514_v49 = vadd.f32 %v3313_v45, %v199_v47 }
  0xf6   :  { %v528_v51 = vpop.f32.mrf.mxu0 }
  0xf7   :  { %v4507_v13 = vadd.f32 %v528_v51, %v204_v44  ;;  %v4523_v44 = vld [vmem:[%s6016_s2 + $0x50] sm:$0xff]  ;;  %v254_v51 = vpop.permute.xlu1 %253  ;;  %v6028_v9 = vmax.f32 %v4514_v49, 0.0 }
  0xf8   :  { %v3319_v53 = vpop.f32.mrf.mxu0  ;;  %6081 = vst [vmem:[#allocation5_spill] sm:$0xff] %v4523_v44  ;;  %3018 = vmatmul.mubr.msk.f32.gmra.mxu1 %vm261_vm1, %v4523_v44 }
  0xf9   :  { %v4490_v3 = vadd.f32 %v3319_v53, %v219_v35  ;;  %v6026_v53 = vmax.f32 %v4493_v5, 0.0  ;;  %v6029_v45 = vmax.f32 %v4507_v13, 0.0  ;;  %1334 = vmatprep.mubr.f32.mxu1 %v6036_v60 }
  0xfa   :  { %v538_v4 = vpop.f32.mrf.mxu0 }
  0xfb   :  { %v6022_v7 = vmax.f32 %v4490_v3, 0.0  ;;  %v4496_v8 = vadd.f32 %v538_v4, %v214_v41  ;;  %v259_v41 = vpop.permute.xlu0 %258 }
  0xfc   :  { %v4503_v12 = vpop.f32.mrf.mxu0  ;;  %3019 = vmatmul.mubr.msk.f32.gmra.mxu1 %vm261_vm1, %v4315_v1 }
  0xfd   :  { %v6023_v35 = vmax.f32 %v4496_v8, 0.0  ;;  %762 = vrot.lane.b32.xlu0 %v6022_v7, %s4005_s1  ;;  %v4527_v7 = vadd.f32 %v518_v46, %v194_v50  ;;  %v4542_v46 = vadd.f32 %v508_v42, %v184_v10  ;;  %1340 = vmatprep.mubr.f32.mxu1 %v6036_v60 }
  0xfe   :  { %v548_v38 = vpop.f32.mrf.mxu0 }
  0xff   :  { %760 = vrot.lane.b32.xlu1 %v6023_v35, %s4005_s1  ;;  %v4534_v35 = vadd.f32 %v3310_v40, %v189_v2  ;;  %v249_v50 = vpop.permute.xlu0 %248  ;;  %v244_v40 = vpop.permute.xlu1 %243  ;;  %v6033_v42 = vmax.f32 %v4542_v46, 0.0 }
 0x100   :  { %v3325_v4 = vpop.f32.mrf.mxu0  ;;  %3020 = vmatmul.mubr.msk.f32.gmra.mxu1 %vm261_vm1, %v4338_v6 }
 0x101   :  { %758 = vrot.lane.b32.xlu0 %v6026_v53, %s4005_s1  ;;  %v6031_v53 = vmax.f32 %v4527_v7, 0.0  ;;  %v6032_v52 = vmax.f32 %v4534_v35, 0.0  ;;  %1346 = vmatprep.mubr.f32.mxu1 %v6036_v60 }
 0x102   :  { %v558_v47 = vpop.f32.mrf.mxu0 }
 0x103   :  { %756 = vrot.lane.b32.xlu1 %v6029_v45, %s4005_s1  ;;  %v239_v6 = vpop.permute.xlu0 %238 }
 0x104   :  { %v3328_v44 = vpop.f32.mrf.mxu0  ;;  %3021 = vmatmul.mubr.msk.f32.gmra.mxu1 %vm261_vm1, %v4359_v11 }
 0x105   :  { %754 = vrot.lane.b32.xlu0 %v6028_v9, %s4005_s1  ;;  %v4562_v45 = vadd.f32 %v3328_v44, %v249_v50  ;;  %1352 = vmatprep.mubr.f32.mxu1 %v6036_v60 }
 0x106   :  { %v568_v2 = vpop.f32.mrf.mxu0 }
 0x107   :  { %752 = vrot.lane.b32.xlu1 %v6031_v53, %s4005_s1  ;;  %v616_v44 = vmax.f32 %v4562_v45, 0.0 }
 0x108   :  { %v3331_v1 = vpop.f32.mrf.mxu0  ;;  %3022 = vmatmul.mubr.msk.f32.gmra.mxu1 %vm261_vm1, %v4375_v15 }
 0x109   :  { %v4556_v10 = vadd.f32 %v3331_v1, %v259_v41  ;;  %750 = vrot.lane.b32.xlu0 %v6032_v52, %s4005_s1  ;;  %v234_v41 = vpop.permute.xlu1 %233  ;;  %v4572_v1 = vadd.f32 %v568_v2, %v244_v40  ;;  %1358 = vmatprep.mubr.f32.mxu1 %v6036_v60 }
 0x10a   :  { %v578_v9 = vpop.f32.mrf.mxu0  ;;  %v4587_v11 = vadd.f32 %v558_v47, %v234_v41  ;;  %v74_v41 = vld [vmem:[%s6014_s5 + $0x28] sm:$0xff] }
 0x10b   :  { %v618_v48 = vmax.f32 %v4556_v10, 0.0  ;;  %v4565_v53 = vadd.f32 %v578_v9, %v254_v51  ;;  %748 = vrot.lane.b32.xlu1 %v6033_v42, %s4005_s1  ;;  %v4579_v9 = vadd.f32 %v3325_v4, %v239_v6  ;;  %v615_v51 = vmax.f32 %v4572_v1, 0.0  ;;  %v229_v4 = vpop.permute.xlu0 %228  ;;  %v71_v42 = vld [vmem:[%s6014_s5 + $0x10] sm:$0xff] }
 0x10c   :  { %v4595_v40 = vadd.f32 %v4503_v12, %v229_v4  ;;  %3023 = vmatmul.mubr.msk.f32.gmra.mxu1 %vm261_vm1, %v4388_v18  ;;  %v613_v47 = vmax.f32 %v4587_v11, 0.0  ;;  %v76_v18 = vld [vmem:[%s6014_s5 + $0x38] sm:$0xff]  ;;  %v73_v4 = vld [vmem:[%s6014_s5 + $0x20] sm:$0xff] }
 0x10d   :  { %v617_v52 = vmax.f32 %v4565_v53, 0.0  ;;  %722 = vrot.lane.b32.xlu0 %v618_v48, %s4005_s1  ;;  %v224_v50 = vpop.permute.xlu1 %223  ;;  %v614_v2 = vmax.f32 %v4579_v9, 0.0  ;;  %3455 = vmatprep.mubr.msk.f32.mxu1 %vm4006_vm2, %v6036_v60 }
 0x10e   :  { %v4603_v15 = vadd.f32 %v548_v38, %v224_v50  ;;  %v6035_v12 = vmax.f32 %v4595_v40, 0.0  ;;  %v75_v38 = vld [vmem:[%s6014_s5 + $0x30] sm:$0xff]  ;;  %v72_v50 = vld [vmem:[%s6014_s5 + $0x18] sm:$0xff] }
 0x10f   :  { %720 = vrot.lane.b32.xlu1 %v617_v52, %s4005_s1 }
 0x110   :  { %v6034_v6 = vmax.f32 %v4603_v15, 0.0 }
 0x111   :  { %718 = vrot.lane.b32.xlu0 %v616_v44, %s4005_s1 }
 0x113   :  { %716 = vrot.lane.b32.xlu1 %v615_v51, %s4005_s1 }
 0x115   :  { %714 = vrot.lane.b32.xlu0 %v614_v2, %s4005_s1 }
 0x117   :  { %712 = vrot.lane.b32.xlu1 %v613_v47, %s4005_s1 }
 0x119   :  { %710 = vrot.lane.b32.xlu0 %v6035_v12, %s4005_s1 }
 0x11b   :  { %708 = vrot.lane.b32.xlu1 %v6034_v6, %s4005_s1 }
 0x11d   :  { %138 = vperm.xlu0 %3745, %v76_v18   ;;  %v70_v18 = vld [vmem:[%s6014_s5 + $0x8] sm:$0xff] }
 0x11f   :  { %133 = vperm.xlu1 %3746, %v75_v38   ;;  %v69_v38 = vld [vmem:[%s6014_s5] sm:$0xff] }
 0x121   :  { %128 = vperm.xlu0 %3745, %v74_v41   ;;  %v84_v41 = vld [vmem:[%s6014_s5 + $0x78] sm:$0xff] }
 0x123   :  { %123 = vperm.xlu1 %3746, %v73_v4   ;;  %v83_v4 = vld [vmem:[%s6014_s5 + $0x70] sm:$0xff] }
 0x125   :  { %118 = vperm.xlu0 %3745, %v72_v50   ;;  %v82_v50 = vld [vmem:[%s6014_s5 + $0x68] sm:$0xff] }
 0x127   :  { %113 = vperm.xlu1 %3746, %v71_v42   ;;  %v81_v42 = vld [vmem:[%s6014_s5 + $0x60] sm:$0xff] }
 0x129   :  { %108 = vperm.xlu0 %3745, %v70_v18   ;;  %v80_v18 = vld [vmem:[%s6014_s5 + $0x58] sm:$0xff] }
 0x12b   :  { %103 = vperm.xlu1 %3746, %v69_v38   ;;  %v79_v38 = vld [vmem:[%s6014_s5 + $0x50] sm:$0xff] }
 0x12d   :  { %178 = vperm.xlu0 %3745, %v84_v41   ;;  %v78_v41 = vld [vmem:[%s6014_s5 + $0x48] sm:$0xff] }
 0x12f   :  { %173 = vperm.xlu1 %3746, %v83_v4   ;;  %v77_v4 = vld [vmem:[%s6014_s5 + $0x40] sm:$0xff] }
 0x131   :  { %168 = vperm.xlu0 %3745, %v82_v50  }
 0x133   :  { %163 = vperm.xlu1 %3746, %v81_v42  }
 0x135   :  { %158 = vperm.xlu0 %3745, %v80_v18  }
 0x137   :  { %153 = vperm.xlu1 %3746, %v79_v38  }
 0x139   :  { %148 = vperm.xlu0 %3745, %v78_v41  }
 0x13b   :  { %143 = vperm.xlu1 %3746, %v77_v4  }
 0x16f   :  { %v763_v50 = vpop.permute.xlu0 %762 }
 0x170   :  { %v779_v42 = vsel %vm651_vm3, %v763_v50, %v618_v48 }
 0x171   :  { %3333 = vmatpush3.xpose.msra.mxu0 %v779_v42  ;;  %v761_v6 = vpop.permute.xlu1 %760 }
 0x172   :  { %3334 = vmatprep.subr.mxu0 %v6036_v60  ;;  %v778_v38 = vsel %vm651_vm3, %v761_v6, %v617_v52 }
 0x173   :  { %v759_v18 = vpop.permute.xlu0 %758 }
 0x174   :  { %v777_v10 = vsel %vm651_vm3, %v759_v18, %v616_v44 }
 0x175   :  { %3335 = vmatpush3.xpose.msra.mxu0 %v778_v38  ;;  %v757_v12 = vpop.permute.xlu1 %756  ;;  %v6085_v38 = vmax.f32 %v4496_v8, 0.0 }
 0x176   :  { %3336 = vmatprep.subr.mxu0 %v6036_v60  ;;  %v776_v4 = vsel %vm651_vm3, %v757_v12, %v615_v51  ;;  %v6082_v51 = vmax.f32 %v4595_v40, 0.0 }
 0x177   :  { %v755_v41 = vpop.permute.xlu0 %754 }
 0x178   :  { %v775_v6 = vsel %vm651_vm3, %v755_v41, %v614_v2  ;;  %v6083_v2 = vmax.f32 %v4603_v15, 0.0 }
 0x179   :  { %3337 = vmatpush3.xpose.msra.mxu0 %v777_v10  ;;  %v753_v48 = vpop.permute.xlu1 %752 }
 0x17a   :  { %3338 = vmatprep.subr.mxu0 %v6036_v60  ;;  %v774_v44 = vsel %vm651_vm3, %v753_v48, %v613_v47  ;;  %v6084_v47 = vmax.f32 %v4490_v3, 0.0  ;;  %v6086_v48 = vmax.f32 %v4493_v5, 0.0 }
 0x17b   :  { %v751_v53 = vpop.permute.xlu0 %750 }
 0x17c   :  { %v773_v12 = vsel %vm651_vm3, %v751_v53, %v6082_v51 }
 0x17d   :  { %3339 = vmatpush3.xpose.msra.mxu0 %v776_v4  ;;  %v749_v52 = vpop.permute.xlu1 %748 }
 0x17e   :  { %3340 = vmatprep.subr.mxu0 %v6036_v60  ;;  %v772_v42 = vsel %vm651_vm3, %v749_v52, %v6083_v2 }
 0x17f   :  { %v723_v45 = vpop.permute.xlu0 %722 }
 0x180   :  { %v739_v18 = vsel %vm651_vm3, %v6084_v47, %v723_v45  ;;  %v6087_v45 = vmax.f32 %v4507_v13, 0.0 }
 0x181   :  { %3341 = vmatpush3.xpose.msra.mxu0 %v775_v6  ;;  %v721_v1 = vpop.permute.xlu1 %720 }
 0x182   :  { %3342 = vmatprep.subr.mxu0 %v6036_v60  ;;  %v738_v41 = vsel %vm651_vm3, %v6085_v38, %v721_v1 }
 0x183   :  { %v719_v50 = vpop.permute.xlu0 %718 }
 0x184   :  { %v737_v4 = vsel %vm651_vm3, %v6086_v48, %v719_v50 }
 0x185   :  { %3343 = vmatpush3.xpose.msra.mxu0 %v774_v44  ;;  %v717_v9 = vpop.permute.xlu1 %716 }
 0x186   :  { %3344 = vmatprep.subr.mxu0 %v6036_v60  ;;  %v736_v44 = vsel %vm651_vm3, %v6087_v45, %v717_v9 }
 0x187   :  { %v715_v11 = vpop.permute.xlu0 %714 }
 0x189   :  { %3345 = vmatpush3.xpose.msra.mxu0 %v773_v12  ;;  %v713_v40 = vpop.permute.xlu1 %712 }
 0x18a   :  { %3346 = vmatprep.subr.mxu0 %v6036_v60 }
 0x18b   :  { %v711_v10 = vpop.permute.xlu0 %710 }
 0x18d   :  { %3347 = vmatpush3.xpose.msra.mxu0 %v772_v42  ;;  %v709_v15 = vpop.permute.xlu1 %708 }
 0x18e   :  { %3348 = vmatprep.subr.mxu0 %v6036_v60 }
 0x191   :  { %3349 = vmatpush3.xpose.msra.mxu0 %v739_v18 }
 0x192   :  { %3350 = vmatprep.subr.mxu0 %v6036_v60 }
 0x195   :  { %3351 = vmatpush3.xpose.msra.mxu0 %v738_v41 }
 0x196   :  { %3352 = vmatprep.subr.mxu0 %v6036_v60 }
 0x198   :  { %v139_v3 = vpop.permute.xlu0 %138 }
 0x199   :  { %v4716_v53 = vadd.f32 %v4404_v23, %v139_v3  ;;  %3353 = vmatpush3.xpose.msra.mxu0 %v737_v4 }
 0x19a   :  { %v134_v52 = vpop.permute.xlu1 %133  ;;  %3354 = vmatprep.subr.mxu0 %v6036_v60 }
 0x19b   :  { %v594_v8 = vmax.f32 %v4716_v53, 0.0  ;;  %v4721_v6 = vadd.f32 %v4414_v25, %v134_v52 }
 0x19c   :  { %v129_v5 = vpop.permute.xlu0 %128 }
 0x19d   :  { %v593_v1 = vmax.f32 %v4721_v6, 0.0  ;;  %v4728_v51 = vadd.f32 %v4392_v20, %v129_v5  ;;  %682 = vrot.lane.b32.xlu0 %v594_v8, %s4005_s1  ;;  %3355 = vmatpush3.xpose.msra.mxu0 %v736_v44  ;;  %v6088_v20 = vmax.f32 %v4514_v49, 0.0 }
 0x19e   :  { %v124_v23 = vpop.permute.xlu1 %123  ;;  %3356 = vmatprep.subr.mxu0 %v6036_v60 }
 0x19f   :  { %v592_v25 = vmax.f32 %v4728_v51, 0.0  ;;  %v4736_v13 = vadd.f32 %v4402_v22, %v124_v23  ;;  %680 = vrot.lane.b32.xlu1 %v593_v1, %s4005_s1  ;;  %v735_v12 = vsel %vm651_vm3, %v6088_v20, %v715_v11 }
 0x1a0   :  { %v119_v50 = vpop.permute.xlu0 %118 }
 0x1a1   :  { %v591_v9 = vmax.f32 %v4736_v13, 0.0  ;;  %v4746_v2 = vadd.f32 %v4380_v17, %v119_v50  ;;  %678 = vrot.lane.b32.xlu0 %v592_v25, %s4005_s1  ;;  %3357 = vmatpush3.xpose.msra.mxu0 %v735_v12  ;;  %v6089_v17 = vmax.f32 %v4527_v7, 0.0  ;;  %v888_v50 = vld [vmem:[%s6018_s3 + $0x8] sm:$0xff] }
 0x1a2   :  { %v114_v22 = vpop.permute.xlu1 %113  ;;  %3358 = vmatprep.subr.mxu0 %v6036_v60 }
 0x1a3   :  { %v590_v42 = vmax.f32 %v4746_v2, 0.0  ;;  %v4754_v49 = vadd.f32 %v4390_v19, %v114_v22  ;;  %676 = vrot.lane.b32.xlu1 %v591_v9, %s4005_s1  ;;  %v734_v11 = vsel %vm651_vm3, %v6089_v17, %v713_v40  ;;  %v897_v22 = vld [vmem:[%s6018_s3 + $0x50] sm:$0xff]  ;;  %v899_v17 = vld [vmem:[%s6018_s3 + $0x60] sm:$0xff] }
 0x1a4   :  { %v109_v47 = vpop.permute.xlu0 %108 }
 0x1a5   :  { %v589_v18 = vmax.f32 %v4754_v49, 0.0  ;;  %v4764_v38 = vadd.f32 %v4367_v14, %v109_v47  ;;  %674 = vrot.lane.b32.xlu0 %v590_v42, %s4005_s1  ;;  %3359 = vmatpush3.xpose.msra.mxu0 %v734_v11  ;;  %v6090_v14 = vmax.f32 %v4534_v35, 0.0  ;;  %v6092_v11 = vld [vmem:[#allocation2_spill] sm:$0xff]  ;;  %v901_v47 = vld [vmem:[%s6018_s3 + $0x70] sm:$0xff] }
 0x1a6   :  { %v104_v19 = vpop.permute.xlu1 %103  ;;  %3360 = vmatprep.subr.mxu0 %v6036_v60 }
 0x1a7   :  { %v588_v41 = vmax.f32 %v4764_v38, 0.0  ;;  %v4772_v7 = vadd.f32 %v4377_v16, %v104_v19  ;;  %672 = vrot.lane.b32.xlu1 %v589_v18, %s4005_s1  ;;  %v733_v40 = vsel %vm651_vm3, %v6090_v14, %v711_v10  ;;  %v6093_v19 = vld [vmem:[#allocation3_spill] sm:$0xff]  ;;  %v6094_v14 = vld [vmem:[#allocation4_spill] sm:$0xff] }
 0x1a8   :  { %v179_v48 = vpop.permute.xlu0 %178 }
 0x1a9   :  { %v587_v4 = vmax.f32 %v4772_v7, 0.0  ;;  %v4782_v3 = vadd.f32 %v4452_v36, %v179_v48  ;;  %670 = vrot.lane.b32.xlu0 %v588_v41, %s4005_s1  ;;  %3361 = vmatpush3.xpose.msra.mxu0 %v733_v40  ;;  %v6091_v36 = vmax.f32 %v4542_v46, 0.0  ;;  %v6095_v40 = vld [vmem:[#allocation5_spill] sm:$0xff] }
 0x1aa   :  { %v174_v16 = vpop.permute.xlu1 %173  ;;  %3362 = vmatprep.subr.mxu0 %v6036_v60 }
 0x1ab   :  { %v602_v52 = vmax.f32 %v4782_v3, 0.0  ;;  %v4790_v35 = vadd.f32 %v4462_v39, %v174_v16  ;;  %668 = vrot.lane.b32.xlu1 %v587_v4, %s4005_s1  ;;  %v732_v10 = vsel %vm651_vm3, %v6091_v36, %v709_v15  ;;  %v780_v39 = vld [vmem:[%s6017_s6] sm:$0xf] }
 0x1ac   :  { %v169_v45 = vpop.permute.xlu0 %168 }
 0x1ad   :  { %v601_v44 = vmax.f32 %v4790_v35, 0.0  ;;  %v4800_v5 = vadd.f32 %v4440_v32, %v169_v45  ;;  %641 = vrot.lane.b32.xlu0 %v602_v52, %s4005_s1  ;;  %3363 = vmatpush3.xpose.msra.mxu0 %v732_v10 }
 0x1ae   :  { %v164_v23 = vpop.permute.xlu1 %163  ;;  %2988 = vmatprep.subr.msk.mxu0 %vm358_vm0, %v4253_v54 }
 0x1af   :  { %v600_v46 = vmax.f32 %v4800_v5, 0.0  ;;  %v4812_v15 = vadd.f32 %v4450_v34, %v164_v23  ;;  %639 = vrot.lane.b32.xlu1 %v601_v44, %s4005_s1  ;;  %v887_v34 = vld [vmem:[%s6018_s3] sm:$0xff] }
 0x1b0   :  { %v159_v32 = vpop.permute.xlu0 %158  ;;  %3365 = vmatmul.mubr.f32.vlgmr.msra.gmra.mxu0 %v780_v39 }
 0x1b1   :  { %v599_v20 = vmax.f32 %v4812_v15, 0.0  ;;  %v4819_v12 = vadd.f32 %v4428_v29, %v159_v32  ;;  %637 = vrot.lane.b32.xlu0 %v600_v46, %s4005_s1  ;;  %2989 = vmatpush1.msk.msra.mxu0 %vm358_vm0, %v4260_v55 }
 0x1b2   :  { %v154_v54 = vpop.permute.xlu1 %153  ;;  %1067 = vmatprep.subr.mxu0 %v4267_v56  ;;  %1107 = vmatprep.mubr.f32.mxu0 %v6036_v60 }
 0x1b3   :  { %635 = vrot.lane.b32.xlu1 %v599_v20, %s4005_s1  ;;  %1068 = vmatpush1.msra.mxu0 %v4272_v57  ;;  %v598_v29 = vmax.f32 %v4819_v12, 0.0  ;;  %v4838_v55 = vadd.f32 %v4438_v31, %v154_v54  ;;  %v895_v31 = vld [vmem:[%s6018_s3 + $0x40] sm:$0xff] }
 0x1b4   :  { %1069 = vmatprep.subr.mxu0 %v4277_v58  ;;  %v149_v56 = vpop.permute.xlu0 %148 }
 0x1b5   :  { %905 = vperm.xlu0 %3745, %v887_v34   ;;  %1070 = vmatpush1.msra.mxu0 %v4283_v59  ;;  %v597_v57 = vmax.f32 %v4838_v55, 0.0  ;;  %v4852_v58 = vadd.f32 %v4416_v26, %v149_v56  ;;  %v892_v26 = vld [vmem:[%s6018_s3 + $0x28] sm:$0xff] }
 0x1b6   :  { %1071 = vmatprep.subr.mxu0 %v4290_v61  ;;  %v144_v59 = vpop.permute.xlu1 %143  ;;  %v889_v61 = vld [vmem:[%s6018_s3 + $0x10] sm:$0xff] }
 0x1b7   :  { %633 = vrot.lane.b32.xlu1 %v598_v29, %s4005_s1  ;;  %1072 = vmatpush1.msra.mxu0 %v4297_v62  ;;  %v596_v62 = vmax.f32 %v4852_v58, 0.0 }
 0x1b8   :  { %1073 = vmatprep.subr.mxu0 %v4303_v63  ;;  %v4866_v63 = vadd.f32 %v4426_v28, %v144_v59  ;;  %v894_v28 = vld [vmem:[%s6018_s3 + $0x38] sm:$0xff] }
 0x1b9   :  { %910 = vperm.xlu0 %3745, %v888_v50   ;;  %1074 = vmatpush1.msra.mxu0 %v4309_v0  ;;  %v890_v0 = vld [vmem:[%s6018_s3 + $0x18] sm:$0xff] }
 0x1ba   :  { %2990 = vmatmul.mubr.msk.f32.vlgmr.msra.gmra.mxu0 %vm261_vm1, %v4400_v21  ;;  %v595_v21 = vmax.f32 %v4866_v63, 0.0 }
 0x1bb   :  { %631 = vrot.lane.b32.xlu1 %v597_v57, %s4005_s1  ;;  %1113 = vmatprep.mubr.f32.mxu0 %v6036_v60 }
 0x1bd   :  { %915 = vperm.xlu0 %3745, %v889_v61  }
 0x1be   :  { %2991 = vmatmul.mubr.msk.f32.gmra.mxu0 %vm261_vm1, %v4412_v24  ;;  %v891_v24 = vld [vmem:[%s6018_s3 + $0x20] sm:$0xff] }
 0x1bf   :  { %629 = vrot.lane.b32.xlu1 %v596_v62, %s4005_s1  ;;  %1119 = vmatprep.mubr.f32.mxu0 %v6036_v60 }
 0x1c1   :  { %920 = vperm.xlu0 %3745, %v890_v0  }
 0x1c2   :  { %2992 = vmatmul.mubr.msk.f32.gmra.mxu0 %vm261_vm1, %v4424_v27  ;;  %v893_v27 = vld [vmem:[%s6018_s3 + $0x30] sm:$0xff] }
 0x1c3   :  { %627 = vrot.lane.b32.xlu1 %v595_v21, %s4005_s1  ;;  %1125 = vmatprep.mubr.f32.mxu0 %v6036_v60 }
 0x1c5   :  { %925 = vperm.xlu0 %3745, %v891_v24  }
 0x1c6   :  { %2993 = vmatmul.mubr.msk.f32.gmra.mxu0 %vm261_vm1, %v4436_v30  ;;  %v896_v30 = vld [vmem:[%s6018_s3 + $0x48] sm:$0xff] }
 0x1c7   :  { %930 = vperm.xlu1 %3746, %v892_v26   ;;  %1131 = vmatprep.mubr.f32.mxu0 %v6036_v60 }
 0x1c9   :  { %935 = vperm.xlu0 %3745, %v893_v27  }
 0x1ca   :  { %2994 = vmatmul.mubr.msk.f32.gmra.mxu0 %vm261_vm1, %v4448_v33  ;;  %v898_v33 = vld [vmem:[%s6018_s3 + $0x58] sm:$0xff] }
 0x1cb   :  { %940 = vperm.xlu1 %3746, %v894_v28   ;;  %1137 = vmatprep.mubr.f32.mxu0 %v6036_v60 }
 0x1cd   :  { %945 = vperm.xlu0 %3745, %v895_v31  }
 0x1ce   :  { %2995 = vmatmul.mubr.msk.f32.gmra.mxu0 %vm261_vm1, %v4460_v37  ;;  %v900_v37 = vld [vmem:[%s6018_s3 + $0x68] sm:$0xff] }
 0x1cf   :  { %950 = vperm.xlu1 %3746, %v896_v30   ;;  %1143 = vmatprep.mubr.f32.mxu0 %v6036_v60 }
 0x1d1   :  { %955 = vperm.xlu0 %3745, %v897_v22  }
 0x1d2   :  { %2996 = vmatmul.mubr.msk.f32.gmra.mxu0 %vm261_vm1, %v4470_v43  ;;  %v902_v43 = vld [vmem:[%s6018_s3 + $0x78] sm:$0xff] }
 0x1d3   :  { %960 = vperm.xlu1 %3746, %v898_v33   ;;  %1149 = vmatprep.mubr.f32.mxu0 %v6036_v60 }
 0x1d5   :  { %965 = vperm.xlu0 %3745, %v899_v17  }
 0x1d6   :  { %2997 = vmatmul.mubr.msk.f32.gmra.mxu0 %vm261_vm1, %v6092_v11 }
 0x1d7   :  { %970 = vperm.xlu1 %3746, %v900_v37   ;;  %1155 = vmatprep.mubr.f32.mxu0 %v6036_v60 }
 0x1d9   :  { %975 = vperm.xlu0 %3745, %v901_v47  }
 0x1da   :  { %2998 = vmatmul.mubr.msk.f32.gmra.mxu0 %vm261_vm1, %v6093_v19 }
 0x1db   :  { %980 = vperm.xlu1 %3746, %v902_v43   ;;  %1161 = vmatprep.mubr.f32.mxu0 %v6036_v60 }
 0x1de   :  { %2999 = vmatmul.mubr.msk.f32.gmra.mxu0 %vm261_vm1, %v6094_v14 }
 0x1df   :  { %1167 = vmatprep.mubr.f32.mxu0 %v6036_v60 }
 0x1e2   :  { %3000 = vmatmul.mubr.msk.f32.gmra.mxu0 %vm261_vm1, %v6095_v40 }
 0x20f   :  { %v683_v48 = vpop.permute.xlu0 %682 }
 0x210   :  { %v4946_v16 = vsel %vm651_vm3, %v683_v48, %v602_v52 }
 0x211   :  { %v681_v36 = vpop.permute.xlu1 %680  ;;  %3367 = vmatprep.subr.mxu0 %v4946_v16 }
 0x212   :  { %v4952_v10 = vsel %vm651_vm3, %v681_v36, %v601_v44  ;;  %3368 = vmatpush3.msra.mxu0 %v4946_v16 }
 0x213   :  { %v679_v45 = vpop.permute.xlu0 %678  ;;  %3369 = vmatprep.subr.mxu0 %v4952_v10 }
 0x214   :  { %v4959_v3 = vsel %vm651_vm3, %v679_v45, %v600_v46  ;;  %3370 = vmatpush3.msra.mxu0 %v4952_v10 }
 0x215   :  { %v677_v52 = vpop.permute.xlu1 %676  ;;  %3371 = vmatprep.subr.mxu0 %v4959_v3 }
 0x216   :  { %v4966_v35 = vsel %vm651_vm3, %v677_v52, %v599_v20  ;;  %3372 = vmatpush3.msra.mxu0 %v4959_v3 }
 0x217   :  { %v675_v44 = vpop.permute.xlu0 %674  ;;  %3373 = vmatprep.subr.mxu0 %v4966_v35 }
 0x218   :  { %v4973_v5 = vsel %vm651_vm3, %v675_v44, %v598_v29  ;;  %3374 = vmatpush3.msra.mxu0 %v4966_v35 }
 0x219   :  { %6096 = vst [vmem:[#allocation2_spill] sm:$0xff] %v4973_v5  ;;  %v673_v39 = vpop.permute.xlu1 %672  ;;  %3375 = vmatprep.subr.mxu0 %v4973_v5 }
 0x21a   :  { %v4980_v23 = vsel %vm651_vm3, %v673_v39, %v597_v57  ;;  %3376 = vmatpush3.msra.mxu0 %v4973_v5 }
 0x21b   :  { %6097 = vst [vmem:[#allocation3_spill] sm:$0xff] %v4980_v23  ;;  %v671_v46 = vpop.permute.xlu0 %670  ;;  %3377 = vmatprep.subr.mxu0 %v4980_v23 }
 0x21c   :  { %v4987_v15 = vsel %vm651_vm3, %v671_v46, %v596_v62  ;;  %3378 = vmatpush3.msra.mxu0 %v4980_v23 }
 0x21d   :  { %6098 = vst [vmem:[#allocation4_spill] sm:$0xff] %v4987_v15  ;;  %v669_v32 = vpop.permute.xlu1 %668  ;;  %3379 = vmatprep.subr.mxu0 %v4987_v15 }
 0x21e   :  { %v4994_v20 = vsel %vm651_vm3, %v669_v32, %v595_v21  ;;  %3380 = vmatpush3.msra.mxu0 %v4987_v15 }
 0x21f   :  { %6099 = vst [vmem:[#allocation5_spill] sm:$0xff] %v4994_v20  ;;  %v642_v12 = vpop.permute.xlu0 %641  ;;  %3381 = vmatprep.subr.mxu0 %v4994_v20 }
 0x220   :  { %v5001_v54 = vsel %vm651_vm3, %v594_v8, %v642_v12  ;;  %3382 = vmatpush3.msra.mxu0 %v4994_v20 }
 0x221   :  { %6100 = vst [vmem:[#allocation6_spill] sm:$0xff] %v5001_v54  ;;  %v640_v34 = vpop.permute.xlu1 %639  ;;  %3383 = vmatprep.subr.mxu0 %v5001_v54 }
 0x222   :  { %v5008_v29 = vsel %vm651_vm3, %v593_v1, %v640_v34  ;;  %3384 = vmatpush3.msra.mxu0 %v5001_v54 }
 0x223   :  { %6101 = vst [vmem:[#allocation7_spill] sm:$0xff] %v5008_v29  ;;  %v638_v55 = vpop.permute.xlu0 %637  ;;  %3385 = vmatprep.subr.mxu0 %v5008_v29 }
 0x224   :  { %v5015_v53 = vsel %vm651_vm3, %v592_v25, %v638_v55  ;;  %3386 = vmatpush3.msra.mxu0 %v5008_v29 }
 0x225   :  { %6102 = vst [vmem:[#allocation8_spill] sm:$0xff] %v5015_v53  ;;  %v636_v8 = vpop.permute.xlu1 %635  ;;  %3387 = vmatprep.subr.mxu0 %v5015_v53 }
 0x226   :  { %v5022_v6 = vsel %vm651_vm3, %v591_v9, %v636_v8  ;;  %3388 = vmatpush3.msra.mxu0 %v5015_v53 }
 0x227   :  { %6103 = vst [vmem:[#allocation9_spill] sm:$0xff] %v5022_v6  ;;  %3389 = vmatprep.subr.mxu0 %v5022_v6 }
 0x228   :  { %3390 = vmatpush3.msra.mxu0 %v5022_v6 }
 0x229   :  { %v634_v1 = vpop.permute.xlu1 %633 }
 0x22a   :  { %v5030_v51 = vsel %vm651_vm3, %v590_v42, %v634_v1 }
 0x22b   :  { %6104 = vst [vmem:[#allocation10_spill] sm:$0xff] %v5030_v51  ;;  %3391 = vmatprep.subr.mxu0 %v5030_v51 }
 0x22c   :  { %3392 = vmatpush3.msra.mxu0 %v5030_v51 }
 0x22d   :  { %v632_v25 = vpop.permute.xlu1 %631 }
 0x22e   :  { %v5037_v13 = vsel %vm651_vm3, %v589_v18, %v632_v25  ;;  %v5056_v18 = vpop.f32.mrf.mxu1 }
 0x22f   :  { %6105 = vst [vmem:[#allocation11_spill] sm:$0xff] %v5037_v13  ;;  %3393 = vmatprep.subr.mxu0 %v5037_v13 }
 0x230   :  { %3394 = vmatpush3.msra.mxu0 %v5037_v13  ;;  %v5058_v38 = vpop.f32.mrf.mxu1  ;;  %v5076_v61 = vpop.permute.xlu0 %905 }
 0x231   :  { %v630_v9 = vpop.permute.xlu1 %629 }
 0x232   :  { %v5044_v2 = vsel %vm651_vm3, %v588_v41, %v630_v9  ;;  %v5060_v41 = vpop.f32.mrf.mxu1 }
 0x233   :  { %6106 = vst [vmem:[#allocation12_spill] sm:$0xff] %v5044_v2  ;;  %3395 = vmatprep.subr.mxu0 %v5044_v2 }
 0x234   :  { %3396 = vmatpush3.msra.mxu0 %v5044_v2  ;;  %v5062_v56 = vpop.f32.mrf.mxu1  ;;  %v5082_v21 = vpop.permute.xlu0 %910 }
 0x235   :  { %v628_v42 = vpop.permute.xlu1 %627  ;;  %6109 = vst [vmem:[#allocation15_spill] sm:$0xff] %v5082_v21 }
 0x236   :  { %v5051_v49 = vsel %vm651_vm3, %v587_v4, %v628_v42  ;;  %v5064_v50 = vpop.f32.mrf.mxu1 }
 0x237   :  { %6107 = vst [vmem:[#allocation13_spill] sm:$0xff] %v5051_v49  ;;  %3397 = vmatprep.subr.mxu0 %v5051_v49 }
 0x238   :  { %3398 = vmatpush3.msra.mxu0 %v5051_v49  ;;  %v5066_v7 = vpop.f32.mrf.mxu1  ;;  %v5088_v27 = vpop.permute.xlu0 %915 }
 0x239   :  { %3458 = vmatprep.subr.mxu0 %v4946_v16  ;;  %6111 = vst [vmem:[#allocation17_spill] sm:$0xff] %v5088_v27 }
 0x23a   :  { %v5068_v4 = vpop.f32.mrf.mxu1 }
 0x23c   :  { %v5070_v57 = vpop.f32.mrf.mxu1  ;;  %v5096_v11 = vpop.permute.xlu0 %920 }
 0x23d   :  { %6113 = vst [vmem:[#allocation19_spill] sm:$0xff] %v5096_v11 }
 0x23e   :  { %v5072_v58 = vpop.f32.mrf.mxu1 }
 0x240   :  { %v5074_v59 = vpop.f32.mrf.mxu1  ;;  %v5109_v52 = vpop.permute.xlu0 %925 }
 0x241   :  { %6115 = vst [vmem:[#allocation21_spill] sm:$0xff] %v5109_v52 }
 0x242   :  { %v5080_v63 = vpop.f32.mrf.mxu1  ;;  %v5119_v12 = vpop.permute.xlu1 %930 }
 0x243   :  { %6117 = vst [vmem:[#allocation23_spill] sm:$0xff] %v5119_v12 }
 0x244   :  { %v5084_v24 = vpop.f32.mrf.mxu1  ;;  %v5125_v1 = vpop.permute.xlu0 %935 }
 0x245   :  { %6110 = vst [vmem:[#allocation16_spill] sm:$0xff] %v5084_v24  ;;  %6118 = vst [vmem:[#allocation24_spill] sm:$0xff] %v5125_v1 }
 0x246   :  { %v5086_v26 = vpop.f32.mrf.mxu1 }
 0x248   :  { %v5093_v22 = vpop.f32.mrf.mxu1 }
 0x249   :  { %6112 = vst [vmem:[#allocation18_spill] sm:$0xff] %v5093_v22 }
 0x24a   :  { %v5100_v43 = vpop.f32.mrf.mxu1 }
 0x24c   :  { %v5106_v36 = vpop.f32.mrf.mxu1 }
 0x24d   :  { %6114 = vst [vmem:[#allocation20_spill] sm:$0xff] %v5106_v36 }
 0x24e   :  { %v5117_v32 = vpop.f32.mrf.mxu1 }
 0x24f   :  { %6116 = vst [vmem:[#allocation22_spill] sm:$0xff] %v5117_v32 }
 0x250   :  { %v5130_v9 = vpop.f32.mrf.mxu1 }
 0x251   :  { %6119 = vst [vmem:[#allocation25_spill] sm:$0xff] %v5130_v9 }
 0x270   :  { %v5078_v62 = vpop.f32.mrf.mxu0 }
 0x271   :  { %6108 = vst [vmem:[#allocation14_spill] sm:$0xff] %v5078_v62 }
 0x272   :  { %v3366_v0 = vpop.f32.mrf.mxu0 }
 0x27a   :  { %v1109_v28 = vpop.f32.mrf.mxu0 }
 0x27b   :  { %v1110_v31 = vadd.f32 %v1109_v28, %v5076_v61  ;;  %v5134_v28 = vpop.permute.xlu1 %940 }
 0x27c   :  { %v5091_v30 = vpop.f32.mrf.mxu0  ;;  %6120 = vst [vmem:[#allocation26_spill] sm:$0xff] %v5134_v28 }
 0x27d   :  { %v1365_v33 = vmax.f32 %v1110_v31, 0.0 }
 0x27e   :  { %v1115_v17 = vpop.f32.mrf.mxu0 }
 0x27f   :  { %v1116_v37 = vadd.f32 %v1115_v17, %v5082_v21  ;;  %3399 = vmatprep.mubr.f32.mxu0 %v1365_v33  ;;  %v5141_v17 = vpop.f32.mrf.mxu1 }
 0x280   :  { %v5098_v47 = vpop.f32.mrf.mxu0  ;;  %6121 = vst [vmem:[#allocation27_spill] sm:$0xff] %v5141_v17 }
 0x281   :  { %v1369_v19 = vmax.f32 %v1116_v37, 0.0 }
 0x282   :  { %v1121_v14 = vpop.f32.mrf.mxu0 }
 0x283   :  { %v1122_v40 = vadd.f32 %v1121_v14, %v5088_v27  ;;  %3400 = vmatmul.mubr.f32.vlgmr.msra.gmra.mxu0 %v1369_v19  ;;  %v5144_v19 = vpop.permute.xlu0 %945 }
 0x284   :  { %3459 = vmatpush3.msra.mxu0 %v4946_v16  ;;  %v5104_v48 = vpop.f32.mrf.mxu0  ;;  %6122 = vst [vmem:[#allocation28_spill] sm:$0xff] %v5144_v19 }
 0x285   :  { %v1373_v45 = vmax.f32 %v1122_v40, 0.0  ;;  %3460 = vmatprep.subr.mxu0 %v4952_v10 }
 0x286   :  { %3461 = vmatpush3.msra.mxu0 %v4952_v10  ;;  %v1127_v44 = vpop.f32.mrf.mxu0 }
 0x287   :  { %v1128_v39 = vadd.f32 %v1127_v44, %v5096_v11  ;;  %3462 = vmatprep.subr.mxu0 %v4959_v3  ;;  %3402 = vmatprep.mubr.f32.mxu0 %v1373_v45  ;;  %v5152_v44 = vpop.f32.mrf.mxu1 }
 0x288   :  { %3463 = vmatpush3.msra.mxu0 %v4959_v3  ;;  %v5115_v46 = vpop.f32.mrf.mxu0  ;;  %6123 = vst [vmem:[#allocation29_spill] sm:$0xff] %v5152_v44 }
 0x289   :  { %v1377_v34 = vmax.f32 %v1128_v39, 0.0  ;;  %3464 = vmatprep.subr.mxu0 %v4966_v35  ;;  %v5154_v39 = vpop.permute.xlu1 %950 }
 0x28a   :  { %3465 = vmatpush3.msra.mxu0 %v4966_v35  ;;  %v1133_v55 = vpop.f32.mrf.mxu0  ;;  %6124 = vst [vmem:[#allocation30_spill] sm:$0xff] %v5154_v39 }
 0x28b   :  { %v1134_v8 = vadd.f32 %v1133_v55, %v5109_v52  ;;  %3466 = vmatprep.subr.mxu0 %v4973_v5  ;;  %3403 = vmatmul.mubr.f32.gmra.mxu0 %v1377_v34 }
 0x28c   :  { %3467 = vmatpush3.msra.mxu0 %v4973_v5  ;;  %v5128_v25 = vpop.f32.mrf.mxu0 }
 0x28d   :  { %v1381_v42 = vmax.f32 %v1134_v8, 0.0  ;;  %3468 = vmatprep.subr.mxu0 %v4980_v23 }
 0x28e   :  { %3469 = vmatpush3.msra.mxu0 %v4980_v23  ;;  %v1139_v0 = vpop.f32.mrf.mxu0 }
 0x28f   :  { %v1140_v31 = vadd.f32 %v1139_v0, %v5119_v12  ;;  %3470 = vmatprep.subr.mxu0 %v4987_v15  ;;  %3405 = vmatprep.mubr.f32.mxu0 %v1381_v42  ;;  %v5160_v42 = vpop.permute.xlu0 %955 }
 0x290   :  { %3471 = vmatpush3.msra.mxu0 %v4987_v15  ;;  %v5139_v33 = vpop.f32.mrf.mxu0  ;;  %6125 = vst [vmem:[#allocation31_spill] sm:$0xff] %v5160_v42 }
 0x291   :  { %v1385_v37 = vmax.f32 %v1140_v31, 0.0  ;;  %3472 = vmatprep.subr.mxu0 %v4994_v20  ;;  %v5165_v31 = vpop.f32.mrf.mxu1 }
 0x292   :  { %3473 = vmatpush3.msra.mxu0 %v4994_v20  ;;  %v1145_v14 = vpop.f32.mrf.mxu0  ;;  %6126 = vst [vmem:[#allocation32_spill] sm:$0xff] %v5165_v31 }
 0x293   :  { %v1146_v40 = vadd.f32 %v1145_v14, %v5125_v1  ;;  %3474 = vmatprep.subr.mxu0 %v5001_v54  ;;  %3406 = vmatmul.mubr.f32.gmra.mxu0 %v1385_v37  ;;  %v5176_v60 = vpop.f32.mrf.mxu1 }
 0x294   :  { %3475 = vmatpush3.msra.mxu0 %v5001_v54  ;;  %v5150_v45 = vpop.f32.mrf.mxu0  ;;  %6128 = vst [vmem:[#allocation34_spill] sm:$0xff] %v5176_v60 }
 0x295   :  { %v1389_v34 = vmax.f32 %v1146_v40, 0.0  ;;  %3476 = vmatprep.subr.mxu0 %v5008_v29  ;;  %v5169_v40 = vpop.permute.xlu1 %960 }
 0x296   :  { %3477 = vmatpush3.msra.mxu0 %v5008_v29  ;;  %v1151_v55 = vpop.f32.mrf.mxu0  ;;  %6127 = vst [vmem:[#allocation33_spill] sm:$0xff] %v5169_v40 }
 0x297   :  { %v1152_v8 = vadd.f32 %v1151_v55, %v5134_v28  ;;  %3478 = vmatprep.subr.mxu0 %v5015_v53  ;;  %3408 = vmatprep.mubr.f32.mxu0 %v1389_v34 }
 0x298   :  { %3479 = vmatpush3.msra.mxu0 %v5015_v53  ;;  %v5163_v0 = vpop.f32.mrf.mxu0 }
 0x299   :  { %v1393_v37 = vmax.f32 %v1152_v8, 0.0  ;;  %3480 = vmatprep.subr.mxu0 %v5022_v6  ;;  %v5179_v8 = vpop.permute.xlu0 %965  ;;  %v5189_v60 = vpop.permute.xlu1 %970 }
 0x29a   :  { %3481 = vmatpush3.msra.mxu0 %v5022_v6  ;;  %v1157_v14 = vpop.f32.mrf.mxu0  ;;  %6129 = vst [vmem:[#allocation35_spill] sm:$0xff] %v5179_v8  ;;  %6131 = vst [vmem:[#allocation37_spill] sm:$0xff] %v5189_v60  ;;  %v1188_v17 = vadd.f32 %v5064_v50, %v5189_v60 }
 0x29b   :  { %v1158_v55 = vadd.f32 %v1157_v14, %v5144_v19  ;;  %3482 = vmatprep.subr.mxu0 %v5030_v51  ;;  %3409 = vmatmul.mubr.f32.gmra.mxu0 %v1393_v37  ;;  %v5187_v14 = vpop.f32.mrf.mxu1 }
 0x29c   :  { %3483 = vmatpush3.msra.mxu0 %v5030_v51  ;;  %v5174_v34 = vpop.f32.mrf.mxu0  ;;  %6130 = vst [vmem:[#allocation36_spill] sm:$0xff] %v5187_v14 }
 0x29d   :  { %v1397_v44 = vmax.f32 %v1158_v55, 0.0  ;;  %3484 = vmatprep.subr.mxu0 %v5037_v13  ;;  %v5199_v62 = vpop.permute.xlu0 %975  ;;  %v5201_v14 = vpop.f32.mrf.mxu1 }
 0x29e   :  { %3485 = vmatpush3.msra.mxu0 %v5037_v13  ;;  %v1163_v9 = vpop.f32.mrf.mxu0  ;;  %6132 = vst [vmem:[#allocation38_spill] sm:$0xff] %v5199_v62  ;;  %6133 = vst [vmem:[#allocation39_spill] sm:$0xff] %v5201_v14  ;;  %v5205_v32 = vpop.permute.xlu1 %980 }
 0x29f   :  { %v1164_v36 = vadd.f32 %v1163_v9, %v5154_v39  ;;  %3486 = vmatprep.subr.mxu0 %v5044_v2  ;;  %3411 = vmatprep.mubr.f32.mxu0 %v1397_v44  ;;  %v1176_v9 = vadd.f32 %v5056_v18, %v5169_v40  ;;  %v1182_v44 = vadd.f32 %v5060_v41, %v5179_v8  ;;  %v1417_v41 = vmax.f32 %v1188_v17, 0.0 }
 0x2a0   :  { %3487 = vmatpush3.msra.mxu0 %v5044_v2  ;;  %v5185_v37 = vpop.f32.mrf.mxu0  ;;  %6134 = vst [vmem:[#allocation40_spill] sm:$0xff] %v5205_v32  ;;  %v1200_v14 = vadd.f32 %v5072_v58, %v5205_v32 }
 0x2a1   :  { %v1401_v55 = vmax.f32 %v1164_v36, 0.0  ;;  %3488 = vmatprep.subr.mxu0 %v5051_v49  ;;  %v1409_v31 = vmax.f32 %v1176_v9, 0.0  ;;  %v1413_v18 = vmax.f32 %v1182_v44, 0.0  ;;  %v1118_v44 = vadd.f32 %v5098_v47, %v5082_v21 }
 0x2a2   :  { %3489 = vmatpush3.msra.mxu0 %v5051_v49  ;;  %v1169_v22 = vpop.f32.mrf.mxu0 }
 0x2a3   :  { %v1170_v24 = vadd.f32 %v1169_v22, %v5160_v42  ;;  %3549 = vmatprep.subr.mxu0 %v4946_v16  ;;  %3412 = vmatmul.mubr.f32.gmra.mxu0 %v1401_v55  ;;  %v1194_v22 = vadd.f32 %v5068_v4, %v5199_v62  ;;  %v5209_v55 = vpop.f32.mrf.mxu1  ;;  %v1425_v4 = vmax.f32 %v1200_v14, 0.0  ;;  %v1370_v58 = vmax.f32 %v1118_v44, 0.0 }
 0x2a4   :  { %v1171_v44 = vpop.f32.mrf.mxu0 }
 0x2a5   :  { %v1405_v36 = vmax.f32 %v1170_v24, 0.0  ;;  %v1112_v24 = vadd.f32 %v5091_v30, %v5076_v61  ;;  %v1421_v9 = vmax.f32 %v1194_v22, 0.0  ;;  %v5215_v50 = vpop.f32.mrf.mxu1  ;;  %v1130_v30 = vadd.f32 %v5115_v46, %v5096_v11 }
 0x2a6   :  { %6135 = vst [vmem:[#allocation41_spill] sm:$0xff] %v5215_v50  ;;  %v1136_v22 = vadd.f32 %v5128_v25, %v5109_v52  ;;  %v1148_v46 = vadd.f32 %v5150_v45, %v5125_v1  ;;  %v1160_v45 = vadd.f32 %v5174_v34, %v5144_v19  ;;  %v1172_v34 = vadd.f32 %v1171_v44, %v5160_v42 }
 0x2a7   :  { %3414 = vmatprep.mubr.f32.mxu0 %v1405_v36  ;;  %v1124_v36 = vadd.f32 %v5104_v48, %v5088_v27  ;;  %v5221_v17 = vpop.f32.mrf.mxu1  ;;  %v1378_v47 = vmax.f32 %v1130_v30, 0.0  ;;  %v1142_v48 = vadd.f32 %v5139_v33, %v5119_v12  ;;  %v1154_v33 = vadd.f32 %v5163_v0, %v5134_v28 }
 0x2a8   :  { %3415 = vmatmul.mubr.f32.gmra.mxu0 %v1409_v31  ;;  %v1366_v31 = vmax.f32 %v1112_v24, 0.0  ;;  %v1382_v14 = vmax.f32 %v1136_v22, 0.0  ;;  %v1166_v0 = vadd.f32 %v5185_v37, %v5154_v39  ;;  %v1178_v37 = vadd.f32 %v5058_v38, %v5169_v40 }
 0x2a9   :  { %3417 = vmatprep.mubr.f32.mxu0 %v1413_v18  ;;  %v1374_v18 = vmax.f32 %v1124_v36, 0.0  ;;  %v1386_v24 = vmax.f32 %v1142_v48, 0.0  ;;  %v1398_v36 = vmax.f32 %v1160_v45, 0.0  ;;  %v1184_v22 = vadd.f32 %v5062_v56, %v5179_v8 }
 0x2aa   :  { %v1402_v30 = vmax.f32 %v1166_v0, 0.0  ;;  %v1410_v48 = vmax.f32 %v1178_v37, 0.0  ;;  %v1190_v38 = vadd.f32 %v5066_v7, %v5189_v60  ;;  %v1196_v56 = vadd.f32 %v5070_v57, %v5199_v62 }
 0x2ab   :  { %v1277_v45 = vadd.f32 %v5086_v26, %v5082_v21  ;;  %v6140_v26 = vld [vmem:[#allocation22_spill] sm:$0xff] }
 0x2ac   :  { %3418 = vmatmul.mubr.f32.gmra.mxu0 %v1417_v41  ;;  %v5227_v41 = vpop.f32.mrf.mxu1  ;;  %v1422_v7 = vmax.f32 %v1196_v56, 0.0  ;;  %v6145_v56 = vld [vmem:[#allocation36_spill] sm:$0xff] }
 0x2ad   :  { %3420 = vmatprep.mubr.f32.mxu0 %v1421_v9  ;;  %6136 = vst [vmem:[#allocation42_spill] sm:$0xff] %v5227_v41  ;;  %v1390_v9 = vmax.f32 %v1148_v46, 0.0  ;;  %v1371_v0 = vmax.f32 %v1277_v45, 0.0 }
 0x2ae   :  { %v5237_v25 = vpop.f32.mrf.mxu1 }
 0x2b0   :  { %3421 = vmatmul.mubr.f32.gmra.mxu0 %v1425_v4  ;;  %v5247_v4 = vpop.f32.mrf.mxu1 }
 0x2b1   :  { %3490 = vmatprep.mubr.f32.mxu0 %v1366_v31  ;;  %6137 = vst [vmem:[#allocation43_spill] sm:$0xff] %v5247_v4  ;;  %v1394_v31 = vmax.f32 %v1154_v33, 0.0  ;;  %v1202_v33 = vadd.f32 %v5074_v59, %v5205_v32 }
 0x2b3   :  { %v1426_v59 = vmax.f32 %v1202_v33, 0.0 }
 0x2b4   :  { %3491 = vmatmul.mubr.f32.vlgmr.msra.gmra.mxu0 %v1370_v58  ;;  %v5256_v58 = vpop.f32.mrf.mxu1 }
 0x2b5   :  { %3550 = vmatpush3.msra.mxu0 %v4946_v16  ;;  %3493 = vmatprep.mubr.f32.mxu0 %v1374_v18  ;;  %v1406_v18 = vmax.f32 %v1172_v34, 0.0 }
 0x2b6   :  { %3551 = vmatprep.subr.mxu0 %v4952_v10 }
 0x2b7   :  { %3552 = vmatpush3.msra.mxu0 %v4952_v10 }
 0x2b8   :  { %3553 = vmatprep.subr.mxu0 %v4959_v3  ;;  %3494 = vmatmul.mubr.f32.gmra.mxu0 %v1378_v47  ;;  %v5266_v47 = vpop.f32.mrf.mxu1 }
 0x2b9   :  { %3554 = vmatpush3.msra.mxu0 %v4959_v3  ;;  %3496 = vmatprep.mubr.f32.mxu0 %v1382_v14  ;;  %6138 = vst [vmem:[#allocation44_spill] sm:$0xff] %v5266_v47  ;;  %v1414_v14 = vmax.f32 %v1184_v22, 0.0 }
 0x2ba   :  { %3555 = vmatprep.subr.mxu0 %v4966_v35  ;;  %v1336_v46 = vpop.f32.mrf.mxu1 }
 0x2bb   :  { %3556 = vmatpush3.msra.mxu0 %v4966_v35 }
 0x2bc   :  { %3557 = vmatprep.subr.mxu0 %v4973_v5  ;;  %3497 = vmatmul.mubr.f32.gmra.mxu0 %v1386_v24  ;;  %v1418_v24 = vmax.f32 %v1190_v38, 0.0  ;;  %v5284_v57 = vpop.f32.mrf.mxu1 }
 0x2bd   :  { %3558 = vmatpush3.msra.mxu0 %v4973_v5  ;;  %3499 = vmatprep.mubr.f32.mxu0 %v1390_v9  ;;  %v1271_v9 = vadd.f32 %v5080_v63, %v5076_v61  ;;  %6139 = vst [vmem:[#allocation45_spill] sm:$0xff] %v5284_v57  ;;  %v1283_v63 = vadd.f32 %v5100_v43, %v5088_v27  ;;  %v6142_v43 = vmov 0.0  }
 0x2be   :  { %3559 = vmatprep.subr.mxu0 %v4980_v23 }
 0x2bf   :  { %3560 = vmatpush3.msra.mxu0 %v4980_v23  ;;  %v1367_v44 = vmax.f32 %v1271_v9, 0.0  ;;  %v1375_v34 = vmax.f32 %v1283_v63, 0.0  ;;  %v1313_v9 = vadd.f32 %v5209_v55, %v5134_v28 }
 0x2c0   :  { %3561 = vmatprep.subr.mxu0 %v4987_v15  ;;  %3500 = vmatmul.mubr.f32.gmra.mxu0 %v1394_v31  ;;  %v1342_v31 = vpop.f32.mrf.mxu1 }
 0x2c1   :  { %3562 = vmatpush3.msra.mxu0 %v4987_v15  ;;  %3502 = vmatprep.mubr.f32.mxu0 %v1398_v36  ;;  %v1289_v36 = vadd.f32 %v6140_v26, %v5096_v11  ;;  %v1395_v63 = vmax.f32 %v1313_v9, 0.0 }
 0x2c2   :  { %3563 = vmatprep.subr.mxu0 %v4994_v20 }
 0x2c3   :  { %3564 = vmatpush3.msra.mxu0 %v4994_v20  ;;  %v1379_v22 = vmax.f32 %v1289_v36, 0.0  ;;  %v1331_v36 = vadd.f32 %v5256_v58, %v5160_v42 }
 0x2c4   :  { %3565 = vmatprep.subr.mxu0 %v5001_v54  ;;  %3503 = vmatmul.mubr.f32.gmra.mxu0 %v1402_v30  ;;  %v6141_v30 = vld [vmem:[#allocation27_spill] sm:$0xff] }
 0x2c5   :  { %3566 = vmatpush3.msra.mxu0 %v5001_v54  ;;  %3505 = vmatprep.mubr.f32.mxu0 %v1406_v18  ;;  %v1295_v37 = vadd.f32 %v6141_v30, %v5109_v52  ;;  %v5302_v18 = vpop.f32.mrf.mxu1  ;;  %v1337_v30 = vadd.f32 %v1336_v46, %v5169_v40 }
 0x2c6   :  { %3567 = vmatprep.subr.mxu0 %v5008_v29  ;;  %6143 = vst [vmem:[#allocation22_spill] sm:$0xff] %v5302_v18 }
 0x2c7   :  { %3568 = vmatpush3.msra.mxu0 %v5008_v29  ;;  %v1348_v33 = vpop.f32.mrf.mxu1 }
 0x2c8   :  { %3569 = vmatprep.subr.mxu0 %v5015_v53  ;;  %3506 = vmatmul.mubr.f32.gmra.mxu0 %v1410_v48  ;;  %v6144_v48 = vld [vmem:[#allocation32_spill] sm:$0xff] }
 0x2c9   :  { %3570 = vmatpush3.msra.mxu0 %v5015_v53  ;;  %3508 = vmatprep.mubr.f32.mxu0 %v1414_v14  ;;  %v1301_v38 = vadd.f32 %v6144_v48, %v5119_v12  ;;  %v1383_v14 = vmax.f32 %v1295_v37, 0.0  ;;  %v1407_v37 = vmax.f32 %v1331_v36, 0.0  ;;  %v1411_v48 = vmax.f32 %v1337_v30, 0.0 }
 0x2ca   :  { %3571 = vmatprep.subr.mxu0 %v5022_v6 }
 0x2cb   :  { %3572 = vmatpush3.msra.mxu0 %v5022_v6 }
 0x2cc   :  { %3573 = vmatprep.subr.mxu0 %v5030_v51  ;;  %3509 = vmatmul.mubr.f32.gmra.mxu0 %v1418_v24  ;;  %v1307_v24 = vadd.f32 %v6145_v56, %v5125_v1 }
 0x2cd   :  { %3574 = vmatpush3.msra.mxu0 %v5030_v51  ;;  %3511 = vmatprep.mubr.f32.mxu0 %v1422_v7  ;;  %v1387_v7 = vmax.f32 %v1301_v38, 0.0 }
 0x2ce   :  { %3575 = vmatprep.subr.mxu0 %v5037_v13  ;;  %v1391_v45 = vmax.f32 %v1307_v24, 0.0 }
 0x2cf   :  { %3576 = vmatpush3.msra.mxu0 %v5037_v13 }
 0x2d0   :  { %3577 = vmatprep.subr.mxu0 %v5044_v2  ;;  %3512 = vmatmul.mubr.f32.gmra.mxu0 %v1426_v59  ;;  %v1319_v59 = vadd.f32 %v5221_v17, %v5144_v19  ;;  %v1343_v17 = vadd.f32 %v1342_v31, %v5179_v8 }
 0x2d1   :  { %3578 = vmatpush3.msra.mxu0 %v5044_v2  ;;  %3581 = vmatprep.mubr.f32.mxu0 %v1367_v44  ;;  %v5312_v44 = vpop.f32.mrf.mxu1 }
 0x2d2   :  { %3579 = vmatprep.subr.mxu0 %v5051_v49  ;;  %6146 = vst [vmem:[#allocation27_spill] sm:$0xff] %v5312_v44  ;;  %v1399_v26 = vmax.f32 %v1319_v59, 0.0  ;;  %v1415_v38 = vmax.f32 %v1343_v17, 0.0 }
 0x2d3   :  { %3580 = vmatpush3.msra.mxu0 %v5051_v49 }
 0x2d4   :  { %3582 = vmatmul.mubr.f32.vlgmr.msra.gmra.mxu0 %v1371_v0  ;;  %3605 = vmatprep.subr.mxu0 %v6142_v43  ;;  %v1325_v0 = vadd.f32 %v5237_v25, %v5154_v39  ;;  %v1349_v25 = vadd.f32 %v1348_v33, %v5189_v60 }
 0x2d5   :  { %3584 = vmatprep.mubr.f32.mxu0 %v1375_v34  ;;  %v1354_v34 = vpop.f32.mrf.mxu1 }
 0x2d6   :  { %v1403_v55 = vmax.f32 %v1325_v0, 0.0  ;;  %v1419_v56 = vmax.f32 %v1349_v25, 0.0 }
 0x2d8   :  { %3585 = vmatmul.mubr.f32.gmra.mxu0 %v1379_v22  ;;  %v5320_v22 = vpop.f32.mrf.mxu1 }
 0x2d9   :  { %3587 = vmatprep.mubr.f32.mxu0 %v1383_v14  ;;  %6147 = vst [vmem:[#allocation32_spill] sm:$0xff] %v5320_v22  ;;  %v1355_v14 = vadd.f32 %v1354_v34, %v5199_v62 }
 0x2da   :  { %v1360_v58 = vpop.f32.mrf.mxu1 }
 0x2db   :  { %v1361_v24 = vadd.f32 %v1360_v58, %v5205_v32  ;;  %v1423_v46 = vmax.f32 %v1355_v14, 0.0 }
 0x2dc   :  { %3588 = vmatmul.mubr.f32.gmra.mxu0 %v1387_v7 }
 0x2dd   :  { %3590 = vmatprep.mubr.f32.mxu0 %v1391_v45  ;;  %v1427_v31 = vmax.f32 %v1361_v24, 0.0 }
 0x2e0   :  { %3591 = vmatmul.mubr.f32.gmra.mxu0 %v1395_v63 }
 0x2e1   :  { %3593 = vmatprep.mubr.f32.mxu0 %v1399_v26 }
 0x2e4   :  { %3594 = vmatmul.mubr.f32.gmra.mxu0 %v1403_v55 }
 0x2e5   :  { %3596 = vmatprep.mubr.f32.mxu0 %v1407_v37 }
 0x2e8   :  { %3597 = vmatmul.mubr.f32.gmra.mxu0 %v1411_v48 }
 0x2e9   :  { %3599 = vmatprep.mubr.f32.mxu0 %v1415_v38 }
 0x2ec   :  { %3600 = vmatmul.mubr.f32.gmra.mxu0 %v1419_v56 }
 0x2ed   :  { %3602 = vmatprep.mubr.f32.mxu0 %v1423_v46 }
 0x2f0   :  { %3603 = vmatmul.mubr.f32.gmra.mxu0 %v1427_v31 }
 0x2f1   :  { %3637 = vmatprep.mubr.msk.f32.mxu0 %vm4006_vm2, %v6142_v43 }
 0x343   :  { %v3401_v7 = vpop.f32.mrf.mxu0 }
 0x345   :  { %v1496_v9 = vpop.f32.mrf.mxu0 }
 0x346   :  { %v5376_v4 = vmul.f32 0.0078125, %v1496_v9 }
 0x34b   :  { %v3404_v33 = vpop.f32.mrf.mxu0 }
 0x34d   :  { %v1506_v45 = vpop.f32.mrf.mxu0 }
 0x353   :  { %v3407_v59 = vpop.f32.mrf.mxu0 }
 0x355   :  { %v1516_v63 = vpop.f32.mrf.mxu0 }
 0x35b   :  { %v3410_v0 = vpop.f32.mrf.mxu0 }
 0x35d   :  { %v1526_v26 = vpop.f32.mrf.mxu0 }
 0x363   :  { %v3413_v36 = vpop.f32.mrf.mxu0 }
 0x364   :  { %v5345_v32 = vmul.f32 0.0078125, %v3413_v36  ;;  %v5357_v36 = vmul.f32 0.0078125, %v3407_v59  ;;  %v5369_v59 = vmul.f32 0.0078125, %v3401_v7 }
 0x365   :  { %v1536_v34 = vpop.f32.mrf.mxu0 }
 0x368   :  { %v3416_v55 = vpop.f32.mrf.mxu0 }
 0x369   :  { %v5339_v46 = vmul.f32 0.0078125, %v3416_v55  ;;  %v5351_v55 = vmul.f32 0.0078125, %v3410_v0  ;;  %v5363_v0 = vmul.f32 0.0078125, %v3404_v33 }
 0x36a   :  { %v1546_v30 = vpop.f32.mrf.mxu0 }
 0x36b   :  { %v5348_v22 = vmul.f32 0.0078125, %v1546_v30  ;;  %v5360_v30 = vmul.f32 0.0078125, %v1526_v26  ;;  %v5372_v26 = vmul.f32 0.0078125, %v1506_v45 }
 0x36c   :  { %v3419_v37 = vpop.f32.mrf.mxu0 }
 0x36d   :  { %v5334_v56 = vmul.f32 0.0078125, %v3419_v37 }
 0x36e   :  { %v1556_v17 = vpop.f32.mrf.mxu0 }
 0x370   :  { %v3422_v48 = vpop.f32.mrf.mxu0 }
 0x371   :  { %v5327_v25 = vmul.f32 0.0078125, %v3422_v48  ;;  %v5342_v48 = vmul.f32 0.0078125, %v1556_v17  ;;  %v5354_v17 = vmul.f32 0.0078125, %v1536_v34  ;;  %v5366_v34 = vmul.f32 0.0078125, %v1516_v63 }
 0x372   :  { %v1566_v38 = vpop.f32.mrf.mxu0 }
 0x373   :  { %v5329_v14 = vmul.f32 0.0078125, %v1566_v38  ;;  %1621 = vmax.xlane.f32.xlu0 %v5327_v25 }
 0x374   :  { %v5332_v58 = vpop.f32.mrf.mxu0 }
 0x375   :  { %1619 = vmax.xlane.f32.xlu1 %v5329_v14 }
 0x376   :  { %v5337_v24 = vpop.f32.mrf.mxu0 }
 0x377   :  { %1617 = vmax.xlane.f32.xlu0 %v5334_v56 }
 0x378   :  { %v3495_v31 = vpop.f32.mrf.mxu0 }
 0x379   :  { %1613 = vmax.xlane.f32.xlu1 %v5339_v46 }
 0x37a   :  { %v1890_v38 = vpop.f32.mrf.mxu0 }
 0x37b   :  { %1615 = vmax.xlane.f32.xlu0 %v5342_v48 }
 0x37c   :  { %v3498_v37 = vpop.f32.mrf.mxu0 }
 0x37d   :  { %1609 = vmax.xlane.f32.xlu1 %v5345_v32 }
 0x37e   :  { %v1900_v62 = vpop.f32.mrf.mxu0 }
 0x37f   :  { %1611 = vmax.xlane.f32.xlu0 %v5348_v22 }
 0x380   :  { %v3501_v44 = vpop.f32.mrf.mxu0 }
 0x381   :  { %1605 = vmax.xlane.f32.xlu1 %v5351_v55 }
 0x382   :  { %v1910_v60 = vpop.f32.mrf.mxu0 }
 0x383   :  { %1607 = vmax.xlane.f32.xlu0 %v5354_v17 }
 0x384   :  { %v3504_v18 = vpop.f32.mrf.mxu0 }
 0x385   :  { %1601 = vmax.xlane.f32.xlu1 %v5357_v36 }
 0x386   :  { %v1920_v8 = vpop.f32.mrf.mxu0 }
 0x387   :  { %1603 = vmax.xlane.f32.xlu0 %v5360_v30 }
 0x388   :  { %v3507_v57 = vpop.f32.mrf.mxu0 }
 0x389   :  { %1597 = vmax.xlane.f32.xlu1 %v5363_v0  ;;  %v5388_v45 = vmul.f32 0.0078125, %v3507_v57  ;;  %v5403_v57 = vmul.f32 0.0078125, %v3501_v44  ;;  %v5418_v44 = vmul.f32 0.0078125, %v1890_v38 }
 0x38a   :  { %v1930_v40 = vpop.f32.mrf.mxu0 }
 0x38b   :  { %1599 = vmax.xlane.f32.xlu0 %v5366_v34  ;;  %v5394_v9 = vmul.f32 0.0078125, %v1930_v40  ;;  %v5409_v40 = vmul.f32 0.0078125, %v3498_v37  ;;  %v5426_v37 = vmul.f32 0.0078125, %v5337_v24 }
 0x38c   :  { %v3510_v47 = vpop.f32.mrf.mxu0 }
 0x38d   :  { %1593 = vmax.xlane.f32.xlu1 %v5369_v59  ;;  %v5382_v7 = vmul.f32 0.0078125, %v3510_v47  ;;  %v5397_v47 = vmul.f32 0.0078125, %v3504_v18  ;;  %v5412_v18 = vmul.f32 0.0078125, %v1900_v62 }
 0x38e   :  { %v1940_v42 = vpop.f32.mrf.mxu0 }
 0x38f   :  { %1595 = vmax.xlane.f32.xlu0 %v5372_v26  ;;  %v5390_v19 = vmul.f32 0.0078125, %v1940_v42  ;;  %v5406_v42 = vmul.f32 0.0078125, %v1910_v60  ;;  %v5422_v60 = vmul.f32 0.0078125, %v5332_v58 }
 0x390   :  { %v3513_v33 = vpop.f32.mrf.mxu0 }
 0x391   :  { %v5378_v63 = vmul.f32 0.0078125, %v3513_v33 }
 0x392   :  { %v1950_v39 = vpop.f32.mrf.mxu0 }
 0x393   :  { %1591 = vmax.xlane.f32.xlu0 %v5376_v4  ;;  %2005 = vmax.xlane.f32.xlu1 %v5378_v63  ;;  %v5384_v41 = vmul.f32 0.0078125, %v1950_v39  ;;  %v5400_v39 = vmul.f32 0.0078125, %v1920_v8  ;;  %v5415_v8 = vmul.f32 0.0078125, %v3495_v31 }
 0x397   :  { %2003 = vmax.xlane.f32.xlu0 %v5384_v41  ;;  %2001 = vmax.xlane.f32.xlu1 %v5382_v7 }
 0x39b   :  { %1999 = vmax.xlane.f32.xlu0 %v5390_v19  ;;  %1997 = vmax.xlane.f32.xlu1 %v5388_v45 }
 0x39f   :  { %1995 = vmax.xlane.f32.xlu0 %v5394_v9 }
 0x3a3   :  { %1993 = vmax.xlane.f32.xlu0 %v5397_v47 }
 0x3a7   :  { %1991 = vmax.xlane.f32.xlu0 %v5400_v39 }
 0x3ab   :  { %1989 = vmax.xlane.f32.xlu0 %v5403_v57 }
 0x3af   :  { %1987 = vmax.xlane.f32.xlu0 %v5406_v42 }
 0x3b3   :  { %1985 = vmax.xlane.f32.xlu0 %v5409_v40 }
 0x3b7   :  { %1983 = vmax.xlane.f32.xlu0 %v5412_v18 }
 0x3bb   :  { %1981 = vmax.xlane.f32.xlu0 %v5415_v8 }
 0x3bf   :  { %1979 = vmax.xlane.f32.xlu0 %v5418_v44 }
 0x3c3   :  { %1977 = vmax.xlane.f32.xlu0 %v5422_v60 }
 0x3c7   :  { %1975 = vmax.xlane.f32.xlu0 %v5426_v37 }
 0x3fc   :  { %v1622_v62 = vpop.xlane.xlu0 %1621 }
 0x3fd   :  { %v1638_v31 = vsub.f32 %v5327_v25, %v1622_v62 }
 0x3fe   :  { %v1620_v33 = vpop.xlane.xlu1 %1619 }
 0x3ff   :  { %v1669_v50 = vmul.f32 1.442695, %v1638_v31  ;;  %v1637_v38 = vsub.f32 %v5329_v14, %v1620_v33 }
 0x400   :  { %v1618_v28 = vpop.xlane.xlu0 %1617 }
 0x401   :  { %3747 = vpow2.f32 %v1669_v50  ;;  %v1667_v1 = vmul.f32 1.442695, %v1637_v38  ;;  %v1636_v58 = vsub.f32 %v5334_v56, %v1618_v28 }
 0x402   :  { %v1614_v12 = vpop.xlane.xlu1 %1613 }
 0x403   :  { %3749 = vpow2.f32 %v1667_v1  ;;  %v1665_v11 = vmul.f32 1.442695, %v1636_v58  ;;  %v1634_v2 = vsub.f32 %v5339_v46, %v1614_v12 }
 0x404   :  { %v1616_v52 = vpop.xlane.xlu0 %1615 }
 0x405   :  { %v1635_v24 = vsub.f32 %v5342_v48, %v1616_v52  ;;  %3751 = vpow2.f32 %v1665_v11  ;;  %v1661_v27 = vmul.f32 1.442695, %v1634_v2 }
 0x406   :  { %v1610_v62 = vpop.xlane.xlu1 %1609 }
 0x407   :  { %v1663_v25 = vmul.f32 1.442695, %v1635_v24  ;;  %v1632_v1 = vsub.f32 %v5345_v32, %v1610_v62 }
 0x408   :  { %v1612_v49 = vpop.xlane.xlu0 %1611 }
 0x409   :  { %3753 = vpow2.f32 %v1663_v25  ;;  %v1633_v50 = vsub.f32 %v5348_v22, %v1612_v49  ;;  %v1657_v12 = vmul.f32 1.442695, %v1632_v1 }
 0x40a   :  { %v1606_v28 = vpop.xlane.xlu1 %1605  ;;  %3755 = vpow2.f32 %v1661_v27 }
 0x40b   :  { %v1659_v52 = vmul.f32 1.442695, %v1633_v50  ;;  %v1630_v27 = vsub.f32 %v5351_v55, %v1606_v28 }
 0x40c   :  { %v1608_v31 = vpop.xlane.xlu0 %1607 }
 0x40d   :  { %v1631_v2 = vsub.f32 %v5354_v17, %v1608_v31  ;;  %3757 = vpow2.f32 %v1659_v52 }
 0x40e   :  { %v5435_v14 = vpop.eup %3747  ;;  %v1602_v49 = vpop.xlane.xlu1 %1601  ;;  %3759 = vpow2.f32 %v1657_v12 }
 0x40f   :  { %1701 = vadd.xlane.f32.xlu1 %v5435_v14  ;;  %v1655_v32 = vmul.f32 1.442695, %v1631_v2 }
 0x410   :  { %v1604_v56 = vpop.xlane.xlu0 %1603  ;;  %v5439_v11 = vpop.eup %3749 }
 0x411   :  { %v1629_v62 = vsub.f32 %v5360_v30, %v1604_v56 }
 0x412   :  { %v5444_v48 = vpop.eup %3751  ;;  %v1598_v17 = vpop.xlane.xlu1 %1597 }
 0x413   :  { %1699 = vadd.xlane.f32.xlu1 %v5439_v11  ;;  %v1651_v1 = vmul.f32 1.442695, %v1629_v62  ;;  %v1626_v56 = vsub.f32 %v5363_v0, %v1598_v17 }
 0x414   :  { %v1600_v46 = vpop.xlane.xlu0 %1599 }
 0x415   :  { %v1627_v22 = vsub.f32 %v5366_v34, %v1600_v46  ;;  %v1653_v34 = vmul.f32 1.442695, %v1630_v27 }
 0x416   :  { %v5449_v24 = vpop.eup %3753  ;;  %v1594_v12 = vpop.xlane.xlu1 %1593 }
 0x417   :  { %v1647_v33 = vmul.f32 1.442695, %v1627_v22  ;;  %1697 = vadd.xlane.f32.xlu1 %v5444_v48  ;;  %v5454_v55 = vpop.eup %3755  ;;  %v1624_v17 = vsub.f32 %v5369_v59, %v1594_v12 }
 0x418   :  { %v1596_v38 = vpop.xlane.xlu0 %1595 }
 0x419   :  { %3761 = vpow2.f32 %v1647_v33  ;;  %v1625_v58 = vsub.f32 %v5372_v26, %v1596_v38  ;;  %v1628_v26 = vsub.f32 %v5357_v36, %v1602_v49  ;;  %v1645_v38 = vmul.f32 1.442695, %v1626_v56 }
 0x41a   :  { %3763 = vpow2.f32 %v1655_v32  ;;  %v5459_v46 = vpop.eup %3757  ;;  %v5468_v32 = vpop.f32.mrf.mxu0  ;;  %v1641_v59 = vmul.f32 1.442695, %v1624_v17 }
 0x41b   :  { %v1643_v25 = vmul.f32 1.442695, %v1625_v58  ;;  %1695 = vadd.xlane.f32.xlu1 %v5449_v24  ;;  %v5463_v33 = vpop.eup %3759 }
 0x41c   :  { %v1592_v31 = vpop.xlane.xlu0 %1591  ;;  %v2006_v27 = vpop.xlane.xlu1 %2005 }
 0x41d   :  { %3765 = vpow2.f32 %v1643_v25  ;;  %v1623_v50 = vsub.f32 %v5376_v4, %v1592_v31  ;;  %v1649_v4 = vmul.f32 1.442695, %v1628_v26 }
 0x41e   :  { %3767 = vpow2.f32 %v1653_v34  ;;  %v5478_v34 = vpop.f32.mrf.mxu0 }
 0x41f   :  { %v1639_v28 = vmul.f32 1.442695, %v1623_v50  ;;  %1693 = vadd.xlane.f32.xlu1 %v5454_v55  ;;  %v2022_v50 = vsub.f32 %v5378_v63, %v2006_v27  ;;  %v5626_v54 = vmul.f32 0.0078125, %v5478_v34 }
 0x420   :  { %v2004_v52 = vpop.xlane.xlu0 %2003  ;;  %v2002_v62 = vpop.xlane.xlu1 %2001 }
 0x421   :  { %3769 = vpow2.f32 %v1639_v28  ;;  %v2021_v2 = vsub.f32 %v5384_v41, %v2004_v52  ;;  %v2053_v52 = vmul.f32 1.442695, %v2022_v50  ;;  %v2020_v63 = vsub.f32 %v5382_v7, %v2002_v62 }
 0x422   :  { %3771 = vpow2.f32 %v1651_v1 }
 0x423   :  { %v2051_v30 = vmul.f32 1.442695, %v2021_v2  ;;  %1691 = vadd.xlane.f32.xlu1 %v5459_v46 }
 0x424   :  { %v2000_v22 = vpop.xlane.xlu0 %1999 }
 0x425   :  { %3773 = vpow2.f32 %v2051_v30  ;;  %v2019_v36 = vsub.f32 %v5390_v19, %v2000_v22  ;;  %v1998_v30 = vpop.xlane.xlu1 %1997 }
 0x426   :  { %v5466_v49 = vpop.eup %3761  ;;  %3775 = vpow2.f32 %v1649_v4 }
 0x427   :  { %v2047_v41 = vmul.f32 1.442695, %v2019_v36  ;;  %1679 = vadd.xlane.f32.xlu0 %v5466_v49  ;;  %1689 = vadd.xlane.f32.xlu1 %v5463_v33  ;;  %v5472_v0 = vpop.eup %3763  ;;  %v2018_v36 = vsub.f32 %v5388_v45, %v1998_v30 }
 0x428   :  { %v1996_v58 = vpop.xlane.xlu0 %1995 }
 0x429   :  { %3777 = vpow2.f32 %v2047_v41  ;;  %v2017_v25 = vsub.f32 %v5394_v9, %v1996_v58  ;;  %v5487_v9 = vpop.f32.mrf.mxu0  ;;  %v2049_v58 = vmul.f32 1.442695, %v2020_v63  ;;  %v2045_v17 = vmul.f32 1.442695, %v2018_v36 }
 0x42a   :  { %v5476_v19 = vpop.eup %3765  ;;  %3779 = vpow2.f32 %v1645_v38 }
 0x42b   :  { %v2043_v31 = vmul.f32 1.442695, %v2017_v25  ;;  %1675 = vadd.xlane.f32.xlu0 %v5476_v19  ;;  %1687 = vadd.xlane.f32.xlu1 %v5472_v0  ;;  %v5483_v26 = vpop.eup %3767  ;;  %v5497_v22 = vpop.f32.mrf.mxu0 }
 0x42c   :  { %v1994_v28 = vpop.xlane.xlu0 %1993 }
 0x42d   :  { %3781 = vpow2.f32 %v2043_v31  ;;  %v2016_v45 = vsub.f32 %v5397_v47, %v1994_v28 }
 0x42e   :  { %v5485_v1 = vpop.eup %3769  ;;  %3783 = vpow2.f32 %v1641_v59 }
 0x42f   :  { %1671 = vadd.xlane.f32.xlu0 %v5485_v1  ;;  %1685 = vadd.xlane.f32.xlu1 %v5483_v26  ;;  %v5491_v2 = vpop.eup %3771  ;;  %3785 = vpow2.f32 %v2053_v52  ;;  %v2041_v30 = vmul.f32 1.442695, %v2016_v45 }
 0x430   :  { %v1992_v12 = vpop.xlane.xlu0 %1991 }
 0x431   :  { %v2015_v4 = vsub.f32 %v5400_v39, %v1992_v12  ;;  %v5506_v39 = vpop.f32.mrf.mxu0 }
 0x432   :  { %v5495_v56 = vpop.eup %3773 }
 0x433   :  { %v2039_v27 = vmul.f32 1.442695, %v2015_v4  ;;  %2083 = vadd.xlane.f32.xlu0 %v5495_v56  ;;  %1683 = vadd.xlane.f32.xlu1 %v5491_v2  ;;  %v5502_v38 = vpop.eup %3775  ;;  %v5516_v59 = vpop.f32.mrf.mxu0 }
 0x434   :  { %v1990_v41 = vpop.xlane.xlu0 %1989 }
 0x435   :  { %3787 = vpow2.f32 %v2039_v27  ;;  %v2014_v12 = vsub.f32 %v5403_v57, %v1990_v41  ;;  %v5523_v47 = vpop.f32.mrf.mxu0 }
 0x436   :  { %v5504_v7 = vpop.eup %3777  ;;  %3789 = vpow2.f32 %v2049_v58 }
 0x437   :  { %2079 = vadd.xlane.f32.xlu0 %v5504_v7  ;;  %1681 = vadd.xlane.f32.xlu1 %v5502_v38  ;;  %v5510_v62 = vpop.eup %3779  ;;  %3791 = vpow2.f32 %v2045_v17  ;;  %v5532_v57 = vpop.f32.mrf.mxu0 }
 0x438   :  { %v1988_v25 = vpop.xlane.xlu0 %1987 }
 0x439   :  { %v2013_v31 = vsub.f32 %v5406_v42, %v1988_v25  ;;  %v2037_v42 = vmul.f32 1.442695, %v2014_v12 }
 0x43a   :  { %v5514_v50 = vpop.eup %3781 }
 0x43b   :  { %v2035_v52 = vmul.f32 1.442695, %v2013_v31  ;;  %2075 = vadd.xlane.f32.xlu0 %v5514_v50  ;;  %1677 = vadd.xlane.f32.xlu1 %v5510_v62  ;;  %v5521_v4 = vpop.eup %3783 }
 0x43c   :  { %v1986_v63 = vpop.xlane.xlu0 %1985  ;;  %v5526_v27 = vpop.eup %3785 }
 0x43d   :  { %3793 = vpow2.f32 %v2035_v52  ;;  %v2012_v36 = vsub.f32 %v5409_v40, %v1986_v63  ;;  %v3595_v40 = vpop.f32.mrf.mxu0 }
 0x43e   :  { %3795 = vpow2.f32 %v2041_v30 }
 0x43f   :  { %1673 = vadd.xlane.f32.xlu1 %v5521_v4  ;;  %3797 = vpow2.f32 %v2037_v42  ;;  %v2033_v45 = vmul.f32 1.442695, %v2012_v36  ;;  %v2299_v42 = vpop.f32.mrf.mxu0 }
 0x440   :  { %v1984_v28 = vpop.xlane.xlu0 %1983 }
 0x441   :  { %v2011_v58 = vsub.f32 %v5412_v18, %v1984_v28 }
 0x442   :  { %v5530_v17 = vpop.eup %3787 }
 0x443   :  { %v2031_v41 = vmul.f32 1.442695, %v2011_v58  ;;  %2071 = vadd.xlane.f32.xlu0 %v5530_v17  ;;  %2085 = vadd.xlane.f32.xlu1 %v5526_v27  ;;  %v5537_v52 = vpop.eup %3789 }
 0x444   :  { %v1982_v25 = vpop.xlane.xlu0 %1981  ;;  %v5540_v63 = vpop.eup %3791 }
 0x445   :  { %3799 = vpow2.f32 %v2031_v41  ;;  %v2010_v31 = vsub.f32 %v5415_v8, %v1982_v25  ;;  %v3598_v25 = vpop.f32.mrf.mxu0 }
 0x446   :  { %3801 = vpow2.f32 %v2033_v45 }
 0x447   :  { %2081 = vadd.xlane.f32.xlu1 %v5537_v52  ;;  %v2029_v18 = vmul.f32 1.442695, %v2010_v31  ;;  %v2309_v21 = vpop.f32.mrf.mxu0 }
 0x448   :  { %v1980_v12 = vpop.xlane.xlu0 %1979  ;;  %v5588_v29 = vmul.f32 0.0078125, %v2309_v21  ;;  %v5606_v21 = vmul.f32 0.0078125, %v5506_v39  ;;  %v5622_v39 = vmul.f32 0.0078125, %v5468_v32 }
 0x449   :  { %v2009_v30 = vsub.f32 %v5418_v44, %v1980_v12  ;;  %3803 = vpow2.f32 %v2029_v18 }
 0x44a   :  { %v5543_v28 = vpop.eup %3793 }
 0x44b   :  { %v2027_v58 = vmul.f32 1.442695, %v2009_v30  ;;  %2067 = vadd.xlane.f32.xlu0 %v5543_v28  ;;  %2077 = vadd.xlane.f32.xlu1 %v5540_v63  ;;  %v5548_v41 = vpop.eup %3795 }
 0x44c   :  { %v1978_v8 = vpop.xlane.xlu0 %1977  ;;  %v5551_v45 = vpop.eup %3797 }
 0x44d   :  { %3805 = vpow2.f32 %v2027_v58  ;;  %v2008_v36 = vsub.f32 %v5422_v60, %v1978_v8  ;;  %v3601_v58 = vpop.f32.mrf.mxu0 }
 0x44e   :  { %v5579_v6 = vmul.f32 0.0078125, %v3601_v58  ;;  %v5594_v58 = vmul.f32 0.0078125, %v2299_v42 }
 0x44f   :  { %v2025_v31 = vmul.f32 1.442695, %v2008_v36  ;;  %2073 = vadd.xlane.f32.xlu1 %v5548_v41 }
 0x450   :  { %v1976_v44 = vpop.xlane.xlu0 %1975 }
 0x451   :  { %3807 = vpow2.f32 %v2025_v31  ;;  %v2007_v12 = vsub.f32 %v5426_v37, %v1976_v44  ;;  %v2319_v31 = vpop.f32.mrf.mxu0 }
 0x452   :  { %v5554_v30 = vpop.eup %3799  ;;  %v5582_v53 = vmul.f32 0.0078125, %v2319_v31  ;;  %v5598_v31 = vmul.f32 0.0078125, %v5523_v47  ;;  %v5614_v47 = vmul.f32 0.0078125, %v5487_v9 }
 0x453   :  { %v2023_v18 = vmul.f32 1.442695, %v2007_v12  ;;  %2063 = vadd.xlane.f32.xlu0 %v5554_v30  ;;  %2069 = vadd.xlane.f32.xlu1 %v5551_v45  ;;  %v5558_v60 = vpop.eup %3801  ;;  %v3604_v44 = vpop.f32.mrf.mxu0 }
 0x454   :  { %v5570_v12 = vmul.f32 0.0078125, %v3604_v44  ;;  %v5585_v44 = vmul.f32 0.0078125, %v3598_v25  ;;  %v5602_v25 = vmul.f32 0.0078125, %v5532_v57  ;;  %v5618_v57 = vmul.f32 0.0078125, %v5497_v22 }
 0x455   :  { %3809 = vpow2.f32 %v2023_v18  ;;  %v2329_v13 = vpop.f32.mrf.mxu0 }
 0x456   :  { %v5561_v8 = vpop.eup %3803  ;;  %v5576_v51 = vmul.f32 0.0078125, %v2329_v13  ;;  %v5591_v13 = vmul.f32 0.0078125, %v3595_v40  ;;  %v5610_v40 = vmul.f32 0.0078125, %v5516_v59 }
 0x457   :  { %2065 = vadd.xlane.f32.xlu1 %v5558_v60 }
 0x45a   :  { %v5563_v36 = vpop.eup %3805 }
 0x45b   :  { %2059 = vadd.xlane.f32.xlu0 %v5563_v36  ;;  %2061 = vadd.xlane.f32.xlu1 %v5561_v8 }
 0x45e   :  { %v5567_v37 = vpop.eup %3807 }
 0x45f   :  { %2057 = vadd.xlane.f32.xlu1 %v5567_v37 }
 0x462   :  { %v5572_v18 = vpop.eup %3809 }
 0x463   :  { %2055 = vadd.xlane.f32.xlu0 %v5572_v18  ;;  %2384 = vmax.xlane.f32.xlu1 %v5570_v12 }
 0x467   :  { %2382 = vmax.xlane.f32.xlu1 %v5576_v51 }
 0x46b   :  { %2380 = vmax.xlane.f32.xlu1 %v5579_v6 }
 0x46f   :  { %2378 = vmax.xlane.f32.xlu1 %v5582_v53 }
 0x473   :  { %2376 = vmax.xlane.f32.xlu1 %v5585_v44 }
 0x477   :  { %2374 = vmax.xlane.f32.xlu1 %v5588_v29 }
 0x47b   :  { %2372 = vmax.xlane.f32.xlu1 %v5591_v13 }
 0x47f   :  { %2370 = vmax.xlane.f32.xlu1 %v5594_v58 }
 0x483   :  { %2368 = vmax.xlane.f32.xlu1 %v5598_v31 }
 0x487   :  { %2366 = vmax.xlane.f32.xlu1 %v5602_v25 }
 0x48b   :  { %2364 = vmax.xlane.f32.xlu1 %v5606_v21 }
 0x48f   :  { %2362 = vmax.xlane.f32.xlu1 %v5610_v40 }
 0x493   :  { %2360 = vmax.xlane.f32.xlu1 %v5614_v47 }
 0x497   :  { %2358 = vmax.xlane.f32.xlu1 %v5618_v57 }
 0x498   :  { %v1702_v42 = vpop.xlane.xlu1 %1701 }
 0x499   :  { %3811 = vrcp.f32 %v1702_v42 }
 0x49b   :  { %2356 = vmax.xlane.f32.xlu1 %v5622_v39 }
 0x49c   :  { %v1700_v59 = vpop.xlane.xlu1 %1699 }
 0x49d   :  { %3813 = vrcp.f32 %v1700_v59 }
 0x49f   :  { %2354 = vmax.xlane.f32.xlu1 %v5626_v54 }
 0x4a0   :  { %v1698_v9 = vpop.xlane.xlu1 %1697 }
 0x4a1   :  { %3815 = vrcp.f32 %v1698_v9 }
 0x4a4   :  { %v1696_v22 = vpop.xlane.xlu1 %1695 }
 0x4a5   :  { %3817 = vrcp.f32 %v1696_v22 }
 0x4a6   :  { %v3812_v20 = vpop.eup %3811 }
 0x4a7   :  { %v1734_v15 = vmul.f32 %v3812_v20, %v5435_v14 }
 0x4a8   :  { %v1694_v23 = vpop.xlane.xlu1 %1693 }
 0x4a9   :  { %3819 = vrcp.f32 %v1694_v23  ;;  %3424 = vmatpush3.xpose.msra.mxu1 %v1734_v15 }
 0x4aa   :  { %v3814_v32 = vpop.eup %3813  ;;  %3425 = vmatprep.subr.mxu1 %v6142_v43 }
 0x4ab   :  { %v1732_v42 = vmul.f32 %v3814_v32, %v5439_v11 }
 0x4ac   :  { %v1692_v34 = vpop.xlane.xlu1 %1691 }
 0x4ad   :  { %3821 = vrcp.f32 %v1692_v34  ;;  %3426 = vmatpush3.xpose.msra.mxu1 %v1732_v42 }
 0x4ae   :  { %v3816_v59 = vpop.eup %3815  ;;  %3427 = vmatprep.subr.mxu1 %v6142_v43 }
 0x4af   :  { %v1730_v9 = vmul.f32 %v3816_v59, %v5444_v48 }
 0x4b0   :  { %v1690_v22 = vpop.xlane.xlu1 %1689  ;;  %v1680_v59 = vpop.xlane.xlu0 %1679 }
 0x4b1   :  { %3428 = vmatpush3.xpose.msra.mxu1 %v1730_v9  ;;  %3823 = vrcp.f32 %v1690_v22 }
 0x4b2   :  { %v3818_v5 = vpop.eup %3817  ;;  %3429 = vmatprep.subr.mxu1 %v6142_v43 }
 0x4b3   :  { %v1728_v23 = vmul.f32 %v3818_v5, %v5449_v24 }
 0x4b4   :  { %v1688_v15 = vpop.xlane.xlu1 %1687 }
 0x4b5   :  { %3430 = vmatpush3.xpose.msra.mxu1 %v1728_v23  ;;  %3825 = vrcp.f32 %v1688_v15 }
 0x4b6   :  { %v3820_v20 = vpop.eup %3819  ;;  %3431 = vmatprep.subr.mxu1 %v6142_v43 }
 0x4b7   :  { %v1726_v14 = vmul.f32 %v3820_v20, %v5454_v55  ;;  %v1676_v20 = vpop.xlane.xlu0 %1675 }
 0x4b8   :  { %v1686_v11 = vpop.xlane.xlu1 %1685 }
 0x4b9   :  { %3432 = vmatpush3.xpose.msra.mxu1 %v1726_v14  ;;  %3827 = vrcp.f32 %v1686_v11 }
 0x4ba   :  { %v3822_v32 = vpop.eup %3821  ;;  %3433 = vmatprep.subr.mxu1 %v6142_v43 }
 0x4bb   :  { %v1724_v48 = vmul.f32 %v3822_v32, %v5459_v46 }
 0x4bc   :  { %v1684_v42 = vpop.xlane.xlu1 %1683 }
 0x4bd   :  { %3434 = vmatpush3.xpose.msra.mxu1 %v1724_v48  ;;  %3829 = vrcp.f32 %v1684_v42 }
 0x4be   :  { %3435 = vmatprep.subr.mxu1 %v6142_v43  ;;  %v3824_v5 = vpop.eup %3823 }
 0x4bf   :  { %v1722_v34 = vmul.f32 %v3824_v5, %v5463_v33  ;;  %v1672_v5 = vpop.xlane.xlu0 %1671 }
 0x4c0   :  { %v1682_v24 = vpop.xlane.xlu1 %1681 }
 0x4c1   :  { %3831 = vrcp.f32 %v1682_v24  ;;  %3436 = vmatpush3.xpose.msra.mxu1 %v1722_v34 }
 0x4c2   :  { %v3826_v55 = vpop.eup %3825  ;;  %3437 = vmatprep.subr.mxu1 %v6142_v43  ;;  %3833 = vrcp.f32 %v1680_v59 }
 0x4c3   :  { %v1720_v22 = vmul.f32 %v3826_v55, %v5472_v0 }
 0x4c4   :  { %v1678_v9 = vpop.xlane.xlu1 %1677 }
 0x4c5   :  { %3438 = vmatpush3.xpose.msra.mxu1 %v1720_v22  ;;  %3835 = vrcp.f32 %v1678_v9  ;;  %v2084_v9 = vpop.xlane.xlu0 %2083 }
 0x4c6   :  { %v3828_v46 = vpop.eup %3827  ;;  %3439 = vmatprep.subr.mxu1 %v6142_v43  ;;  %3837 = vrcp.f32 %v1676_v20 }
 0x4c7   :  { %v1718_v15 = vmul.f32 %v3828_v46, %v5483_v26 }
 0x4c8   :  { %v1674_v23 = vpop.xlane.xlu1 %1673 }
 0x4c9   :  { %3440 = vmatpush3.xpose.msra.mxu1 %v1718_v15  ;;  %3839 = vrcp.f32 %v1674_v23 }
 0x4ca   :  { %v3830_v33 = vpop.eup %3829  ;;  %3441 = vmatprep.subr.mxu1 %v6142_v43  ;;  %3841 = vrcp.f32 %v1672_v5 }
 0x4cb   :  { %v1716_v11 = vmul.f32 %v3830_v33, %v5491_v2 }
 0x4cc   :  { %v2086_v14 = vpop.xlane.xlu1 %2085 }
 0x4cd   :  { %3442 = vmatpush3.xpose.msra.mxu1 %v1716_v11  ;;  %3843 = vrcp.f32 %v2086_v14 }
 0x4ce   :  { %v3832_v32 = vpop.eup %3831  ;;  %3443 = vmatprep.subr.mxu1 %v6142_v43  ;;  %3845 = vrcp.f32 %v2084_v9 }
 0x4cf   :  { %v1714_v48 = vmul.f32 %v3832_v32, %v5502_v38  ;;  %v3834_v42 = vpop.eup %3833 }
 0x4d0   :  { %v2082_v0 = vpop.xlane.xlu1 %2081  ;;  %v1712_v24 = vmul.f32 %v3834_v42, %v5466_v49 }
 0x4d1   :  { %3444 = vmatpush3.xpose.msra.mxu1 %v1714_v48  ;;  %3847 = vrcp.f32 %v2082_v0  ;;  %v6148_v0 = vld [vmem:[#allocation14_spill] sm:$0xff] }
 0x4d2   :  { %3445 = vmatprep.subr.mxu1 %v6142_v43  ;;  %v3836_v34 = vpop.eup %3835 }
 0x4d3   :  { %v1710_v59 = vmul.f32 %v3836_v34, %v5510_v62  ;;  %v3838_v55 = vpop.eup %3837  ;;  %v2080_v62 = vpop.xlane.xlu0 %2079 }
 0x4d4   :  { %v2078_v26 = vpop.xlane.xlu1 %2077  ;;  %v1708_v22 = vmul.f32 %v3838_v55, %v5476_v19  ;;  %3849 = vrcp.f32 %v2080_v62 }
 0x4d5   :  { %3446 = vmatpush3.xpose.msra.mxu1 %v1712_v24  ;;  %3851 = vrcp.f32 %v2078_v26 }
 0x4d6   :  { %3447 = vmatprep.subr.mxu1 %v6142_v43  ;;  %v3840_v46 = vpop.eup %3839 }
 0x4d7   :  { %v1706_v23 = vmul.f32 %v3840_v46, %v5521_v4  ;;  %v3842_v15 = vpop.eup %3841  ;;  %v2076_v32 = vpop.xlane.xlu0 %2075 }
 0x4d8   :  { %v2074_v2 = vpop.xlane.xlu1 %2073  ;;  %v1704_v33 = vmul.f32 %v3842_v15, %v5485_v1  ;;  %3853 = vrcp.f32 %v2076_v32 }
 0x4d9   :  { %3448 = vmatpush3.xpose.msra.mxu1 %v1710_v59  ;;  %3855 = vrcp.f32 %v2074_v2 }
 0x4da   :  { %3449 = vmatprep.subr.mxu1 %v6142_v43  ;;  %v3844_v19 = vpop.eup %3843 }
 0x4db   :  { %v2118_v11 = vmul.f32 %v3844_v19, %v5526_v27  ;;  %v3846_v4 = vpop.eup %3845  ;;  %v2072_v59 = vpop.xlane.xlu0 %2071 }
 0x4dc   :  { %v2070_v38 = vpop.xlane.xlu1 %2069  ;;  %v2116_v48 = vmul.f32 %v3846_v4, %v5495_v56 }
 0x4dd   :  { %3450 = vmatpush3.xpose.msra.mxu1 %v1708_v22 }
 0x4de   :  { %3451 = vmatprep.subr.mxu1 %v6142_v43  ;;  %v3848_v42 = vpop.eup %3847 }
 0x4df   :  { %v2114_v24 = vmul.f32 %v3848_v42, %v5537_v52  ;;  %v2068_v15 = vpop.xlane.xlu0 %2067 }
 0x4e0   :  { %v5657_v49 = vpop.xlane.xlu1 %2065 }
 0x4e1   :  { %3452 = vmatpush3.xpose.msra.mxu1 %v1706_v23  ;;  %v3850_v34 = vpop.eup %3849 }
 0x4e2   :  { %3453 = vmatprep.subr.mxu1 %v6142_v43  ;;  %v3852_v22 = vpop.eup %3851 }
 0x4e4   :  { %v5661_v20 = vpop.xlane.xlu1 %2061 }
 0x4e5   :  { %3454 = vmatpush3.xpose.msra.mxu1 %v1704_v33  ;;  %v3854_v23 = vpop.eup %3853 }
 0x4e6   :  { %3514 = vmatprep.subr.mxu1 %v6142_v43  ;;  %v3856_v19 = vpop.eup %3855 }
 0x4e7   :  { %v2106_v4 = vmul.f32 %v3856_v19, %v5548_v41 }
 0x4e8   :  { %v5665_v14 = vpop.xlane.xlu1 %2057  ;;  %3456 = vmatmul.mubr.f32.vlgmr.msra.gmra.mxu1 %v6148_v0 }
 0x4e9   :  { %3515 = vmatpush3.xpose.msra.mxu1 %v2118_v11  ;;  %3546 = vmatprep.mubr.msk.f32.mxu1 %vm4006_vm2, %v6142_v43 }
 0x4ea   :  { %3516 = vmatprep.subr.mxu1 %v6142_v43 }
 0x4ec   :  { %v2385_v1 = vpop.xlane.xlu1 %2384 }
 0x4ed   :  { %v2401_v5 = vsub.f32 %v5570_v12, %v2385_v1  ;;  %3517 = vmatpush3.xpose.msra.mxu1 %v2116_v48  ;;  %v2112_v12 = vmul.f32 %v3850_v34, %v5504_v7  ;;  %v2064_v1 = vpop.xlane.xlu0 %2063 }
 0x4ee   :  { %3518 = vmatprep.subr.mxu1 %v6142_v43 }
 0x4ef   :  { %v2432_v26 = vmul.f32 1.442695, %v2401_v5 }
 0x4f0   :  { %v2383_v27 = vpop.xlane.xlu1 %2382 }
 0x4f1   :  { %3857 = vpow2.f32 %v2432_v26  ;;  %v2400_v55 = vsub.f32 %v5576_v51, %v2383_v27  ;;  %3519 = vmatpush3.xpose.msra.mxu1 %v2114_v24  ;;  %v2110_v51 = vmul.f32 %v3852_v22, %v5540_v63 }
 0x4f2   :  { %3520 = vmatprep.subr.mxu1 %v6142_v43  ;;  %3859 = vrcp.f32 %v2072_v59  ;;  %v2060_v59 = vpop.xlane.xlu0 %2059 }
 0x4f3   :  { %v2430_v9 = vmul.f32 1.442695, %v2400_v55 }
 0x4f4   :  { %v2381_v56 = vpop.xlane.xlu1 %2380 }
 0x4f5   :  { %3861 = vpow2.f32 %v2430_v9  ;;  %v2399_v2 = vsub.f32 %v5579_v6, %v2381_v56  ;;  %3521 = vmatpush3.xpose.msra.mxu1 %v2112_v12  ;;  %v2108_v6 = vmul.f32 %v3854_v23, %v5514_v50 }
 0x4f6   :  { %3522 = vmatprep.subr.mxu1 %v6142_v43  ;;  %3863 = vrcp.f32 %v2070_v38 }
 0x4f7   :  { %v2428_v46 = vmul.f32 1.442695, %v2399_v2 }
 0x4f8   :  { %v2379_v52 = vpop.xlane.xlu1 %2378 }
 0x4f9   :  { %3865 = vpow2.f32 %v2428_v46  ;;  %v2398_v62 = vsub.f32 %v5582_v53, %v2379_v52  ;;  %3523 = vmatpush3.xpose.msra.mxu1 %v2110_v51  ;;  %v2056_v52 = vpop.xlane.xlu0 %2055 }
 0x4fa   :  { %3524 = vmatprep.subr.mxu1 %v6142_v43  ;;  %3867 = vrcp.f32 %v2068_v15 }
 0x4fb   :  { %v2426_v33 = vmul.f32 1.442695, %v2398_v62 }
 0x4fc   :  { %v2377_v7 = vpop.xlane.xlu1 %2376 }
 0x4fd   :  { %3869 = vpow2.f32 %v2426_v33  ;;  %v2397_v38 = vsub.f32 %v5585_v44, %v2377_v7  ;;  %3525 = vmatpush3.xpose.msra.mxu1 %v2108_v6 }
 0x4fe   :  { %v5686_v11 = vpop.eup %3857  ;;  %3526 = vmatprep.subr.mxu1 %v6142_v43  ;;  %3871 = vrcp.f32 %v5657_v49 }
 0x4ff   :  { %v2424_v63 = vmul.f32 1.442695, %v2397_v38  ;;  %2464 = vadd.xlane.f32.xlu1 %v5686_v11  ;;  %v3860_v32 = vpop.eup %3859 }
 0x500   :  { %v2375_v53 = vpop.xlane.xlu1 %2374  ;;  %v2104_v49 = vmul.f32 %v3860_v32, %v5530_v17 }
 0x501   :  { %3873 = vpow2.f32 %v2424_v63  ;;  %v2396_v50 = vsub.f32 %v5588_v29, %v2375_v53  ;;  %3527 = vmatpush3.xpose.msra.mxu1 %v2106_v4 }
 0x502   :  { %v5693_v48 = vpop.eup %3861  ;;  %3528 = vmatprep.subr.mxu1 %v6142_v43  ;;  %3875 = vrcp.f32 %v2064_v1 }
 0x503   :  { %v2422_v44 = vmul.f32 1.442695, %v2396_v50  ;;  %2462 = vadd.xlane.f32.xlu1 %v5693_v48  ;;  %v3864_v5 = vpop.eup %3863 }
 0x504   :  { %v2373_v42 = vpop.xlane.xlu1 %2372  ;;  %v2102_v24 = vmul.f32 %v3864_v5, %v5551_v45  ;;  %v6149_v5 = vld [vmem:[#allocation16_spill] sm:$0xff] }
 0x505   :  { %3877 = vpow2.f32 %v2422_v44  ;;  %v2395_v41 = vsub.f32 %v5591_v13, %v2373_v42  ;;  %3529 = vmatpush3.xpose.msra.mxu1 %v2104_v49 }
 0x506   :  { %v5699_v26 = vpop.eup %3865  ;;  %3530 = vmatprep.subr.mxu1 %v6142_v43  ;;  %3879 = vrcp.f32 %v5661_v20 }
 0x507   :  { %v2420_v29 = vmul.f32 1.442695, %v2395_v41  ;;  %2460 = vadd.xlane.f32.xlu1 %v5699_v26  ;;  %v3868_v34 = vpop.eup %3867  ;;  %v1273_v41 = vadd.f32 %v6149_v5, %v5076_v61 }
 0x508   :  { %v2371_v27 = vpop.xlane.xlu1 %2370  ;;  %v2100_v20 = vmul.f32 %v3868_v34, %v5543_v28 }
 0x509   :  { %3881 = vpow2.f32 %v2420_v29  ;;  %v2394_v17 = vsub.f32 %v5594_v58, %v2371_v27  ;;  %3531 = vmatpush3.xpose.msra.mxu1 %v2102_v24  ;;  %v1368_v24 = vmax.f32 %v1273_v41, 0.0 }
 0x50a   :  { %v5706_v55 = vpop.eup %3869  ;;  %3532 = vmatprep.subr.mxu1 %v6142_v43  ;;  %3883 = vrcp.f32 %v2060_v59  ;;  %v6152_v59 = vld [vmem:[#allocation4_spill] sm:$0xff] }
 0x50b   :  { %v2418_v13 = vmul.f32 1.442695, %v2394_v17  ;;  %2458 = vadd.xlane.f32.xlu1 %v5706_v55  ;;  %v3872_v56 = vpop.eup %3871  ;;  %v6153_v17 = vld [vmem:[#allocation5_spill] sm:$0xff] }
 0x50c   :  { %v2369_v9 = vpop.xlane.xlu1 %2368  ;;  %v2098_v2 = vmul.f32 %v3872_v56, %v5558_v60  ;;  %v6157_v56 = vld [vmem:[#allocation9_spill] sm:$0xff] }
 0x50d   :  { %3885 = vpow2.f32 %v2418_v13  ;;  %v2393_v45 = vsub.f32 %v5598_v31, %v2369_v9  ;;  %3533 = vmatpush3.xpose.msra.mxu1 %v2100_v20  ;;  %v6155_v9 = vld [vmem:[#allocation7_spill] sm:$0xff]  ;;  %v6156_v20 = vld [vmem:[#allocation8_spill] sm:$0xff] }
 0x50e   :  { %v5712_v12 = vpop.eup %3873  ;;  %3534 = vmatprep.subr.mxu1 %v6142_v43  ;;  %3887 = vrcp.f32 %v5665_v14 }
 0x50f   :  { %v2416_v58 = vmul.f32 1.442695, %v2393_v45  ;;  %2456 = vadd.xlane.f32.xlu1 %v5712_v12  ;;  %v3876_v46 = vpop.eup %3875  ;;  %v6158_v45 = vld [vmem:[#allocation10_spill] sm:$0xff] }
 0x510   :  { %v2367_v22 = vpop.xlane.xlu1 %2366  ;;  %v2096_v14 = vmul.f32 %v3876_v46, %v5554_v30 }
 0x511   :  { %3889 = vpow2.f32 %v2416_v58  ;;  %v2392_v28 = vsub.f32 %v5602_v25, %v2367_v22  ;;  %3535 = vmatpush3.xpose.msra.mxu1 %v2098_v2  ;;  %v6159_v58 = vld [vmem:[#allocation11_spill] sm:$0xff]  ;;  %v6161_v2 = vld [vmem:[#allocation18_spill] sm:$0xff] }
 0x512   :  { %v5719_v51 = vpop.eup %3877  ;;  %3536 = vmatprep.subr.mxu1 %v6142_v43  ;;  %3891 = vrcp.f32 %v2056_v52  ;;  %v6160_v22 = vld [vmem:[#allocation15_spill] sm:$0xff]  ;;  %v6162_v52 = vld [vmem:[#allocation17_spill] sm:$0xff] }
 0x513   :  { %v2414_v31 = vmul.f32 1.442695, %v2392_v28  ;;  %2454 = vadd.xlane.f32.xlu1 %v5719_v51  ;;  %v3880_v15 = vpop.eup %3879  ;;  %v1279_v46 = vadd.f32 %v6161_v2, %v6160_v22  ;;  %v6163_v28 = vld [vmem:[#allocation20_spill] sm:$0xff]  ;;  %v6184_v22 = vld [vmem:[#allocation35_spill] sm:$0xff]  ;;  %v6185_v2 = vld [vmem:[#allocation22_spill] sm:$0xff] }
 0x514   :  { %v2365_v23 = vpop.xlane.xlu1 %2364  ;;  %v2094_v7 = vmul.f32 %v3880_v15, %v5561_v8 }
 0x515   :  { %3893 = vpow2.f32 %v2414_v31  ;;  %v2391_v60 = vsub.f32 %v5606_v21, %v2365_v23  ;;  %3537 = vmatpush3.xpose.msra.mxu1 %v2096_v14  ;;  %v1285_v31 = vadd.f32 %v6163_v28, %v6162_v52  ;;  %v6164_v23 = vld [vmem:[#allocation12_spill] sm:$0xff]  ;;  %v6165_v14 = vld [vmem:[#allocation13_spill] sm:$0xff]  ;;  %v1372_v15 = vmax.f32 %v1279_v46, 0.0 }
 0x516   :  { %v5725_v62 = vpop.eup %3881  ;;  %3538 = vmatprep.subr.mxu1 %v6142_v43  ;;  %v1345_v46 = vadd.f32 %v6185_v2, %v6184_v22  ;;  %v6186_v28 = vld [vmem:[#allocation37_spill] sm:$0xff] }
 0x517   :  { %v2412_v25 = vmul.f32 1.442695, %v2391_v60  ;;  %2452 = vadd.xlane.f32.xlu1 %v5725_v62  ;;  %v3884_v6 = vpop.eup %3883  ;;  %v6166_v60 = vld [vmem:[#allocation19_spill] sm:$0xff] }
 0x518   :  { %v2363_v33 = vpop.xlane.xlu1 %2362  ;;  %v2092_v63 = vmul.f32 %v3884_v6, %v5563_v36  ;;  %v6168_v6 = vld [vmem:[#allocation21_spill] sm:$0xff] }
 0x519   :  { %3895 = vpow2.f32 %v2412_v25  ;;  %v2390_v19 = vsub.f32 %v5610_v40, %v2363_v33  ;;  %3539 = vmatpush3.xpose.msra.mxu1 %v2094_v7  ;;  %v6167_v25 = vld [vmem:[#allocation25_spill] sm:$0xff]  ;;  %v1376_v7 = vmax.f32 %v1285_v31, 0.0  ;;  %v6187_v31 = vld [vmem:[#allocation27_spill] sm:$0xff] }
 0x51a   :  { %v5731_v30 = vpop.eup %3885  ;;  %3540 = vmatprep.subr.mxu1 %v6142_v43  ;;  %v1291_v33 = vadd.f32 %v6167_v25, %v6166_v60  ;;  %v6188_v60 = vld [vmem:[#allocation38_spill] sm:$0xff]  ;;  %v6189_v25 = vld [vmem:[#allocation32_spill] sm:$0xff] }
 0x51b   :  { %v2410_v38 = vmul.f32 1.442695, %v2390_v19  ;;  %2450 = vadd.xlane.f32.xlu1 %v5731_v30  ;;  %v3888_v53 = vpop.eup %3887  ;;  %v6169_v19 = vld [vmem:[#allocation29_spill] sm:$0xff] }
 0x51c   :  { %v2361_v21 = vpop.xlane.xlu1 %2360  ;;  %v2090_v1 = vmul.f32 %v3888_v53, %v5567_v37  ;;  %v6170_v53 = vld [vmem:[#allocation23_spill] sm:$0xff] }
 0x51d   :  { %3897 = vpow2.f32 %v2410_v38  ;;  %v2389_v4 = vsub.f32 %v5614_v47, %v2361_v21  ;;  %3541 = vmatpush3.xpose.msra.mxu1 %v2092_v63  ;;  %v1297_v38 = vadd.f32 %v6169_v19, %v6168_v6  ;;  %v1429_v21 = vld [vmem:[%s6019_s7] sm:$0xf]  ;;  %v1380_v63 = vmax.f32 %v1291_v33, 0.0 }
 0x51e   :  { %v5737_v8 = vpop.eup %3889  ;;  %3542 = vmatprep.subr.mxu1 %v6142_v43  ;;  %v1357_v33 = vadd.f32 %v6189_v25, %v6188_v60 }
 0x51f   :  { %v2408_v32 = vmul.f32 1.442695, %v2389_v4  ;;  %2448 = vadd.xlane.f32.xlu1 %v5737_v8  ;;  %v3892_v50 = vpop.eup %3891  ;;  %v6171_v4 = vld [vmem:[#allocation34_spill] sm:$0xff] }
 0x520   :  { %v2359_v40 = vpop.xlane.xlu1 %2358  ;;  %v2088_v49 = vmul.f32 %v3892_v50, %v5572_v18  ;;  %v6173_v50 = vld [vmem:[#allocation39_spill] sm:$0xff] }
 0x521   :  { %3899 = vpow2.f32 %v2408_v32  ;;  %v2388_v44 = vsub.f32 %v5618_v57, %v2359_v40  ;;  %3543 = vmatpush3.xpose.msra.mxu1 %v2090_v1  ;;  %v1303_v32 = vadd.f32 %v6171_v4, %v6170_v53  ;;  %v1384_v40 = vmax.f32 %v1297_v38, 0.0  ;;  %v6172_v1 = vld [vmem:[#allocation24_spill] sm:$0xff] }
 0x522   :  { %v5743_v36 = vpop.eup %3893  ;;  %3544 = vmatprep.subr.mxu1 %v6142_v43  ;;  %v1424_v38 = vmax.f32 %v1357_v33, 0.0 }
 0x523   :  { %v2406_v42 = vmul.f32 1.442695, %v2388_v44  ;;  %2446 = vadd.xlane.f32.xlu1 %v5743_v36  ;;  %v1309_v44 = vadd.f32 %v6173_v50, %v6172_v1 }
 0x524   :  { %v2357_v47 = vpop.xlane.xlu1 %2356 }
 0x525   :  { %3901 = vpow2.f32 %v2406_v42  ;;  %v2387_v37 = vsub.f32 %v5622_v39, %v2357_v47  ;;  %3545 = vmatpush3.xpose.msra.mxu1 %v2088_v49  ;;  %v1388_v42 = vmax.f32 %v1303_v32, 0.0  ;;  %v6174_v47 = vld [vmem:[#allocation26_spill] sm:$0xff]  ;;  %v6175_v49 = vld [vmem:[#allocation41_spill] sm:$0xff]  ;;  %v1392_v41 = vmax.f32 %v1309_v44, 0.0 }
 0x526   :  { %v5751_v29 = vpop.eup %3895  ;;  %3640 = vmatprep.subr.mxu1 %v4946_v16  ;;  %v1315_v5 = vadd.f32 %v6175_v49, %v6174_v47 }
 0x527   :  { %v2404_v57 = vmul.f32 1.442695, %v2387_v37  ;;  %2444 = vadd.xlane.f32.xlu1 %v5751_v29  ;;  %v6176_v37 = vld [vmem:[#allocation28_spill] sm:$0xff] }
 0x528   :  { %v2355_v27 = vpop.xlane.xlu1 %2354  ;;  %3547 = vmatmul.mubr.f32.vlgmr.msra.gmra.mxu1 %v6148_v0 }
 0x529   :  { %3903 = vpow2.f32 %v2404_v57  ;;  %v2386_v18 = vsub.f32 %v5626_v54, %v2355_v27  ;;  %3641 = vmatpush3.msra.mxu1 %v4946_v16  ;;  %3672 = vmatprep.mubr.f32.mxu1 %v1368_v24  ;;  %v6150_v16 = vld [vmem:[#allocation2_spill] sm:$0xff]  ;;  %v1396_v24 = vmax.f32 %v1315_v5, 0.0 }
 0x52a   :  { %v5757_v34 = vpop.eup %3897  ;;  %3642 = vmatprep.subr.mxu1 %v4952_v10  ;;  %v6177_v57 = vld [vmem:[#allocation42_spill] sm:$0xff] }
 0x52b   :  { %v2402_v61 = vmul.f32 1.442695, %v2386_v18  ;;  %2442 = vadd.xlane.f32.xlu1 %v5757_v34  ;;  %3643 = vmatpush3.msra.mxu1 %v4952_v10  ;;  %v6151_v10 = vld [vmem:[#allocation3_spill] sm:$0xff]  ;;  %v1321_v27 = vadd.f32 %v6177_v57, %v6176_v37  ;;  %v6178_v18 = vld [vmem:[#allocation30_spill] sm:$0xff] }
 0x52c   :  { %3644 = vmatprep.subr.mxu1 %v4959_v3 }
 0x52d   :  { %3905 = vpow2.f32 %v2402_v61  ;;  %3645 = vmatpush3.msra.mxu1 %v4959_v3  ;;  %v6179_v61 = vld [vmem:[#allocation43_spill] sm:$0xff] }
 0x52e   :  { %v5764_v39 = vpop.eup %3899  ;;  %3646 = vmatprep.subr.mxu1 %v4966_v35 }
 0x52f   :  { %2440 = vadd.xlane.f32.xlu1 %v5764_v39  ;;  %3647 = vmatpush3.msra.mxu1 %v4966_v35  ;;  %v6154_v35 = vld [vmem:[#allocation6_spill] sm:$0xff] }
 0x530   :  { %3648 = vmatprep.subr.mxu1 %v6150_v16 }
 0x531   :  { %3649 = vmatpush3.msra.mxu1 %v6150_v16  ;;  %v1327_v16 = vadd.f32 %v6179_v61, %v6178_v18 }
 0x532   :  { %v5771_v54 = vpop.eup %3901  ;;  %3650 = vmatprep.subr.mxu1 %v6151_v10 }
 0x533   :  { %2438 = vadd.xlane.f32.xlu1 %v5771_v54  ;;  %3651 = vmatpush3.msra.mxu1 %v6151_v10  ;;  %v1400_v10 = vmax.f32 %v1321_v27, 0.0 }
 0x534   :  { %3652 = vmatprep.subr.mxu1 %v6152_v59 }
 0x535   :  { %3653 = vmatpush3.msra.mxu1 %v6152_v59  ;;  %v6180_v59 = vld [vmem:[#allocation31_spill] sm:$0xff] }
 0x536   :  { %v5778_v3 = vpop.eup %3903  ;;  %3654 = vmatprep.subr.mxu1 %v6153_v17 }
 0x537   :  { %2436 = vadd.xlane.f32.xlu1 %v5778_v3  ;;  %3655 = vmatpush3.msra.mxu1 %v6153_v17  ;;  %v6181_v17 = vld [vmem:[#allocation44_spill] sm:$0xff] }
 0x538   :  { %3656 = vmatprep.subr.mxu1 %v6154_v35 }
 0x539   :  { %3657 = vmatpush3.msra.mxu1 %v6154_v35  ;;  %v1333_v35 = vadd.f32 %v6181_v17, %v6180_v59 }
 0x53a   :  { %v5785_v13 = vpop.eup %3905  ;;  %3658 = vmatprep.subr.mxu1 %v6155_v9 }
 0x53b   :  { %2434 = vadd.xlane.f32.xlu1 %v5785_v13  ;;  %3659 = vmatpush3.msra.mxu1 %v6155_v9  ;;  %v1404_v9 = vmax.f32 %v1327_v16, 0.0 }
 0x53c   :  { %3660 = vmatprep.subr.mxu1 %v6156_v20 }
 0x53d   :  { %3661 = vmatpush3.msra.mxu1 %v6156_v20  ;;  %v6182_v20 = vld [vmem:[#allocation33_spill] sm:$0xff] }
 0x53e   :  { %3662 = vmatprep.subr.mxu1 %v6157_v56 }
 0x53f   :  { %3663 = vmatpush3.msra.mxu1 %v6157_v56  ;;  %v6183_v56 = vld [vmem:[#allocation45_spill] sm:$0xff] }
 0x540   :  { %3664 = vmatprep.subr.mxu1 %v6158_v45 }
 0x541   :  { %3665 = vmatpush3.msra.mxu1 %v6158_v45  ;;  %v1339_v45 = vadd.f32 %v6183_v56, %v6182_v20 }
 0x542   :  { %3666 = vmatprep.subr.mxu1 %v6159_v58 }
 0x543   :  { %3667 = vmatpush3.msra.mxu1 %v6159_v58  ;;  %v1408_v58 = vmax.f32 %v1333_v35, 0.0  ;;  %v1412_v52 = vmax.f32 %v1339_v45, 0.0 }
 0x544   :  { %3668 = vmatprep.subr.mxu1 %v6164_v23 }
 0x545   :  { %3669 = vmatpush3.msra.mxu1 %v6164_v23  ;;  %v1351_v23 = vadd.f32 %v6187_v31, %v6186_v28 }
 0x546   :  { %3670 = vmatprep.subr.mxu1 %v6165_v14 }
 0x547   :  { %3671 = vmatpush3.msra.mxu1 %v6165_v14  ;;  %v1362_v14 = vpop.f32.mrf.mxu1  ;;  %v1420_v19 = vmax.f32 %v1351_v23, 0.0 }
 0x548   :  { %3673 = vmatmul.mubr.f32.vlgmr.msra.gmra.mxu1 %v1372_v15  ;;  %3696 = vmatprep.subr.mxu1 %v6142_v43  ;;  %v1416_v15 = vmax.f32 %v1345_v46, 0.0 }
 0x549   :  { %3675 = vmatprep.mubr.f32.mxu1 %v1376_v7  ;;  %v6190_v7 = vld [vmem:[#allocation40_spill] sm:$0xff] }
 0x54a   :  { %v1363_v6 = vadd.f32 %v1362_v14, %v6190_v7  ;;  %v1811_v14 = vld [vmem:[%s6020_s8] sm:$0xf] }
 0x54c   :  { %1737 = vperm.xlu1 %3746, %v1429_v21   ;;  %3676 = vmatmul.mubr.f32.gmra.mxu1 %v1380_v63  ;;  %v1428_v21 = vmax.f32 %v1363_v6, 0.0 }
 0x54d   :  { %3678 = vmatprep.mubr.f32.mxu1 %v1384_v40 }
 0x550   :  { %3679 = vmatmul.mubr.f32.gmra.mxu1 %v1388_v42 }
 0x551   :  { %3681 = vmatprep.mubr.f32.mxu1 %v1392_v41 }
 0x554   :  { %3682 = vmatmul.mubr.f32.gmra.mxu1 %v1396_v24 }
 0x555   :  { %3684 = vmatprep.mubr.f32.mxu1 %v1400_v10 }
 0x558   :  { %3685 = vmatmul.mubr.f32.gmra.mxu1 %v1404_v9 }
 0x559   :  { %3687 = vmatprep.mubr.f32.mxu1 %v1408_v58 }
 0x55c   :  { %3688 = vmatmul.mubr.f32.gmra.mxu1 %v1412_v52 }
 0x55d   :  { %3690 = vmatprep.mubr.f32.mxu1 %v1416_v15 }
 0x560   :  { %3691 = vmatmul.mubr.f32.gmra.mxu1 %v1420_v19  ;;  %v2190_v19 = vld [vmem:[%s6020_s8 + $0x4] sm:$0xf] }
 0x561   :  { %3693 = vmatprep.mubr.f32.mxu1 %v1424_v38 }
 0x564   :  { %3694 = vmatmul.mubr.f32.gmra.mxu1 %v1428_v21 }
 0x565   :  { %3728 = vmatprep.mubr.msk.f32.mxu1 %vm4006_vm2, %v6142_v43 }
 0x588   :  { %v2465_v63 = vpop.xlane.xlu1 %2464 }
 0x589   :  { %3907 = vrcp.f32 %v2465_v63 }
 0x58c   :  { %v2463_v53 = vpop.xlane.xlu1 %2462 }
 0x58d   :  { %3909 = vrcp.f32 %v2463_v53 }
 0x590   :  { %v2461_v4 = vpop.xlane.xlu1 %2460 }
 0x591   :  { %3911 = vrcp.f32 %v2461_v4 }
 0x594   :  { %v2459_v32 = vpop.xlane.xlu1 %2458 }
 0x595   :  { %3913 = vrcp.f32 %v2459_v32 }
 0x596   :  { %v3908_v40 = vpop.eup %3907 }
 0x597   :  { %v2497_v1 = vmul.f32 %v3908_v40, %v5686_v11 }
 0x598   :  { %v2457_v50 = vpop.xlane.xlu1 %2456 }
 0x599   :  { %3915 = vrcp.f32 %v2457_v50  ;;  %3606 = vmatpush3.xpose.msra.mxu0 %v2497_v1 }
 0x59a   :  { %v3910_v44 = vpop.eup %3909  ;;  %3607 = vmatprep.subr.mxu0 %v6142_v43 }
 0x59b   :  { %v2495_v42 = vmul.f32 %v3910_v44, %v5693_v48 }
 0x59c   :  { %v2455_v47 = vpop.xlane.xlu1 %2454 }
 0x59d   :  { %3917 = vrcp.f32 %v2455_v47  ;;  %3608 = vmatpush3.xpose.msra.mxu0 %v2495_v42 }
 0x59e   :  { %v3912_v49 = vpop.eup %3911  ;;  %3609 = vmatprep.subr.mxu0 %v6142_v43 }
 0x59f   :  { %v2493_v5 = vmul.f32 %v3912_v49, %v5699_v26 }
 0x5a0   :  { %v2453_v41 = vpop.xlane.xlu1 %2452 }
 0x5a1   :  { %3919 = vrcp.f32 %v2453_v41  ;;  %3610 = vmatpush3.xpose.msra.mxu0 %v2493_v5 }
 0x5a2   :  { %v3914_v11 = vpop.eup %3913  ;;  %3611 = vmatprep.subr.mxu0 %v6142_v43 }
 0x5a3   :  { %v2491_v37 = vmul.f32 %v3914_v11, %v5706_v55 }
 0x5a4   :  { %v2451_v57 = vpop.xlane.xlu1 %2450 }
 0x5a5   :  { %3921 = vrcp.f32 %v2451_v57  ;;  %3612 = vmatpush3.xpose.msra.mxu0 %v2491_v37 }
 0x5a6   :  { %v3916_v48 = vpop.eup %3915  ;;  %3613 = vmatprep.subr.mxu0 %v6142_v43 }
 0x5a7   :  { %v2489_v27 = vmul.f32 %v3916_v48, %v5712_v12 }
 0x5a8   :  { %v2449_v24 = vpop.xlane.xlu1 %2448  ;;  %v1806_v18 = vpop.f32.mrf.mxu1 }
 0x5a9   :  { %3923 = vrcp.f32 %v2449_v24  ;;  %3614 = vmatpush3.xpose.msra.mxu0 %v2489_v27 }
 0x5aa   :  { %v3918_v26 = vpop.eup %3917  ;;  %3615 = vmatprep.subr.mxu0 %v6142_v43  ;;  %v3457_v61 = vpop.f32.mrf.mxu1 }
 0x5ab   :  { %v2487_v16 = vmul.f32 %v3918_v26, %v5719_v51 }
 0x5ac   :  { %v2447_v10 = vpop.xlane.xlu1 %2446 }
 0x5ad   :  { %3925 = vrcp.f32 %v2447_v10  ;;  %3616 = vmatpush3.xpose.msra.mxu0 %v2487_v16 }
 0x5ae   :  { %v3920_v55 = vpop.eup %3919  ;;  %3617 = vmatprep.subr.mxu0 %v6142_v43 }
 0x5af   :  { %v2485_v59 = vmul.f32 %v3920_v55, %v5725_v62 }
 0x5b0   :  { %v2445_v17 = vpop.xlane.xlu1 %2444 }
 0x5b1   :  { %3927 = vrcp.f32 %v2445_v17  ;;  %3618 = vmatpush3.xpose.msra.mxu0 %v2485_v59 }
 0x5b2   :  { %v3922_v12 = vpop.eup %3921  ;;  %3619 = vmatprep.subr.mxu0 %v6142_v43 }
 0x5b3   :  { %v2483_v35 = vmul.f32 %v3922_v12, %v5731_v30 }
 0x5b4   :  { %v2443_v9 = vpop.xlane.xlu1 %2442 }
 0x5b5   :  { %3929 = vrcp.f32 %v2443_v9  ;;  %3620 = vmatpush3.xpose.msra.mxu0 %v2483_v35 }
 0x5b6   :  { %v3924_v51 = vpop.eup %3923  ;;  %3621 = vmatprep.subr.mxu0 %v6142_v43 }
 0x5b7   :  { %v2481_v20 = vmul.f32 %v3924_v51, %v5737_v8 }
 0x5b8   :  { %v2441_v56 = vpop.xlane.xlu1 %2440 }
 0x5b9   :  { %3931 = vrcp.f32 %v2441_v56  ;;  %3622 = vmatpush3.xpose.msra.mxu0 %v2481_v20 }
 0x5ba   :  { %v3926_v62 = vpop.eup %3925  ;;  %3623 = vmatprep.subr.mxu0 %v6142_v43 }
 0x5bb   :  { %v2479_v45 = vmul.f32 %v3926_v62, %v5743_v36  ;;  %v2569_v62 = vld [vmem:[%s6020_s8 + $0x8] sm:$0xf] }
 0x5bc   :  { %v2439_v58 = vpop.xlane.xlu1 %2438 }
 0x5bd   :  { %3933 = vrcp.f32 %v2439_v58  ;;  %3624 = vmatpush3.xpose.msra.mxu0 %v2479_v45 }
 0x5be   :  { %v3928_v30 = vpop.eup %3927  ;;  %3625 = vmatprep.subr.mxu0 %v6142_v43 }
 0x5bf   :  { %v2477_v22 = vmul.f32 %v3928_v30, %v5751_v29 }
 0x5c0   :  { %v2437_v2 = vpop.xlane.xlu1 %2436 }
 0x5c1   :  { %3935 = vrcp.f32 %v2437_v2  ;;  %3626 = vmatpush3.xpose.msra.mxu0 %v2477_v22 }
 0x5c2   :  { %v3930_v8 = vpop.eup %3929  ;;  %3627 = vmatprep.subr.mxu0 %v6142_v43 }
 0x5c3   :  { %v2475_v46 = vmul.f32 %v3930_v8, %v5757_v34 }
 0x5c4   :  { %v2435_v52 = vpop.xlane.xlu1 %2434 }
 0x5c5   :  { %3937 = vrcp.f32 %v2435_v52  ;;  %3628 = vmatpush3.xpose.msra.mxu0 %v2475_v46 }
 0x5c6   :  { %v3932_v36 = vpop.eup %3931  ;;  %3629 = vmatprep.subr.mxu0 %v6142_v43 }
 0x5c7   :  { %v2473_v28 = vmul.f32 %v3932_v36, %v5764_v39 }
 0x5c8   :  { %v5863_v31 = vpop.permute.xlu1 %1737 }
 0x5c9   :  { %v1807_v29 = vadd.f32 %v1806_v18, %v5863_v31  ;;  %3630 = vmatpush3.xpose.msra.mxu0 %v2473_v28 }
 0x5ca   :  { %v3934_v23 = vpop.eup %3933  ;;  %3631 = vmatprep.subr.mxu0 %v6142_v43 }
 0x5cb   :  { %v1810_v34 = vmax.f32 %v1807_v29, 0.0  ;;  %v2471_v15 = vmul.f32 %v3934_v23, %v5771_v54 }
 0x5cd   :  { %v1812_v60 = vadd.f32 %v1811_v14, %v1810_v34  ;;  %3632 = vmatpush3.xpose.msra.mxu0 %v2471_v15 }
 0x5ce   :  { %v3936_v25 = vpop.eup %3935  ;;  %3633 = vmatprep.subr.mxu0 %v6142_v43 }
 0x5cf   :  { %1813 = vst [vmem:[%s6021_s9] sm:$0xf] %v1812_v60  ;;  %v2469_v39 = vmul.f32 %v3936_v25, %v5778_v3 }
 0x5d1   :  { %3634 = vmatpush3.xpose.msra.mxu0 %v2469_v39 }
 0x5d2   :  { %v3938_v33 = vpop.eup %3937  ;;  %3635 = vmatprep.subr.mxu0 %v6142_v43 }
 0x5d3   :  { %v2467_v7 = vmul.f32 %v3938_v33, %v5785_v13 }
 0x5d5   :  { %3636 = vmatpush3.xpose.msra.mxu0 %v2467_v7 }
 0x5d8   :  { %3638 = vmatmul.mubr.f32.vlgmr.msra.gmra.mxu0 %v6148_v0 }
 0x5e8   :  { %v2185_v54 = vpop.f32.mrf.mxu1 }
 0x5e9   :  { %v2186_v6 = vadd.f32 %v2185_v54, %v5863_v31 }
 0x5ea   :  { %v3548_v38 = vpop.f32.mrf.mxu1 }
 0x5eb   :  { %v2189_v21 = vmax.f32 %v2186_v6, 0.0 }
 0x5ed   :  { %v2191_v63 = vadd.f32 %v2190_v19, %v2189_v21 }
 0x5ef   :  { %2192 = vst [vmem:[%s6021_s9 + $0x4] sm:$0xf] %v2191_v63 }
 0x608   :  { %v3674_v3 = vpop.f32.mrf.mxu1 }
 0x609   :  { %v5904_v9 = vmul.f32 0.0078125, %v3674_v3 }
 0x60a   :  { %v2638_v53 = vpop.f32.mrf.mxu1 }
 0x60b   :  { %v5907_v51 = vmul.f32 0.0078125, %v2638_v53 }
 0x60c   :  { %v3677_v13 = vpop.f32.mrf.mxu1 }
 0x60d   :  { %v5898_v12 = vmul.f32 0.0078125, %v3677_v13 }
 0x60e   :  { %v2648_v4 = vpop.f32.mrf.mxu1 }
 0x60f   :  { %v5901_v35 = vmul.f32 0.0078125, %v2648_v4 }
 0x610   :  { %v3680_v32 = vpop.f32.mrf.mxu1 }
 0x611   :  { %v5892_v59 = vmul.f32 0.0078125, %v3680_v32 }
 0x612   :  { %v2658_v40 = vpop.f32.mrf.mxu1 }
 0x613   :  { %v5895_v17 = vmul.f32 0.0078125, %v2658_v40 }
 0x614   :  { %v3683_v1 = vpop.f32.mrf.mxu1 }
 0x615   :  { %v5886_v10 = vmul.f32 0.0078125, %v3683_v1 }
 0x616   :  { %v2668_v50 = vpop.f32.mrf.mxu1 }
 0x617   :  { %v5889_v55 = vmul.f32 0.0078125, %v2668_v50 }
 0x618   :  { %v3686_v44 = vpop.f32.mrf.mxu1 }
 0x619   :  { %v2726_v61 = vmul.f32 0.0078125, %v3686_v44 }
 0x61a   :  { %v2678_v42 = vpop.f32.mrf.mxu1 }
 0x61b   :  { %v2725_v16 = vmul.f32 0.0078125, %v2678_v42 }
 0x61c   :  { %v3689_v47 = vpop.f32.mrf.mxu1 }
 0x61d   :  { %v2728_v18 = vmul.f32 0.0078125, %v3689_v47 }
 0x61e   :  { %v2688_v49 = vpop.f32.mrf.mxu1 }
 0x61f   :  { %v2727_v26 = vmul.f32 0.0078125, %v2688_v49 }
 0x620   :  { %v3692_v5 = vpop.f32.mrf.mxu1 }
 0x621   :  { %v2730_v27 = vmul.f32 0.0078125, %v3692_v5 }
 0x622   :  { %v2698_v41 = vpop.f32.mrf.mxu1 }
 0x623   :  { %v2729_v24 = vmul.f32 0.0078125, %v2698_v41 }
 0x624   :  { %v3695_v11 = vpop.f32.mrf.mxu1 }
 0x625   :  { %v2732_v37 = vmul.f32 0.0078125, %v3695_v11 }
 0x626   :  { %v2708_v57 = vpop.f32.mrf.mxu1 }
 0x627   :  { %2763 = vmax.xlane.f32.xlu0 %v2732_v37  ;;  %v2731_v48 = vmul.f32 0.0078125, %v2708_v57 }
 0x62b   :  { %2761 = vmax.xlane.f32.xlu0 %v2731_v48 }
 0x62f   :  { %2759 = vmax.xlane.f32.xlu0 %v2730_v27 }
 0x633   :  { %2757 = vmax.xlane.f32.xlu0 %v2729_v24 }
 0x637   :  { %2755 = vmax.xlane.f32.xlu0 %v2728_v18 }
 0x63b   :  { %2753 = vmax.xlane.f32.xlu0 %v2727_v26 }
 0x63f   :  { %2751 = vmax.xlane.f32.xlu0 %v2726_v61 }
 0x643   :  { %2749 = vmax.xlane.f32.xlu0 %v2725_v16 }
 0x647   :  { %2747 = vmax.xlane.f32.xlu0 %v5886_v10 }
 0x64b   :  { %2745 = vmax.xlane.f32.xlu0 %v5889_v55 }
 0x64f   :  { %2743 = vmax.xlane.f32.xlu0 %v5892_v59 }
 0x653   :  { %2741 = vmax.xlane.f32.xlu0 %v5895_v17 }
 0x657   :  { %2739 = vmax.xlane.f32.xlu0 %v5898_v12 }
 0x65b   :  { %2737 = vmax.xlane.f32.xlu0 %v5901_v35 }
 0x65f   :  { %2735 = vmax.xlane.f32.xlu0 %v5904_v9 }
 0x663   :  { %2733 = vmax.xlane.f32.xlu0 %v5907_v51 }
 0x698   :  { %v2564_v20 = vpop.f32.mrf.mxu0 }
 0x699   :  { %v2565_v56 = vadd.f32 %v2564_v20, %v5863_v31 }
 0x69a   :  { %v3639_v45 = vpop.f32.mrf.mxu0 }
 0x69b   :  { %v2568_v58 = vmax.f32 %v2565_v56, 0.0 }
 0x69d   :  { %v2570_v30 = vadd.f32 %v2569_v62, %v2568_v58 }
 0x69f   :  { %2571 = vst [vmem:[%s6021_s9 + $0x8] sm:$0xf] %v2570_v30 }
 0x6b0   :  { %v2764_v22 = vpop.xlane.xlu0 %2763 }
 0x6b1   :  { %v2780_v2 = vsub.f32 %v2732_v37, %v2764_v22 }
 0x6b3   :  { %v2811_v8 = vmul.f32 1.442695, %v2780_v2 }
 0x6b4   :  { %v2762_v46 = vpop.xlane.xlu0 %2761 }
 0x6b5   :  { %3939 = vpow2.f32 %v2811_v8  ;;  %v2779_v52 = vsub.f32 %v2731_v48, %v2762_v46 }
 0x6b7   :  { %v2809_v36 = vmul.f32 1.442695, %v2779_v52 }
 0x6b8   :  { %v2760_v28 = vpop.xlane.xlu0 %2759 }
 0x6b9   :  { %3941 = vpow2.f32 %v2809_v36  ;;  %v2778_v29 = vsub.f32 %v2730_v27, %v2760_v28 }
 0x6bb   :  { %v2807_v23 = vmul.f32 1.442695, %v2778_v29 }
 0x6bc   :  { %v2758_v14 = vpop.xlane.xlu0 %2757 }
 0x6bd   :  { %3943 = vpow2.f32 %v2807_v23  ;;  %v2777_v34 = vsub.f32 %v2729_v24, %v2758_v14 }
 0x6bf   :  { %v2805_v15 = vmul.f32 1.442695, %v2777_v34 }
 0x6c0   :  { %v2756_v60 = vpop.xlane.xlu0 %2755 }
 0x6c1   :  { %3945 = vpow2.f32 %v2805_v15  ;;  %v2776_v25 = vsub.f32 %v2728_v18, %v2756_v60 }
 0x6c2   :  { %v5917_v39 = vpop.eup %3939 }
 0x6c3   :  { %v2803_v33 = vmul.f32 1.442695, %v2776_v25  ;;  %2843 = vadd.xlane.f32.xlu0 %v5917_v39 }
 0x6c4   :  { %v2754_v7 = vpop.xlane.xlu0 %2753 }
 0x6c5   :  { %3947 = vpow2.f32 %v2803_v33  ;;  %v2775_v54 = vsub.f32 %v2727_v26, %v2754_v7 }
 0x6c6   :  { %v5920_v6 = vpop.eup %3941 }
 0x6c7   :  { %v2801_v19 = vmul.f32 1.442695, %v2775_v54  ;;  %2841 = vadd.xlane.f32.xlu0 %v5920_v6 }
 0x6c8   :  { %v2752_v38 = vpop.xlane.xlu0 %2751 }
 0x6c9   :  { %3949 = vpow2.f32 %v2801_v19  ;;  %v2774_v21 = vsub.f32 %v2726_v61, %v2752_v38 }
 0x6ca   :  { %v5923_v63 = vpop.eup %3943 }
 0x6cb   :  { %v2799_v3 = vmul.f32 1.442695, %v2774_v21  ;;  %2839 = vadd.xlane.f32.xlu0 %v5923_v63 }
 0x6cc   :  { %v2750_v53 = vpop.xlane.xlu0 %2749 }
 0x6cd   :  { %3951 = vpow2.f32 %v2799_v3  ;;  %v2773_v13 = vsub.f32 %v2725_v16, %v2750_v53 }
 0x6ce   :  { %v5926_v4 = vpop.eup %3945 }
 0x6cf   :  { %v2797_v32 = vmul.f32 1.442695, %v2773_v13  ;;  %2837 = vadd.xlane.f32.xlu0 %v5926_v4 }
 0x6d0   :  { %v2748_v40 = vpop.xlane.xlu0 %2747 }
 0x6d1   :  { %3953 = vpow2.f32 %v2797_v32  ;;  %v2772_v1 = vsub.f32 %v5886_v10, %v2748_v40 }
 0x6d2   :  { %v5930_v50 = vpop.eup %3947 }
 0x6d3   :  { %v2795_v44 = vmul.f32 1.442695, %v2772_v1  ;;  %2835 = vadd.xlane.f32.xlu0 %v5930_v50 }
 0x6d4   :  { %v2746_v42 = vpop.xlane.xlu0 %2745 }
 0x6d5   :  { %3955 = vpow2.f32 %v2795_v44  ;;  %v2771_v47 = vsub.f32 %v5889_v55, %v2746_v42 }
 0x6d6   :  { %v5934_v49 = vpop.eup %3949 }
 0x6d7   :  { %v2793_v5 = vmul.f32 1.442695, %v2771_v47  ;;  %2833 = vadd.xlane.f32.xlu0 %v5934_v49 }
 0x6d8   :  { %v2744_v41 = vpop.xlane.xlu0 %2743 }
 0x6d9   :  { %3957 = vpow2.f32 %v2793_v5  ;;  %v2770_v11 = vsub.f32 %v5892_v59, %v2744_v41 }
 0x6da   :  { %v5938_v37 = vpop.eup %3951 }
 0x6db   :  { %v2791_v57 = vmul.f32 1.442695, %v2770_v11  ;;  %2831 = vadd.xlane.f32.xlu0 %v5938_v37 }
 0x6dc   :  { %v2742_v48 = vpop.xlane.xlu0 %2741 }
 0x6dd   :  { %3959 = vpow2.f32 %v2791_v57  ;;  %v2769_v27 = vsub.f32 %v5895_v17, %v2742_v48 }
 0x6de   :  { %v5942_v24 = vpop.eup %3953 }
 0x6df   :  { %v2789_v18 = vmul.f32 1.442695, %v2769_v27  ;;  %2829 = vadd.xlane.f32.xlu0 %v5942_v24 }
 0x6e0   :  { %v2740_v26 = vpop.xlane.xlu0 %2739 }
 0x6e1   :  { %3961 = vpow2.f32 %v2789_v18  ;;  %v2768_v61 = vsub.f32 %v5898_v12, %v2740_v26 }
 0x6e2   :  { %v5946_v16 = vpop.eup %3955 }
 0x6e3   :  { %v2787_v10 = vmul.f32 1.442695, %v2768_v61  ;;  %2827 = vadd.xlane.f32.xlu0 %v5946_v16 }
 0x6e4   :  { %v2738_v55 = vpop.xlane.xlu0 %2737 }
 0x6e5   :  { %3963 = vpow2.f32 %v2787_v10  ;;  %v2767_v59 = vsub.f32 %v5901_v35, %v2738_v55 }
 0x6e6   :  { %v5950_v20 = vpop.eup %3957 }
 0x6e7   :  { %v2785_v17 = vmul.f32 1.442695, %v2767_v59  ;;  %2825 = vadd.xlane.f32.xlu0 %v5950_v20 }
 0x6e8   :  { %v2736_v56 = vpop.xlane.xlu0 %2735 }
 0x6e9   :  { %3965 = vpow2.f32 %v2785_v17  ;;  %v2766_v62 = vsub.f32 %v5904_v9, %v2736_v56 }
 0x6ea   :  { %v5954_v45 = vpop.eup %3959 }
 0x6eb   :  { %v2783_v12 = vmul.f32 1.442695, %v2766_v62  ;;  %2823 = vadd.xlane.f32.xlu0 %v5954_v45  ;;  %v2948_v62 = vld [vmem:[%s6020_s8 + $0xc] sm:$0xf] }
 0x6ec   :  { %v2734_v58 = vpop.xlane.xlu0 %2733 }
 0x6ed   :  { %3967 = vpow2.f32 %v2783_v12  ;;  %v2765_v30 = vsub.f32 %v5907_v51, %v2734_v58 }
 0x6ee   :  { %v5958_v22 = vpop.eup %3961 }
 0x6ef   :  { %v2781_v35 = vmul.f32 1.442695, %v2765_v30  ;;  %2821 = vadd.xlane.f32.xlu0 %v5958_v22 }
 0x6f1   :  { %3969 = vpow2.f32 %v2781_v35 }
 0x6f2   :  { %v5961_v2 = vpop.eup %3963 }
 0x6f3   :  { %2819 = vadd.xlane.f32.xlu0 %v5961_v2 }
 0x6f6   :  { %v5964_v9 = vpop.eup %3965 }
 0x6f7   :  { %2817 = vadd.xlane.f32.xlu0 %v5964_v9 }
 0x6fa   :  { %v5967_v8 = vpop.eup %3967 }
 0x6fb   :  { %2815 = vadd.xlane.f32.xlu0 %v5967_v8 }
 0x6fe   :  { %v5970_v46 = vpop.eup %3969 }
 0x6ff   :  { %2813 = vadd.xlane.f32.xlu0 %v5970_v46 }
 0x74c   :  { %v2844_v51 = vpop.xlane.xlu0 %2843 }
 0x74d   :  { %3971 = vrcp.f32 %v2844_v51 }
 0x750   :  { %v2842_v52 = vpop.xlane.xlu0 %2841 }
 0x751   :  { %3973 = vrcp.f32 %v2842_v52 }
 0x754   :  { %v2840_v36 = vpop.xlane.xlu0 %2839 }
 0x755   :  { %3975 = vrcp.f32 %v2840_v36 }
 0x758   :  { %v2838_v28 = vpop.xlane.xlu0 %2837 }
 0x759   :  { %3977 = vrcp.f32 %v2838_v28 }
 0x75a   :  { %v3972_v29 = vpop.eup %3971 }
 0x75b   :  { %v2876_v23 = vmul.f32 %v3972_v29, %v5917_v39 }
 0x75c   :  { %v2836_v14 = vpop.xlane.xlu0 %2835 }
 0x75d   :  { %3979 = vrcp.f32 %v2836_v14  ;;  %3697 = vmatpush3.xpose.msra.mxu1 %v2876_v23 }
 0x75e   :  { %v3974_v34 = vpop.eup %3973  ;;  %3698 = vmatprep.subr.mxu1 %v6142_v43 }
 0x75f   :  { %v2874_v15 = vmul.f32 %v3974_v34, %v5920_v6 }
 0x760   :  { %v2834_v60 = vpop.xlane.xlu0 %2833 }
 0x761   :  { %3981 = vrcp.f32 %v2834_v60  ;;  %3699 = vmatpush3.xpose.msra.mxu1 %v2874_v15 }
 0x762   :  { %v3976_v25 = vpop.eup %3975  ;;  %3700 = vmatprep.subr.mxu1 %v6142_v43 }
 0x763   :  { %v2872_v33 = vmul.f32 %v3976_v25, %v5923_v63 }
 0x764   :  { %v2832_v7 = vpop.xlane.xlu0 %2831 }
 0x765   :  { %3983 = vrcp.f32 %v2832_v7  ;;  %3701 = vmatpush3.xpose.msra.mxu1 %v2872_v33 }
 0x766   :  { %v3978_v39 = vpop.eup %3977  ;;  %3702 = vmatprep.subr.mxu1 %v6142_v43 }
 0x767   :  { %v2870_v54 = vmul.f32 %v3978_v39, %v5926_v4 }
 0x768   :  { %v2830_v19 = vpop.xlane.xlu0 %2829 }
 0x769   :  { %3985 = vrcp.f32 %v2830_v19  ;;  %3703 = vmatpush3.xpose.msra.mxu1 %v2870_v54 }
 0x76a   :  { %v3980_v6 = vpop.eup %3979  ;;  %3704 = vmatprep.subr.mxu1 %v6142_v43 }
 0x76b   :  { %v2868_v38 = vmul.f32 %v3980_v6, %v5930_v50 }
 0x76c   :  { %v2828_v21 = vpop.xlane.xlu0 %2827 }
 0x76d   :  { %3987 = vrcp.f32 %v2828_v21  ;;  %3705 = vmatpush3.xpose.msra.mxu1 %v2868_v38 }
 0x76e   :  { %v3982_v63 = vpop.eup %3981  ;;  %3706 = vmatprep.subr.mxu1 %v6142_v43 }
 0x76f   :  { %v2866_v3 = vmul.f32 %v3982_v63, %v5934_v49 }
 0x770   :  { %v2826_v53 = vpop.xlane.xlu0 %2825 }
 0x771   :  { %3989 = vrcp.f32 %v2826_v53  ;;  %3707 = vmatpush3.xpose.msra.mxu1 %v2866_v3 }
 0x772   :  { %v3984_v13 = vpop.eup %3983  ;;  %3708 = vmatprep.subr.mxu1 %v6142_v43 }
 0x773   :  { %v2864_v4 = vmul.f32 %v3984_v13, %v5938_v37 }
 0x774   :  { %v2824_v32 = vpop.xlane.xlu0 %2823 }
 0x775   :  { %3991 = vrcp.f32 %v2824_v32  ;;  %3709 = vmatpush3.xpose.msra.mxu1 %v2864_v4 }
 0x776   :  { %v3986_v40 = vpop.eup %3985  ;;  %3710 = vmatprep.subr.mxu1 %v6142_v43 }
 0x777   :  { %v2862_v1 = vmul.f32 %v3986_v40, %v5942_v24 }
 0x778   :  { %v2822_v50 = vpop.xlane.xlu0 %2821 }
 0x779   :  { %3993 = vrcp.f32 %v2822_v50  ;;  %3711 = vmatpush3.xpose.msra.mxu1 %v2862_v1 }
 0x77a   :  { %v3988_v44 = vpop.eup %3987  ;;  %3712 = vmatprep.subr.mxu1 %v6142_v43 }
 0x77b   :  { %v2860_v42 = vmul.f32 %v3988_v44, %v5946_v16 }
 0x77c   :  { %v2820_v47 = vpop.xlane.xlu0 %2819 }
 0x77d   :  { %3995 = vrcp.f32 %v2820_v47  ;;  %3713 = vmatpush3.xpose.msra.mxu1 %v2860_v42 }
 0x77e   :  { %v3990_v49 = vpop.eup %3989  ;;  %3714 = vmatprep.subr.mxu1 %v6142_v43 }
 0x77f   :  { %v2858_v5 = vmul.f32 %v3990_v49, %v5950_v20 }
 0x780   :  { %v2818_v41 = vpop.xlane.xlu0 %2817 }
 0x781   :  { %3997 = vrcp.f32 %v2818_v41  ;;  %3715 = vmatpush3.xpose.msra.mxu1 %v2858_v5 }
 0x782   :  { %v3992_v11 = vpop.eup %3991  ;;  %3716 = vmatprep.subr.mxu1 %v6142_v43 }
 0x783   :  { %v2856_v37 = vmul.f32 %v3992_v11, %v5954_v45 }
 0x784   :  { %v2816_v57 = vpop.xlane.xlu0 %2815 }
 0x785   :  { %3999 = vrcp.f32 %v2816_v57  ;;  %3717 = vmatpush3.xpose.msra.mxu1 %v2856_v37 }
 0x786   :  { %v3994_v48 = vpop.eup %3993  ;;  %3718 = vmatprep.subr.mxu1 %v6142_v43 }
 0x787   :  { %v2854_v27 = vmul.f32 %v3994_v48, %v5958_v22 }
 0x788   :  { %v2814_v24 = vpop.xlane.xlu0 %2813 }
 0x789   :  { %4001 = vrcp.f32 %v2814_v24  ;;  %3719 = vmatpush3.xpose.msra.mxu1 %v2854_v27 }
 0x78a   :  { %v3996_v18 = vpop.eup %3995  ;;  %3720 = vmatprep.subr.mxu1 %v6142_v43 }
 0x78b   :  { %v2852_v26 = vmul.f32 %v3996_v18, %v5961_v2 }
 0x78d   :  { %3721 = vmatpush3.xpose.msra.mxu1 %v2852_v26 }
 0x78e   :  { %v3998_v61 = vpop.eup %3997  ;;  %3722 = vmatprep.subr.mxu1 %v6142_v43 }
 0x78f   :  { %v2850_v16 = vmul.f32 %v3998_v61, %v5964_v9 }
 0x791   :  { %3723 = vmatpush3.xpose.msra.mxu1 %v2850_v16 }
 0x792   :  { %v4000_v10 = vpop.eup %3999  ;;  %3724 = vmatprep.subr.mxu1 %v6142_v43 }
 0x793   :  { %v2848_v55 = vmul.f32 %v4000_v10, %v5967_v8 }
 0x795   :  { %3725 = vmatpush3.xpose.msra.mxu1 %v2848_v55 }
 0x796   :  { %v4002_v59 = vpop.eup %4001  ;;  %3726 = vmatprep.subr.mxu1 %v6142_v43 }
 0x797   :  { %v2846_v20 = vmul.f32 %v4002_v59, %v5970_v46 }
 0x799   :  { %3727 = vmatpush3.xpose.msra.mxu1 %v2846_v20 }
 0x79c   :  { %3729 = vmatmul.mubr.f32.vlgmr.msra.gmra.mxu1 %v6148_v0 }
 0x85c   :  { %v2943_v17 = vpop.f32.mrf.mxu1 }
 0x85d   :  { %v2944_v56 = vadd.f32 %v2943_v17, %v5863_v31 }
 0x85e   :  { %v3730_v45 = vpop.f32.mrf.mxu1 }
 0x85f   :  { %v2947_v12 = vmax.f32 %v2944_v56, 0.0 }
 0x861   :  { %v2949_v58 = vadd.f32 %v2948_v62, %v2947_v12 }
 0x863   :  { %2950 = vst [vmem:[%s6021_s9 + $0xc] sm:$0xf] %v2949_v58 }

</bundles_post_ra>
